<compile_context>
chip_gen: v6e
topology: v6e:2x2x1
jax: 0.10.0
libtpu: 0.0.40
codegen_flags: <defaults>
</compile_context>

<pallas_src>
import functools

import jax
import jax.numpy as jnp
from jax import lax
from jax.experimental import pallas as pl
from jax.experimental.pallas import tpu as pltpu

ACT_DTYPE = jnp.bfloat16   # set to jnp.float32 to run the whole module in f32


def _round_up(v, m):
    return ((v + m - 1) // m) * m


def _pick_tile_h(h_total, target=32):
    """Largest divisor of H that is <= target and leaves >= 2 H-tiles."""
    divs = [d for d in range(1, h_total + 1) if h_total % d == 0]
    good = [d for d in divs if d <= target and h_total // d >= 2]
    return max(good) if good else h_total


# ----------------------------- kernel helpers --------------------------------

def _fill_xpad(xpad_ref, xc_ref, xt_ref, xb_ref, *, th, w, c0):
    """Build the zero-padded (th+2, W_PAD, Cin) input tile in VMEM."""
    h = pl.program_id(1)
    nh = pl.num_programs(1)
    xpad_ref[...] = jnp.zeros_like(xpad_ref)
    # interior: rows 1..th, columns 1..w
    xpad_ref[pl.ds(1, th), pl.ds(1, w), :] = xc_ref[0, :, :, c0:]
    # one-row halos (zeroed at the image border)
    top = xt_ref[0, :, :, c0:]
    bot = xb_ref[0, :, :, c0:]
    xpad_ref[pl.ds(0, 1), pl.ds(1, w), :] = jnp.where(
        h > 0, top, jnp.zeros_like(top))
    xpad_ref[pl.ds(th + 1, 1), pl.ds(1, w), :] = jnp.where(
        h < nh - 1, bot, jnp.zeros_like(bot))


def _conv3x3_epilogue(xpad_ref, w_ref, b_ref, *, th, w, w_pad):
    """3x3 conv on the padded tile + folded-BN bias + ReLU; f32 (th, w, Cout)."""
    cin = xpad_ref.shape[-1]
    cout = w_ref.shape[-1]
    # Three contiguous (th*w_pad, cin) operands, one per ky (w_pad % 8 == 0 so
    # the reshape is layout preserving) -- shared by all kx taps.
    slabs = [xpad_ref[pl.ds(ky, th), :, :].reshape(th * w_pad, cin)
             for ky in range(3)]
    out = None
    for kx in range(3):
        # Chained accumulation: init from the first dot (no zero-fill + add).
        acc = jnp.dot(slabs[0], w_ref[0, kx], preferred_element_type=jnp.float32)
        acc = acc + jnp.dot(slabs[1], w_ref[1, kx],
                            preferred_element_type=jnp.float32)
        acc = acc + jnp.dot(slabs[2], w_ref[2, kx],
                            preferred_element_type=jnp.float32)
        acc = acc.reshape(th, w_pad, cout)[:, kx:kx + w, :]   # kx shift on output
        out = acc if out is None else out + acc
    out = out + b_ref[0].astype(jnp.float32)
    return jnp.maximum(out, 0.0)


# ------------------------------- kernels --------------------------------------

def _dual_conv_kernel(xc_ref, xt_ref, xb_ref, w_ref, b_ref, y1_ref, y2_ref,
                      xpad_ref, *, th, w, w_pad, c_split):
    """Two convs sharing the same input tile (weights concatenated on Cout)."""
    _fill_xpad(xpad_ref, xc_ref, xt_ref, xb_ref, th=th, w=w, c0=0)
    y = _conv3x3_epilogue(xpad_ref, w_ref, b_ref, th=th, w=w, w_pad=w_pad)
    y1_ref[0] = y[:, :, :c_split].astype(y1_ref.dtype)
    y2_ref[0] = y[:, :, c_split:].astype(y2_ref.dtype)


def _single_conv_kernel(xc_ref, xt_ref, xb_ref, w_ref, b_ref, y_ref,
                        xpad_ref, *, th, w, w_pad):
    _fill_xpad(xpad_ref, xc_ref, xt_ref, xb_ref, th=th, w=w, c0=0)
    y = _conv3x3_epilogue(xpad_ref, w_ref, b_ref, th=th, w=w, w_pad=w_pad)
    y_ref[0] = y.astype(y_ref.dtype)


def _final_conv_concat_kernel(x23c_ref, x23t_ref, x23b_ref, y1_ref, w_ref,
                              b_ref, o_ref, xpad_ref, *, th, w, w_pad, ch):
    """Last conv (x3_ -> x3) fused with assembling out = relu(cat(x1,x2,x3))."""
    # Conv input x3_ lives in channels [ch:2ch] of the fused stage-2 output.
    _fill_xpad(xpad_ref, x23c_ref, x23t_ref, x23b_ref, th=th, w=w, c0=ch)
    y3 = _conv3x3_epilogue(xpad_ref, w_ref, b_ref, th=th, w=w, w_pad=w_pad)
    # Lane-dense assembly of the concatenated output block (2C = 4*ch channels).
    o_ref[0, :, :, 0:2 * ch] = y1_ref[0].astype(o_ref.dtype)                     # x1
    o_ref[0, :, :, 2 * ch:3 * ch] = x23c_ref[0, :, :, 0:ch].astype(o_ref.dtype)  # x2
    o_ref[0, :, :, 3 * ch:4 * ch] = y3.astype(o_ref.dtype)                       # x3


# ------------------------------ pallas wrappers --------------------------------

def _halo_in_specs(H, W, C, th):
    """Current tile + clamped one-row halos (no host padding, no manual DMA)."""
    cur = pl.BlockSpec((1, th, W, C), lambda n, h: (n, h, 0, 0))
    top = pl.BlockSpec((1, 1, W, C),
                       lambda n, h: (n, jnp.maximum(h * th - 1, 0), 0, 0))
    bot = pl.BlockSpec((1, 1, W, C),
                       lambda n, h: (n, jnp.minimum((h + 1) * th, H - 1), 0, 0))
    return cur, top, bot


def fused_conv3x3_bn_relu(x, w, b, out_channels, *, out_dtype=None, tile_h=None):
    """3x3/s1/p1 conv + folded-BN bias + ReLU in NHWC.

    `w` may hold several convs concatenated along Cout; `out_channels` gives the
    channel split of the returned tensors (1 or 2 entries).
    """
    N, H, W, Cin = x.shape
    Ct = w.shape[-1]
    assert sum(out_channels) == Ct
    out_dtype = out_dtype or x.dtype
    th = tile_h or _pick_tile_h(H)
    nh = H // th
    w_pad = _round_up(W + 2, 8)

    cur, top, bot = _halo_in_specs(H, W, Cin, th)
    w_spec = pl.BlockSpec((3, 3, Cin, Ct), lambda n, h: (0, 0, 0, 0))
    b_spec = pl.BlockSpec((1, Ct), lambda n, h: (0, 0))
    out_specs = [pl.BlockSpec((1, th, W, c), lambda n, h: (n, h, 0, 0))
                 for c in out_channels]
    out_shapes = [jax.ShapeDtypeStruct((N, H, W, c), out_dtype)
                  for c in out_channels]

    if len(out_channels) == 1:
        kernel = functools.partial(_single_conv_kernel, th=th, w=W, w_pad=w_pad)
        out_shape, out_spec = out_shapes[0], out_specs[0]
    else:
        kernel = functools.partial(_dual_conv_kernel, th=th, w=W, w_pad=w_pad,
                                   c_split=out_channels[0])
        out_shape, out_spec = tuple(out_shapes), out_specs

    return pl.pallas_call(
        kernel,
        out_shape=out_shape,
        grid=(N, nh),
        in_specs=[cur, top, bot, w_spec, b_spec],
        out_specs=out_spec,
        scratch_shapes=[pltpu.VMEM((th + 2, w_pad, Cin), x.dtype)],
        compiler_params=pltpu.CompilerParams(
            dimension_semantics=("parallel", "parallel")),
    )(x, x, x, w, b)


def final_conv_concat(y1, y23, w, b, *, tile_h=None):
    """Stage 3: conv on x3_ plus in-kernel assembly of relu(cat(x1, x2, x3))."""
    N, H, W, C = y23.shape          # y23 = [x2 | x3_], C == module in_channels
    ch = C // 2
    th = tile_h or _pick_tile_h(H)
    nh = H // th
    w_pad = _round_up(W + 2, 8)

    cur, top, bot = _halo_in_specs(H, W, C, th)
    y1_spec = pl.BlockSpec((1, th, W, C), lambda n, h: (n, h, 0, 0))
    w_spec = pl.BlockSpec((3, 3, ch, ch), lambda n, h: (0, 0, 0, 0))
    b_spec = pl.BlockSpec((1, ch), lambda n, h: (0, 0))
    o_spec = pl.BlockSpec((1, th, W, 2 * C), lambda n, h: (n, h, 0, 0))

    return pl.pallas_call(
        functools.partial(_final_conv_concat_kernel,
                          th=th, w=W, w_pad=w_pad, ch=ch),
        out_shape=jax.ShapeDtypeStruct((N, H, W, 2 * C), jnp.float32),
        grid=(N, nh),
        in_specs=[cur, top, bot, y1_spec, w_spec, b_spec],
        out_specs=o_spec,
        scratch_shapes=[pltpu.VMEM((th + 2, w_pad, ch), y23.dtype)],
        compiler_params=pltpu.CompilerParams(
            dimension_semantics=("parallel", "parallel")),
    )(y23, y23, y23, y1, w, b)


# --------------------------- parameters / module -------------------------------

def _fold_conv_bn(p, *, eps=1e-5, dtype=ACT_DTYPE):
    """Fold eval-mode BN into the conv: w' = w*scale (cast), b' = (b-mean)*scale+beta."""
    scale = p["gamma"] / jnp.sqrt(p["var"] + eps)
    w = (p["w"] * scale[None, None, None, :]).astype(dtype)
    b = ((p["b"] - p["mean"]) * scale + p["beta"]).astype(jnp.float32)
    return w, b


def prepare_params(params, *, dtype=ACT_DTYPE):
    w1, b1 = _fold_conv_bn(params["det_conv1"], dtype=dtype)
    wc1, bc1 = _fold_conv_bn(params["det_context_conv1"], dtype=dtype)
    w2, b2 = _fold_conv_bn(params["det_context_conv2"], dtype=dtype)
    w31, b31 = _fold_conv_bn(params["det_context_conv3_1"], dtype=dtype)
    w32, b32 = _fold_conv_bn(params["det_context_conv3_2"], dtype=dtype)
    return {
        "w_s1": jnp.concatenate([w1, wc1], axis=-1),    # x  -> [x1 | x_ ]
        "b_s1": jnp.concatenate([b1, bc1])[None, :],
        "w_s2": jnp.concatenate([w2, w31], axis=-1),    # x_ -> [x2 | x3_]
        "b_s2": jnp.concatenate([b2, b31])[None, :],
        "w_s3": w32,                                    # x3_ -> x3
        "b_s3": b32[None, :],
    }


def context_module(x_nchw, params):
    """Pallas ContextModule.forward (eval-mode BN), NCHW in / NCHW out."""
    # NCHW <-> NHWC only at the module boundary; drop these if the caller is NHWC.
    x = jnp.transpose(x_nchw, (0, 2, 3, 1)).astype(ACT_DTYPE)
    C = x.shape[-1]
    p = prepare_params(params)
    y1, yu = fused_conv3x3_bn_relu(x, p["w_s1"], p["b_s1"], (C, C // 2))
    y23 = fused_conv3x3_bn_relu(yu, p["w_s2"], p["b_s2"], (C,))
    out = final_conv_concat(y1, y23, p["w_s3"], p["b_s3"])
    return jnp.transpose(out, (0, 3, 1, 2))


def make_params(key, in_channels=8):
    """Deterministic synthetic parameters (same shapes as the PyTorch module)."""
    c, h = in_channels, in_channels // 2
    layer_shapes = {
        "det_conv1": (c, c),
        "det_context_conv1": (c, h),
        "det_context_conv2": (h, h),
        "det_context_conv3_1": (h, h),
        "det_context_conv3_2": (h, h),
    }
    params = {}
    for name, (cin, cout) in layer_shapes.items():
        key, k1, k2, k3, k4, k5, k6 = jax.random.split(key, 7)
        params[name] = {
            "w": 0.2 * jax.random.normal(k1, (3, 3, cin, cout), jnp.float32),
            "b": 0.1 * jax.random.normal(k2, (cout,), jnp.float32),
            "gamma": 1.0 + 0.1 * jax.random.normal(k3, (cout,), jnp.float32),
            "beta": 0.1 * jax.random.normal(k4, (cout,), jnp.float32),
            "mean": 0.1 * jax.random.normal(k5, (cout,), jnp.float32),
            "var": jnp.abs(1.0 + 0.1 * jax.random.normal(k6, (cout,), jnp.float32)),
        }
    return params


# ----------------- pure-JAX reference (same bf16/f32 numerics) -----------------

def _ref_conv(x, w, b, *, out_lowp=True):
    y = lax.conv_general_dilated(
        x, w, window_strides=(1, 1), padding="SAME",
        dimension_numbers=("NHWC", "HWIO", "NHWC"),
        preferred_element_type=jnp.float32)
    y = jnp.maximum(y + b, 0.0)
    return y.astype(ACT_DTYPE) if out_lowp else y


def context_module_ref(x_nchw, params):
    x = jnp.transpose(x_nchw, (0, 2, 3, 1)).astype(ACT_DTYPE)
    w1, b1 = _fold_conv_bn(params["det_conv1"])
    wc1, bc1 = _fold_conv_bn(params["det_context_conv1"])
    w2, b2 = _fold_conv_bn(params["det_context_conv2"])
    w31, b31 = _fold_conv_bn(params["det_context_conv3_1"])
    w32, b32 = _fold_conv_bn(params["det_context_conv3_2"])
    x1 = _ref_conv(x, w1, b1)
    x_ = _ref_conv(x, wc1, bc1)
    x2 = _ref_conv(x_, w2, b2)
    x3_ = _ref_conv(x_, w31, b31)
    x3 = _ref_conv(x3_, w32, b32, out_lowp=False)   # kernel keeps last conv in f32
    out = jnp.concatenate(
        [x1.astype(jnp.float32), x2.astype(jnp.float32), x3], axis=-1)
    return jnp.transpose(out, (0, 3, 1, 2))


if __name__ == "__main__":
    key = jax.random.PRNGKey(0)
    kx, kp = jax.random.split(key)
    N, C, H, W = 2, 8, 16, 16            # small stand-in for in_channels=256
    x = jax.random.normal(kx, (N, C, H, W), jnp.float32)
    params = make_params(kp, in_channels=C)

    out = jax.block_until_ready(jax.jit(context_module)(x, params))
    ref = context_module_ref(x, params)

    assert out.shape == (N, 2 * C, H, W), out.shape
    err = float(jnp.max(jnp.abs(out - ref)))
    assert jnp.allclose(out, ref, atol=1e-2, rtol=1e-2), f"mismatch vs ref: {err}"
    print("KERNEL_OK")
</pallas_src>

<mosaic_0001>
module attributes {stable_mosaic.version = 11 : i64} {
  func.func @_single_conv_kernel(%arg0: i32, %arg1: i32, %arg2: memref<1x8x16x4xbf16, #tpu.memory_space<vmem>>, %arg3: memref<1x1x16x4xbf16, #tpu.memory_space<vmem>>, %arg4: memref<1x1x16x4xbf16, #tpu.memory_space<vmem>>, %arg5: memref<3x3x4x8xbf16, #tpu.memory_space<vmem>>, %arg6: memref<1x8xf32, #tpu.memory_space<vmem>>, %arg7: memref<1x8x16x8xbf16, #tpu.memory_space<vmem>>, %arg8: memref<10x24x4xbf16, #tpu.memory_space<vmem>>) attributes {dimension_semantics = [#tpu.dimension_semantics<parallel>, #tpu.dimension_semantics<parallel>], iteration_bounds = array<i64: 2, 2>, scalar_prefetch = 0 : i64, scratch_operands = 1 : i64, tpu.core_type = #tpu.core_type<tc>, window_params = [{transform_indices = @transform_0, window_bounds = array<i64: 1, 8, 16, 4>}, {transform_indices = @transform_1, window_bounds = array<i64: 1, 1, 16, 4>}, {transform_indices = @transform_2, window_bounds = array<i64: 1, 1, 16, 4>}, {pipeline_mode = #tpu.pipeline_mode<synchronous>, transform_indices = @transform_3, window_bounds = array<i64: 3, 3, 4, 8>}, {pipeline_mode = #tpu.pipeline_mode<synchronous>, transform_indices = @transform_4, window_bounds = array<i64: 1, 8>}, {transform_indices = @transform_5, window_bounds = array<i64: 1, 8, 16, 8>}]} {
    %cst = arith.constant 0.000000e+00 : bf16
    %0 = vector.broadcast %cst : bf16 to vector<10x24x4xbf16>
    %c0 = arith.constant 0 : index
    %c0_0 = arith.constant 0 : index
    %c0_1 = arith.constant 0 : index
    %1 = vector.load %arg8[%c0, %c0_0, %c0_1] : memref<10x24x4xbf16, #tpu.memory_space<vmem>>, vector<10x24x4xbf16>
    tpu.vector_store %arg8[%c0, %c0_0, %c0_1], %0 {strides = array<i32>} : memref<10x24x4xbf16, #tpu.memory_space<vmem>>, vector<10x24x4xbf16>,
    %c0_2 = arith.constant 0 : index
    %c0_3 = arith.constant 0 : index
    %c0_4 = arith.constant 0 : index
    %c0_5 = arith.constant 0 : index
    %2 = vector.load %arg2[%c0_2, %c0_3, %c0_4, %c0_5] : memref<1x8x16x4xbf16, #tpu.memory_space<vmem>>, vector<1x8x16x4xbf16>
    %3 = vector.shape_cast %2 : vector<1x8x16x4xbf16> to vector<8x16x4xbf16>
    %c1 = arith.constant 1 : index
    %c1_6 = arith.constant 1 : index
    %c0_7 = arith.constant 0 : index
    %4 = vector.load %arg8[%c1, %c1_6, %c0_7] : memref<10x24x4xbf16, #tpu.memory_space<vmem>>, vector<8x16x4xbf16>
    tpu.vector_store %arg8[%c1, %c1_6, %c0_7], %3 {strides = array<i32>} : memref<10x24x4xbf16, #tpu.memory_space<vmem>>, vector<8x16x4xbf16>,
    %c0_8 = arith.constant 0 : index
    %c0_9 = arith.constant 0 : index
    %c0_10 = arith.constant 0 : index
    %c0_11 = arith.constant 0 : index
    %5 = vector.load %arg3[%c0_8, %c0_9, %c0_10, %c0_11] : memref<1x1x16x4xbf16, #tpu.memory_space<vmem>>, vector<1x1x16x4xbf16>
    %6 = vector.shape_cast %5 : vector<1x1x16x4xbf16> to vector<1x16x4xbf16>
    %c0_12 = arith.constant 0 : index
    %c0_13 = arith.constant 0 : index
    %c0_14 = arith.constant 0 : index
    %c0_15 = arith.constant 0 : index
    %7 = vector.load %arg4[%c0_12, %c0_13, %c0_14, %c0_15] : memref<1x1x16x4xbf16, #tpu.memory_space<vmem>>, vector<1x1x16x4xbf16>
    %8 = vector.shape_cast %7 : vector<1x1x16x4xbf16> to vector<1x16x4xbf16>
    %c0_i32 = arith.constant 0 : i32
    %9 = arith.cmpi sgt, %arg1, %c0_i32 : i32
    %cst_16 = arith.constant 0.000000e+00 : bf16
    %10 = vector.broadcast %cst_16 : bf16 to vector<1x16x4xbf16>
    %11 = arith.select %9, %6, %10 : vector<1x16x4xbf16>
    %c0_17 = arith.constant 0 : index
    %c1_18 = arith.constant 1 : index
    %c0_19 = arith.constant 0 : index
    %12 = vector.load %arg8[%c0_17, %c1_18, %c0_19] : memref<10x24x4xbf16, #tpu.memory_space<vmem>>, vector<1x16x4xbf16>
    tpu.vector_store %arg8[%c0_17, %c1_18, %c0_19], %11 {strides = array<i32>} : memref<10x24x4xbf16, #tpu.memory_space<vmem>>, vector<1x16x4xbf16>,
    %c1_i32 = arith.constant 1 : i32
    %13 = arith.cmpi slt, %arg1, %c1_i32 : i32
    %cst_20 = arith.constant 0.000000e+00 : bf16
    %14 = vector.broadcast %cst_20 : bf16 to vector<1x16x4xbf16>
    %15 = arith.select %13, %8, %14 : vector<1x16x4xbf16>
    %c9 = arith.constant 9 : index
    %c1_21 = arith.constant 1 : index
    %c0_22 = arith.constant 0 : index
    %16 = vector.load %arg8[%c9, %c1_21, %c0_22] : memref<10x24x4xbf16, #tpu.memory_space<vmem>>, vector<1x16x4xbf16>
    tpu.vector_store %arg8[%c9, %c1_21, %c0_22], %15 {strides = array<i32>} : memref<10x24x4xbf16, #tpu.memory_space<vmem>>, vector<1x16x4xbf16>,
    %c0_23 = arith.constant 0 : index
    %c0_24 = arith.constant 0 : index
    %c0_25 = arith.constant 0 : index
    %17 = vector.load %arg8[%c0_23, %c0_24, %c0_25] : memref<10x24x4xbf16, #tpu.memory_space<vmem>>, vector<8x24x4xbf16>
    %18 = vector.shape_cast %17 : vector<8x24x4xbf16> to vector<192x4xbf16>
    %c1_26 = arith.constant 1 : index
    %c0_27 = arith.constant 0 : index
    %c0_28 = arith.constant 0 : index
    %19 = vector.load %arg8[%c1_26, %c0_27, %c0_28] : memref<10x24x4xbf16, #tpu.memory_space<vmem>>, vector<8x24x4xbf16>
    %20 = vector.shape_cast %19 : vector<8x24x4xbf16> to vector<192x4xbf16>
    %c2 = arith.constant 2 : index
    %c0_29 = arith.constant 0 : index
    %c0_30 = arith.constant 0 : index
    %21 = vector.load %arg8[%c2, %c0_29, %c0_30] : memref<10x24x4xbf16, #tpu.memory_space<vmem>>, vector<8x24x4xbf16>
    %22 = vector.shape_cast %21 : vector<8x24x4xbf16> to vector<192x4xbf16>
    %c0_31 = arith.constant 0 : index
    %c0_32 = arith.constant 0 : index
    %c0_33 = arith.constant 0 : index
    %c0_34 = arith.constant 0 : index
    %23 = vector.load %arg5[%c0_31, %c0_32, %c0_33, %c0_34] : memref<3x3x4x8xbf16, #tpu.memory_space<vmem>>, vector<1x1x4x8xbf16>
    %24 = vector.shape_cast %23 : vector<1x1x4x8xbf16> to vector<4x8xbf16>
    %cst_35 = arith.constant dense<0.000000e+00> : vector<192x8xf32>
    %25 = tpu.matmul %18, %24, %cst_35 {dimension_numbers = #tpu.dot_dimension_numbers<[1], [0], [0], [1], [0, 0, 1, 1], [], []>} : vector<192x4xbf16>, vector<4x8xbf16>, vector<192x8xf32> -> vector<192x8xf32>
    %c1_36 = arith.constant 1 : index
    %c0_37 = arith.constant 0 : index
    %c0_38 = arith.constant 0 : index
    %c0_39 = arith.constant 0 : index
    %26 = vector.load %arg5[%c1_36, %c0_37, %c0_38, %c0_39] : memref<3x3x4x8xbf16, #tpu.memory_space<vmem>>, vector<1x1x4x8xbf16>
    %27 = vector.shape_cast %26 : vector<1x1x4x8xbf16> to vector<4x8xbf16>
    %cst_40 = arith.constant dense<0.000000e+00> : vector<192x8xf32>
    %28 = tpu.matmul %20, %27, %cst_40 {dimension_numbers = #tpu.dot_dimension_numbers<[1], [0], [0], [1], [0, 0, 1, 1], [], []>} : vector<192x4xbf16>, vector<4x8xbf16>, vector<192x8xf32> -> vector<192x8xf32>
    %29 = arith.addf %25, %28 : vector<192x8xf32>
    %c2_41 = arith.constant 2 : index
    %c0_42 = arith.constant 0 : index
    %c0_43 = arith.constant 0 : index
    %c0_44 = arith.constant 0 : index
    %30 = vector.load %arg5[%c2_41, %c0_42, %c0_43, %c0_44] : memref<3x3x4x8xbf16, #tpu.memory_space<vmem>>, vector<1x1x4x8xbf16>
    %31 = vector.shape_cast %30 : vector<1x1x4x8xbf16> to vector<4x8xbf16>
    %cst_45 = arith.constant dense<0.000000e+00> : vector<192x8xf32>
    %32 = tpu.matmul %22, %31, %cst_45 {dimension_numbers = #tpu.dot_dimension_numbers<[1], [0], [0], [1], [0, 0, 1, 1], [], []>} : vector<192x4xbf16>, vector<4x8xbf16>, vector<192x8xf32> -> vector<192x8xf32>
    %33 = arith.addf %29, %32 : vector<192x8xf32>
    %34 = vector.shape_cast %33 : vector<192x8xf32> to vector<8x24x8xf32>
    %35 = vector.extract_strided_slice %34 {offsets = [0, 0, 0], sizes = [8, 16, 8], strides = [1, 1, 1]} : vector<8x24x8xf32> to vector<8x16x8xf32>
    %c0_46 = arith.constant 0 : index
    %c1_47 = arith.constant 1 : index
    %c0_48 = arith.constant 0 : index
    %c0_49 = arith.constant 0 : index
    %36 = vector.load %arg5[%c0_46, %c1_47, %c0_48, %c0_49] : memref<3x3x4x8xbf16, #tpu.memory_space<vmem>>, vector<1x1x4x8xbf16>
    %37 = vector.shape_cast %36 : vector<1x1x4x8xbf16> to vector<4x8xbf16>
    %cst_50 = arith.constant dense<0.000000e+00> : vector<192x8xf32>
    %38 = tpu.matmul %18, %37, %cst_50 {dimension_numbers = #tpu.dot_dimension_numbers<[1], [0], [0], [1], [0, 0, 1, 1], [], []>} : vector<192x4xbf16>, vector<4x8xbf16>, vector<192x8xf32> -> vector<192x8xf32>
    %c1_51 = arith.constant 1 : index
    %c1_52 = arith.constant 1 : index
    %c0_53 = arith.constant 0 : index
    %c0_54 = arith.constant 0 : index
    %39 = vector.load %arg5[%c1_51, %c1_52, %c0_53, %c0_54] : memref<3x3x4x8xbf16, #tpu.memory_space<vmem>>, vector<1x1x4x8xbf16>
    %40 = vector.shape_cast %39 : vector<1x1x4x8xbf16> to vector<4x8xbf16>
    %cst_55 = arith.constant dense<0.000000e+00> : vector<192x8xf32>
    %41 = tpu.matmul %20, %40, %cst_55 {dimension_numbers = #tpu.dot_dimension_numbers<[1], [0], [0], [1], [0, 0, 1, 1], [], []>} : vector<192x4xbf16>, vector<4x8xbf16>, vector<192x8xf32> -> vector<192x8xf32>
    %42 = arith.addf %38, %41 : vector<192x8xf32>
    %c2_56 = arith.constant 2 : index
    %c1_57 = arith.constant 1 : index
    %c0_58 = arith.constant 0 : index
    %c0_59 = arith.constant 0 : index
    %43 = vector.load %arg5[%c2_56, %c1_57, %c0_58, %c0_59] : memref<3x3x4x8xbf16, #tpu.memory_space<vmem>>, vector<1x1x4x8xbf16>
    %44 = vector.shape_cast %43 : vector<1x1x4x8xbf16> to vector<4x8xbf16>
    %cst_60 = arith.constant dense<0.000000e+00> : vector<192x8xf32>
    %45 = tpu.matmul %22, %44, %cst_60 {dimension_numbers = #tpu.dot_dimension_numbers<[1], [0], [0], [1], [0, 0, 1, 1], [], []>} : vector<192x4xbf16>, vector<4x8xbf16>, vector<192x8xf32> -> vector<192x8xf32>
    %46 = arith.addf %42, %45 : vector<192x8xf32>
    %47 = vector.shape_cast %46 : vector<192x8xf32> to vector<8x24x8xf32>
    %48 = vector.extract_strided_slice %47 {offsets = [0, 1, 0], sizes = [8, 16, 8], strides = [1, 1, 1]} : vector<8x24x8xf32> to vector<8x16x8xf32>
    %49 = arith.addf %35, %48 : vector<8x16x8xf32>
    %c0_61 = arith.constant 0 : index
    %c2_62 = arith.constant 2 : index
    %c0_63 = arith.constant 0 : index
    %c0_64 = arith.constant 0 : index
    %50 = vector.load %arg5[%c0_61, %c2_62, %c0_63, %c0_64] : memref<3x3x4x8xbf16, #tpu.memory_space<vmem>>, vector<1x1x4x8xbf16>
    %51 = vector.shape_cast %50 : vector<1x1x4x8xbf16> to vector<4x8xbf16>
    %cst_65 = arith.constant dense<0.000000e+00> : vector<192x8xf32>
    %52 = tpu.matmul %18, %51, %cst_65 {dimension_numbers = #tpu.dot_dimension_numbers<[1], [0], [0], [1], [0, 0, 1, 1], [], []>} : vector<192x4xbf16>, vector<4x8xbf16>, vector<192x8xf32> -> vector<192x8xf32>
    %c1_66 = arith.constant 1 : index
    %c2_67 = arith.constant 2 : index
    %c0_68 = arith.constant 0 : index
    %c0_69 = arith.constant 0 : index
    %53 = vector.load %arg5[%c1_66, %c2_67, %c0_68, %c0_69] : memref<3x3x4x8xbf16, #tpu.memory_space<vmem>>, vector<1x1x4x8xbf16>
    %54 = vector.shape_cast %53 : vector<1x1x4x8xbf16> to vector<4x8xbf16>
    %cst_70 = arith.constant dense<0.000000e+00> : vector<192x8xf32>
    %55 = tpu.matmul %20, %54, %cst_70 {dimension_numbers = #tpu.dot_dimension_numbers<[1], [0], [0], [1], [0, 0, 1, 1], [], []>} : vector<192x4xbf16>, vector<4x8xbf16>, vector<192x8xf32> -> vector<192x8xf32>
    %56 = arith.addf %52, %55 : vector<192x8xf32>
    %c2_71 = arith.constant 2 : index
    %c2_72 = arith.constant 2 : index
    %c0_73 = arith.constant 0 : index
    %c0_74 = arith.constant 0 : index
    %57 = vector.load %arg5[%c2_71, %c2_72, %c0_73, %c0_74] : memref<3x3x4x8xbf16, #tpu.memory_space<vmem>>, vector<1x1x4x8xbf16>
    %58 = vector.shape_cast %57 : vector<1x1x4x8xbf16> to vector<4x8xbf16>
    %cst_75 = arith.constant dense<0.000000e+00> : vector<192x8xf32>
    %59 = tpu.matmul %22, %58, %cst_75 {dimension_numbers = #tpu.dot_dimension_numbers<[1], [0], [0], [1], [0, 0, 1, 1], [], []>} : vector<192x4xbf16>, vector<4x8xbf16>, vector<192x8xf32> -> vector<192x8xf32>
    %60 = arith.addf %56, %59 : vector<192x8xf32>
    %61 = vector.shape_cast %60 : vector<192x8xf32> to vector<8x24x8xf32>
    %62 = vector.extract_strided_slice %61 {offsets = [0, 2, 0], sizes = [8, 16, 8], strides = [1, 1, 1]} : vector<8x24x8xf32> to vector<8x16x8xf32>
    %63 = arith.addf %49, %62 : vector<8x16x8xf32>
    %c0_76 = arith.constant 0 : index
    %c0_77 = arith.constant 0 : index
    %64 = vector.load %arg6[%c0_76, %c0_77] : memref<1x8xf32, #tpu.memory_space<vmem>>, vector<1x8xf32>
    %65 = vector.shape_cast %64 : vector<1x8xf32> to vector<8xf32>
    %66 = vector.shape_cast %65 : vector<8xf32> to vector<1x1x8xf32>
    %67 = vector.broadcast %66 : vector<1x1x8xf32> to vector<8x16x8xf32>
    %68 = arith.addf %63, %67 : vector<8x16x8xf32>
    %cst_78 = arith.constant 0.000000e+00 : f32
    %69 = vector.broadcast %cst_78 : f32 to vector<8x16x8xf32>
    %70 = arith.maximumf %68, %69 : vector<8x16x8xf32>
    %71 = arith.truncf %70 : vector<8x16x8xf32> to vector<8x16x8xbf16>
    %c0_79 = arith.constant 0 : index
    %c0_80 = arith.constant 0 : index
    %c0_81 = arith.constant 0 : index
    %c0_82 = arith.constant 0 : index
    %72 = vector.load %arg7[%c0_79, %c0_80, %c0_81, %c0_82] : memref<1x8x16x8xbf16, #tpu.memory_space<vmem>>, vector<1x8x16x8xbf16>
    %73 = vector.shape_cast %72 : vector<1x8x16x8xbf16> to vector<8x16x8xbf16>
    %74 = vector.shape_cast %71 : vector<8x16x8xbf16> to vector<1x8x16x8xbf16>
    tpu.vector_store %arg7[%c0_79, %c0_80, %c0_81, %c0_82], %74 {strides = array<i32>} : memref<1x8x16x8xbf16, #tpu.memory_space<vmem>>, vector<1x8x16x8xbf16>,
    return
  }
  func.func @transform_0(%arg0: i32, %arg1: i32) -> (i32, i32, i32, i32) {
    %c0_i32 = arith.constant 0 : i32
    %c0_i32_0 = arith.constant 0 : i32
    %c0_i32_1 = arith.constant 0 : i32
    return %arg0, %arg1, %c0_i32, %c0_i32_0 : i32, i32, i32, i32
  }
  func.func @transform_1(%arg0: i32, %arg1: i32) -> (i32, i32, i32, i32) {
    %c8_i32 = arith.constant 8 : i32
    %0 = arith.muli %arg1, %c8_i32 : i32
    %c1_i32 = arith.constant 1 : i32
    %1 = arith.subi %0, %c1_i32 : i32
    %c0_i32 = arith.constant 0 : i32
    %2 = arith.maxsi %1, %c0_i32 : i32
    %c0_i32_0 = arith.constant 0 : i32
    %c0_i32_1 = arith.constant 0 : i32
    %c0_i32_2 = arith.constant 0 : i32
    return %arg0, %2, %c0_i32_0, %c0_i32_1 : i32, i32, i32, i32
  }
  func.func @transform_2(%arg0: i32, %arg1: i32) -> (i32, i32, i32, i32) {
    %c1_i32 = arith.constant 1 : i32
    %0 = arith.addi %arg1, %c1_i32 : i32
    %c8_i32 = arith.constant 8 : i32
    %1 = arith.muli %0, %c8_i32 : i32
    %c15_i32 = arith.constant 15 : i32
    %2 = arith.minsi %1, %c15_i32 : i32
    %c0_i32 = arith.constant 0 : i32
    %c0_i32_0 = arith.constant 0 : i32
    %c0_i32_1 = arith.constant 0 : i32
    return %arg0, %2, %c0_i32, %c0_i32_0 : i32, i32, i32, i32
  }
  func.func @transform_3(%arg0: i32, %arg1: i32) -> (i32, i32, i32, i32) {
    %c0_i32 = arith.constant 0 : i32
    %c0_i32_0 = arith.constant 0 : i32
    %c0_i32_1 = arith.constant 0 : i32
    %c0_i32_2 = arith.constant 0 : i32
    %c0_i32_3 = arith.constant 0 : i32
    return %c0_i32, %c0_i32_0, %c0_i32_1, %c0_i32_2 : i32, i32, i32, i32
  }
  func.func @transform_4(%arg0: i32, %arg1: i32) -> (i32, i32) {
    %c0_i32 = arith.constant 0 : i32
    %c0_i32_0 = arith.constant 0 : i32
    %c0_i32_1 = arith.constant 0 : i32
    return %c0_i32, %c0_i32_0 : i32, i32
  }
  func.func @transform_5(%arg0: i32, %arg1: i32) -> (i32, i32, i32, i32) {
    %c0_i32 = arith.constant 0 : i32
    %c0_i32_0 = arith.constant 0 : i32
    %c0_i32_1 = arith.constant 0 : i32
    return %arg0, %arg1, %c0_i32, %c0_i32_0 : i32, i32, i32, i32
  }
}

module attributes {stable_mosaic.version = 11 : i64} {
  func.func @_dual_conv_kernel(%arg0: i32, %arg1: i32, %arg2: memref<1x8x16x8xbf16, #tpu.memory_space<vmem>>, %arg3: memref<1x1x16x8xbf16, #tpu.memory_space<vmem>>, %arg4: memref<1x1x16x8xbf16, #tpu.memory_space<vmem>>, %arg5: memref<3x3x8x12xbf16, #tpu.memory_space<vmem>>, %arg6: memref<1x12xf32, #tpu.memory_space<vmem>>, %arg7: memref<1x8x16x8xbf16, #tpu.memory_space<vmem>>, %arg8: memref<1x8x16x4xbf16, #tpu.memory_space<vmem>>, %arg9: memref<10x24x8xbf16, #tpu.memory_space<vmem>>) attributes {dimension_semantics = [#tpu.dimension_semantics<parallel>, #tpu.dimension_semantics<parallel>], iteration_bounds = array<i64: 2, 2>, scalar_prefetch = 0 : i64, scratch_operands = 1 : i64, tpu.core_type = #tpu.core_type<tc>, window_params = [{transform_indices = @transform_0, window_bounds = array<i64: 1, 8, 16, 8>}, {transform_indices = @transform_1, window_bounds = array<i64: 1, 1, 16, 8>}, {transform_indices = @transform_2, window_bounds = array<i64: 1, 1, 16, 8>}, {pipeline_mode = #tpu.pipeline_mode<synchronous>, transform_indices = @transform_3, window_bounds = array<i64: 3, 3, 8, 12>}, {pipeline_mode = #tpu.pipeline_mode<synchronous>, transform_indices = @transform_4, window_bounds = array<i64: 1, 12>}, {transform_indices = @transform_5, window_bounds = array<i64: 1, 8, 16, 8>}, {transform_indices = @transform_6, window_bounds = array<i64: 1, 8, 16, 4>}]} {
    %cst = arith.constant 0.000000e+00 : bf16
    %0 = vector.broadcast %cst : bf16 to vector<10x24x8xbf16>
    %c0 = arith.constant 0 : index
    %c0_0 = arith.constant 0 : index
    %c0_1 = arith.constant 0 : index
    %1 = vector.load %arg9[%c0, %c0_0, %c0_1] : memref<10x24x8xbf16, #tpu.memory_space<vmem>>, vector<10x24x8xbf16>
    tpu.vector_store %arg9[%c0, %c0_0, %c0_1], %0 {strides = array<i32>} : memref<10x24x8xbf16, #tpu.memory_space<vmem>>, vector<10x24x8xbf16>,
    %c0_2 = arith.constant 0 : index
    %c0_3 = arith.constant 0 : index
    %c0_4 = arith.constant 0 : index
    %c0_5 = arith.constant 0 : index
    %2 = vector.load %arg2[%c0_2, %c0_3, %c0_4, %c0_5] : memref<1x8x16x8xbf16, #tpu.memory_space<vmem>>, vector<1x8x16x8xbf16>
    %3 = vector.shape_cast %2 : vector<1x8x16x8xbf16> to vector<8x16x8xbf16>
    %c1 = arith.constant 1 : index
    %c1_6 = arith.constant 1 : index
    %c0_7 = arith.constant 0 : index
    %4 = vector.load %arg9[%c1, %c1_6, %c0_7] : memref<10x24x8xbf16, #tpu.memory_space<vmem>>, vector<8x16x8xbf16>
    tpu.vector_store %arg9[%c1, %c1_6, %c0_7], %3 {strides = array<i32>} : memref<10x24x8xbf16, #tpu.memory_space<vmem>>, vector<8x16x8xbf16>,
    %c0_8 = arith.constant 0 : index
    %c0_9 = arith.constant 0 : index
    %c0_10 = arith.constant 0 : index
    %c0_11 = arith.constant 0 : index
    %5 = vector.load %arg3[%c0_8, %c0_9, %c0_10, %c0_11] : memref<1x1x16x8xbf16, #tpu.memory_space<vmem>>, vector<1x1x16x8xbf16>
    %6 = vector.shape_cast %5 : vector<1x1x16x8xbf16> to vector<1x16x8xbf16>
    %c0_12 = arith.constant 0 : index
    %c0_13 = arith.constant 0 : index
    %c0_14 = arith.constant 0 : index
    %c0_15 = arith.constant 0 : index
    %7 = vector.load %arg4[%c0_12, %c0_13, %c0_14, %c0_15] : memref<1x1x16x8xbf16, #tpu.memory_space<vmem>>, vector<1x1x16x8xbf16>
    %8 = vector.shape_cast %7 : vector<1x1x16x8xbf16> to vector<1x16x8xbf16>
    %c0_i32 = arith.constant 0 : i32
    %9 = arith.cmpi sgt, %arg1, %c0_i32 : i32
    %cst_16 = arith.constant 0.000000e+00 : bf16
    %10 = vector.broadcast %cst_16 : bf16 to vector<1x16x8xbf16>
    %11 = arith.select %9, %6, %10 : vector<1x16x8xbf16>
    %c0_17 = arith.constant 0 : index
    %c1_18 = arith.constant 1 : index
    %c0_19 = arith.constant 0 : index
    %12 = vector.load %arg9[%c0_17, %c1_18, %c0_19] : memref<10x24x8xbf16, #tpu.memory_space<vmem>>, vector<1x16x8xbf16>
    tpu.vector_store %arg9[%c0_17, %c1_18, %c0_19], %11 {strides = array<i32>} : memref<10x24x8xbf16, #tpu.memory_space<vmem>>, vector<1x16x8xbf16>,
    %c1_i32 = arith.constant 1 : i32
    %13 = arith.cmpi slt, %arg1, %c1_i32 : i32
    %cst_20 = arith.constant 0.000000e+00 : bf16
    %14 = vector.broadcast %cst_20 : bf16 to vector<1x16x8xbf16>
    %15 = arith.select %13, %8, %14 : vector<1x16x8xbf16>
    %c9 = arith.constant 9 : index
    %c1_21 = arith.constant 1 : index
    %c0_22 = arith.constant 0 : index
    %16 = vector.load %arg9[%c9, %c1_21, %c0_22] : memref<10x24x8xbf16, #tpu.memory_space<vmem>>, vector<1x16x8xbf16>
    tpu.vector_store %arg9[%c9, %c1_21, %c0_22], %15 {strides = array<i32>} : memref<10x24x8xbf16, #tpu.memory_space<vmem>>, vector<1x16x8xbf16>,
    %c0_23 = arith.constant 0 : index
    %c0_24 = arith.constant 0 : index
    %c0_25 = arith.constant 0 : index
    %17 = vector.load %arg9[%c0_23, %c0_24, %c0_25] : memref<10x24x8xbf16, #tpu.memory_space<vmem>>, vector<8x24x8xbf16>
    %18 = vector.shape_cast %17 : vector<8x24x8xbf16> to vector<192x8xbf16>
    %c1_26 = arith.constant 1 : index
    %c0_27 = arith.constant 0 : index
    %c0_28 = arith.constant 0 : index
    %19 = vector.load %arg9[%c1_26, %c0_27, %c0_28] : memref<10x24x8xbf16, #tpu.memory_space<vmem>>, vector<8x24x8xbf16>
    %20 = vector.shape_cast %19 : vector<8x24x8xbf16> to vector<192x8xbf16>
    %c2 = arith.constant 2 : index
    %c0_29 = arith.constant 0 : index
    %c0_30 = arith.constant 0 : index
    %21 = vector.load %arg9[%c2, %c0_29, %c0_30] : memref<10x24x8xbf16, #tpu.memory_space<vmem>>, vector<8x24x8xbf16>
    %22 = vector.shape_cast %21 : vector<8x24x8xbf16> to vector<192x8xbf16>
    %c0_31 = arith.constant 0 : index
    %c0_32 = arith.constant 0 : index
    %c0_33 = arith.constant 0 : index
    %c0_34 = arith.constant 0 : index
    %23 = vector.load %arg5[%c0_31, %c0_32, %c0_33, %c0_34] : memref<3x3x8x12xbf16, #tpu.memory_space<vmem>>, vector<1x1x8x12xbf16>
    %24 = vector.shape_cast %23 : vector<1x1x8x12xbf16> to vector<8x12xbf16>
    %cst_35 = arith.constant dense<0.000000e+00> : vector<192x12xf32>
    %25 = tpu.matmul %18, %24, %cst_35 {dimension_numbers = #tpu.dot_dimension_numbers<[1], [0], [0], [1], [0, 0, 1, 1], [], []>} : vector<192x8xbf16>, vector<8x12xbf16>, vector<192x12xf32> -> vector<192x12xf32>
    %c1_36 = arith.constant 1 : index
    %c0_37 = arith.constant 0 : index
    %c0_38 = arith.constant 0 : index
    %c0_39 = arith.constant 0 : index
    %26 = vector.load %arg5[%c1_36, %c0_37, %c0_38, %c0_39] : memref<3x3x8x12xbf16, #tpu.memory_space<vmem>>, vector<1x1x8x12xbf16>
    %27 = vector.shape_cast %26 : vector<1x1x8x12xbf16> to vector<8x12xbf16>
    %cst_40 = arith.constant dense<0.000000e+00> : vector<192x12xf32>
    %28 = tpu.matmul %20, %27, %cst_40 {dimension_numbers = #tpu.dot_dimension_numbers<[1], [0], [0], [1], [0, 0, 1, 1], [], []>} : vector<192x8xbf16>, vector<8x12xbf16>, vector<192x12xf32> -> vector<192x12xf32>
    %29 = arith.addf %25, %28 : vector<192x12xf32>
    %c2_41 = arith.constant 2 : index
    %c0_42 = arith.constant 0 : index
    %c0_43 = arith.constant 0 : index
    %c0_44 = arith.constant 0 : index
    %30 = vector.load %arg5[%c2_41, %c0_42, %c0_43, %c0_44] : memref<3x3x8x12xbf16, #tpu.memory_space<vmem>>, vector<1x1x8x12xbf16>
    %31 = vector.shape_cast %30 : vector<1x1x8x12xbf16> to vector<8x12xbf16>
    %cst_45 = arith.constant dense<0.000000e+00> : vector<192x12xf32>
    %32 = tpu.matmul %22, %31, %cst_45 {dimension_numbers = #tpu.dot_dimension_numbers<[1], [0], [0], [1], [0, 0, 1, 1], [], []>} : vector<192x8xbf16>, vector<8x12xbf16>, vector<192x12xf32> -> vector<192x12xf32>
    %33 = arith.addf %29, %32 : vector<192x12xf32>
    %34 = vector.shape_cast %33 : vector<192x12xf32> to vector<8x24x12xf32>
    %35 = vector.extract_strided_slice %34 {offsets = [0, 0, 0], sizes = [8, 16, 12], strides = [1, 1, 1]} : vector<8x24x12xf32> to vector<8x16x12xf32>
    %c0_46 = arith.constant 0 : index
    %c1_47 = arith.constant 1 : index
    %c0_48 = arith.constant 0 : index
    %c0_49 = arith.constant 0 : index
    %36 = vector.load %arg5[%c0_46, %c1_47, %c0_48, %c0_49] : memref<3x3x8x12xbf16, #tpu.memory_space<vmem>>, vector<1x1x8x12xbf16>
    %37 = vector.shape_cast %36 : vector<1x1x8x12xbf16> to vector<8x12xbf16>
    %cst_50 = arith.constant dense<0.000000e+00> : vector<192x12xf32>
    %38 = tpu.matmul %18, %37, %cst_50 {dimension_numbers = #tpu.dot_dimension_numbers<[1], [0], [0], [1], [0, 0, 1, 1], [], []>} : vector<192x8xbf16>, vector<8x12xbf16>, vector<192x12xf32> -> vector<192x12xf32>
    %c1_51 = arith.constant 1 : index
    %c1_52 = arith.constant 1 : index
    %c0_53 = arith.constant 0 : index
    %c0_54 = arith.constant 0 : index
    %39 = vector.load %arg5[%c1_51, %c1_52, %c0_53, %c0_54] : memref<3x3x8x12xbf16, #tpu.memory_space<vmem>>, vector<1x1x8x12xbf16>
    %40 = vector.shape_cast %39 : vector<1x1x8x12xbf16> to vector<8x12xbf16>
    %cst_55 = arith.constant dense<0.000000e+00> : vector<192x12xf32>
    %41 = tpu.matmul %20, %40, %cst_55 {dimension_numbers = #tpu.dot_dimension_numbers<[1], [0], [0], [1], [0, 0, 1, 1], [], []>} : vector<192x8xbf16>, vector<8x12xbf16>, vector<192x12xf32> -> vector<192x12xf32>
    %42 = arith.addf %38, %41 : vector<192x12xf32>
    %c2_56 = arith.constant 2 : index
    %c1_57 = arith.constant 1 : index
    %c0_58 = arith.constant 0 : index
    %c0_59 = arith.constant 0 : index
    %43 = vector.load %arg5[%c2_56, %c1_57, %c0_58, %c0_59] : memref<3x3x8x12xbf16, #tpu.memory_space<vmem>>, vector<1x1x8x12xbf16>
    %44 = vector.shape_cast %43 : vector<1x1x8x12xbf16> to vector<8x12xbf16>
    %cst_60 = arith.constant dense<0.000000e+00> : vector<192x12xf32>
    %45 = tpu.matmul %22, %44, %cst_60 {dimension_numbers = #tpu.dot_dimension_numbers<[1], [0], [0], [1], [0, 0, 1, 1], [], []>} : vector<192x8xbf16>, vector<8x12xbf16>, vector<192x12xf32> -> vector<192x12xf32>
    %46 = arith.addf %42, %45 : vector<192x12xf32>
    %47 = vector.shape_cast %46 : vector<192x12xf32> to vector<8x24x12xf32>
    %48 = vector.extract_strided_slice %47 {offsets = [0, 1, 0], sizes = [8, 16, 12], strides = [1, 1, 1]} : vector<8x24x12xf32> to vector<8x16x12xf32>
    %49 = arith.addf %35, %48 : vector<8x16x12xf32>
    %c0_61 = arith.constant 0 : index
    %c2_62 = arith.constant 2 : index
    %c0_63 = arith.constant 0 : index
    %c0_64 = arith.constant 0 : index
    %50 = vector.load %arg5[%c0_61, %c2_62, %c0_63, %c0_64] : memref<3x3x8x12xbf16, #tpu.memory_space<vmem>>, vector<1x1x8x12xbf16>
    %51 = vector.shape_cast %50 : vector<1x1x8x12xbf16> to vector<8x12xbf16>
    %cst_65 = arith.constant dense<0.000000e+00> : vector<192x12xf32>
    %52 = tpu.matmul %18, %51, %cst_65 {dimension_numbers = #tpu.dot_dimension_numbers<[1], [0], [0], [1], [0, 0, 1, 1], [], []>} : vector<192x8xbf16>, vector<8x12xbf16>, vector<192x12xf32> -> vector<192x12xf32>
    %c1_66 = arith.constant 1 : index
    %c2_67 = arith.constant 2 : index
    %c0_68 = arith.constant 0 : index
    %c0_69 = arith.constant 0 : index
    %53 = vector.load %arg5[%c1_66, %c2_67, %c0_68, %c0_69] : memref<3x3x8x12xbf16, #tpu.memory_space<vmem>>, vector<1x1x8x12xbf16>
    %54 = vector.shape_cast %53 : vector<1x1x8x12xbf16> to vector<8x12xbf16>
    %cst_70 = arith.constant dense<0.000000e+00> : vector<192x12xf32>
    %55 = tpu.matmul %20, %54, %cst_70 {dimension_numbers = #tpu.dot_dimension_numbers<[1], [0], [0], [1], [0, 0, 1, 1], [], []>} : vector<192x8xbf16>, vector<8x12xbf16>, vector<192x12xf32> -> vector<192x12xf32>
    %56 = arith.addf %52, %55 : vector<192x12xf32>
    %c2_71 = arith.constant 2 : index
    %c2_72 = arith.constant 2 : index
    %c0_73 = arith.constant 0 : index
    %c0_74 = arith.constant 0 : index
    %57 = vector.load %arg5[%c2_71, %c2_72, %c0_73, %c0_74] : memref<3x3x8x12xbf16, #tpu.memory_space<vmem>>, vector<1x1x8x12xbf16>
    %58 = vector.shape_cast %57 : vector<1x1x8x12xbf16> to vector<8x12xbf16>
    %cst_75 = arith.constant dense<0.000000e+00> : vector<192x12xf32>
    %59 = tpu.matmul %22, %58, %cst_75 {dimension_numbers = #tpu.dot_dimension_numbers<[1], [0], [0], [1], [0, 0, 1, 1], [], []>} : vector<192x8xbf16>, vector<8x12xbf16>, vector<192x12xf32> -> vector<192x12xf32>
    %60 = arith.addf %56, %59 : vector<192x12xf32>
    %61 = vector.shape_cast %60 : vector<192x12xf32> to vector<8x24x12xf32>
    %62 = vector.extract_strided_slice %61 {offsets = [0, 2, 0], sizes = [8, 16, 12], strides = [1, 1, 1]} : vector<8x24x12xf32> to vector<8x16x12xf32>
    %63 = arith.addf %49, %62 : vector<8x16x12xf32>
    %c0_76 = arith.constant 0 : index
    %c0_77 = arith.constant 0 : index
    %64 = vector.load %arg6[%c0_76, %c0_77] : memref<1x12xf32, #tpu.memory_space<vmem>>, vector<1x12xf32>
    %65 = vector.shape_cast %64 : vector<1x12xf32> to vector<12xf32>
    %66 = vector.shape_cast %65 : vector<12xf32> to vector<1x1x12xf32>
    %67 = vector.broadcast %66 : vector<1x1x12xf32> to vector<8x16x12xf32>
    %68 = arith.addf %63, %67 : vector<8x16x12xf32>
    %cst_78 = arith.constant 0.000000e+00 : f32
    %69 = vector.broadcast %cst_78 : f32 to vector<8x16x12xf32>
    %70 = arith.maximumf %68, %69 : vector<8x16x12xf32>
    %71 = vector.extract_strided_slice %70 {offsets = [0, 0, 0], sizes = [8, 16, 8], strides = [1, 1, 1]} : vector<8x16x12xf32> to vector<8x16x8xf32>
    %72 = arith.truncf %71 : vector<8x16x8xf32> to vector<8x16x8xbf16>
    %c0_79 = arith.constant 0 : index
    %c0_80 = arith.constant 0 : index
    %c0_81 = arith.constant 0 : index
    %c0_82 = arith.constant 0 : index
    %73 = vector.load %arg7[%c0_79, %c0_80, %c0_81, %c0_82] : memref<1x8x16x8xbf16, #tpu.memory_space<vmem>>, vector<1x8x16x8xbf16>
    %74 = vector.shape_cast %73 : vector<1x8x16x8xbf16> to vector<8x16x8xbf16>
    %75 = vector.shape_cast %72 : vector<8x16x8xbf16> to vector<1x8x16x8xbf16>
    tpu.vector_store %arg7[%c0_79, %c0_80, %c0_81, %c0_82], %75 {strides = array<i32>} : memref<1x8x16x8xbf16, #tpu.memory_space<vmem>>, vector<1x8x16x8xbf16>,
    %76 = vector.extract_strided_slice %70 {offsets = [0, 0, 8], sizes = [8, 16, 4], strides = [1, 1, 1]} : vector<8x16x12xf32> to vector<8x16x4xf32>
    %77 = arith.truncf %76 : vector<8x16x4xf32> to vector<8x16x4xbf16>
    %c0_83 = arith.constant 0 : index
    %c0_84 = arith.constant 0 : index
    %c0_85 = arith.constant 0 : index
    %c0_86 = arith.constant 0 : index
    %78 = vector.load %arg8[%c0_83, %c0_84, %c0_85, %c0_86] : memref<1x8x16x4xbf16, #tpu.memory_space<vmem>>, vector<1x8x16x4xbf16>
    %79 = vector.shape_cast %78 : vector<1x8x16x4xbf16> to vector<8x16x4xbf16>
    %80 = vector.shape_cast %77 : vector<8x16x4xbf16> to vector<1x8x16x4xbf16>
    tpu.vector_store %arg8[%c0_83, %c0_84, %c0_85, %c0_86], %80 {strides = array<i32>} : memref<1x8x16x4xbf16, #tpu.memory_space<vmem>>, vector<1x8x16x4xbf16>,
    return
  }
  func.func @transform_0(%arg0: i32, %arg1: i32) -> (i32, i32, i32, i32) {
    %c0_i32 = arith.constant 0 : i32
    %c0_i32_0 = arith.constant 0 : i32
    %c0_i32_1 = arith.constant 0 : i32
    return %arg0, %arg1, %c0_i32, %c0_i32_0 : i32, i32, i32, i32
  }
  func.func @transform_1(%arg0: i32, %arg1: i32) -> (i32, i32, i32, i32) {
    %c8_i32 = arith.constant 8 : i32
    %0 = arith.muli %arg1, %c8_i32 : i32
    %c1_i32 = arith.constant 1 : i32
    %1 = arith.subi %0, %c1_i32 : i32
    %c0_i32 = arith.constant 0 : i32
    %2 = arith.maxsi %1, %c0_i32 : i32
    %c0_i32_0 = arith.constant 0 : i32
    %c0_i32_1 = arith.constant 0 : i32
    %c0_i32_2 = arith.constant 0 : i32
    return %arg0, %2, %c0_i32_0, %c0_i32_1 : i32, i32, i32, i32
  }
  func.func @transform_2(%arg0: i32, %arg1: i32) -> (i32, i32, i32, i32) {
    %c1_i32 = arith.constant 1 : i32
    %0 = arith.addi %arg1, %c1_i32 : i32
    %c8_i32 = arith.constant 8 : i32
    %1 = arith.muli %0, %c8_i32 : i32
    %c15_i32 = arith.constant 15 : i32
    %2 = arith.minsi %1, %c15_i32 : i32
    %c0_i32 = arith.constant 0 : i32
    %c0_i32_0 = arith.constant 0 : i32
    %c0_i32_1 = arith.constant 0 : i32
    return %arg0, %2, %c0_i32, %c0_i32_0 : i32, i32, i32, i32
  }
  func.func @transform_3(%arg0: i32, %arg1: i32) -> (i32, i32, i32, i32) {
    %c0_i32 = arith.constant 0 : i32
    %c0_i32_0 = arith.constant 0 : i32
    %c0_i32_1 = arith.constant 0 : i32
    %c0_i32_2 = arith.constant 0 : i32
    %c0_i32_3 = arith.constant 0 : i32
    return %c0_i32, %c0_i32_0, %c0_i32_1, %c0_i32_2 : i32, i32, i32, i32
  }
  func.func @transform_4(%arg0: i32, %arg1: i32) -> (i32, i32) {
    %c0_i32 = arith.constant 0 : i32
    %c0_i32_0 = arith.constant 0 : i32
    %c0_i32_1 = arith.constant 0 : i32
    return %c0_i32, %c0_i32_0 : i32, i32
  }
  func.func @transform_5(%arg0: i32, %arg1: i32) -> (i32, i32, i32, i32) {
    %c0_i32 = arith.constant 0 : i32
    %c0_i32_0 = arith.constant 0 : i32
    %c0_i32_1 = arith.constant 0 : i32
    return %arg0, %arg1, %c0_i32, %c0_i32_0 : i32, i32, i32, i32
  }
  func.func @transform_6(%arg0: i32, %arg1: i32) -> (i32, i32, i32, i32) {
    %c0_i32 = arith.constant 0 : i32
    %c0_i32_0 = arith.constant 0 : i32
    %c0_i32_1 = arith.constant 0 : i32
    return %arg0, %arg1, %c0_i32, %c0_i32_0 : i32, i32, i32, i32
  }
}

module attributes {stable_mosaic.version = 11 : i64} {
  func.func @_final_conv_concat_kernel(%arg0: i32, %arg1: i32, %arg2: memref<1x8x16x8xbf16, #tpu.memory_space<vmem>>, %arg3: memref<1x1x16x8xbf16, #tpu.memory_space<vmem>>, %arg4: memref<1x1x16x8xbf16, #tpu.memory_space<vmem>>, %arg5: memref<1x8x16x8xbf16, #tpu.memory_space<vmem>>, %arg6: memref<3x3x4x4xbf16, #tpu.memory_space<vmem>>, %arg7: memref<1x4xf32, #tpu.memory_space<vmem>>, %arg8: memref<1x8x16x16xf32, #tpu.memory_space<vmem>>, %arg9: memref<10x24x4xbf16, #tpu.memory_space<vmem>>) attributes {dimension_semantics = [#tpu.dimension_semantics<parallel>, #tpu.dimension_semantics<parallel>], iteration_bounds = array<i64: 2, 2>, scalar_prefetch = 0 : i64, scratch_operands = 1 : i64, tpu.core_type = #tpu.core_type<tc>, window_params = [{transform_indices = @transform_0, window_bounds = array<i64: 1, 8, 16, 8>}, {transform_indices = @transform_1, window_bounds = array<i64: 1, 1, 16, 8>}, {transform_indices = @transform_2, window_bounds = array<i64: 1, 1, 16, 8>}, {transform_indices = @transform_3, window_bounds = array<i64: 1, 8, 16, 8>}, {pipeline_mode = #tpu.pipeline_mode<synchronous>, transform_indices = @transform_4, window_bounds = array<i64: 3, 3, 4, 4>}, {pipeline_mode = #tpu.pipeline_mode<synchronous>, transform_indices = @transform_5, window_bounds = array<i64: 1, 4>}, {transform_indices = @transform_6, window_bounds = array<i64: 1, 8, 16, 16>}]} {
    %cst = arith.constant 0.000000e+00 : bf16
    %0 = vector.broadcast %cst : bf16 to vector<10x24x4xbf16>
    %c0 = arith.constant 0 : index
    %c0_0 = arith.constant 0 : index
    %c0_1 = arith.constant 0 : index
    %1 = vector.load %arg9[%c0, %c0_0, %c0_1] : memref<10x24x4xbf16, #tpu.memory_space<vmem>>, vector<10x24x4xbf16>
    tpu.vector_store %arg9[%c0, %c0_0, %c0_1], %0 {strides = array<i32>} : memref<10x24x4xbf16, #tpu.memory_space<vmem>>, vector<10x24x4xbf16>,
    %c0_2 = arith.constant 0 : index
    %c0_3 = arith.constant 0 : index
    %c0_4 = arith.constant 0 : index
    %c4 = arith.constant 4 : index
    %2 = vector.load %arg2[%c0_2, %c0_3, %c0_4, %c4] : memref<1x8x16x8xbf16, #tpu.memory_space<vmem>>, vector<1x8x16x4xbf16>
    %3 = vector.shape_cast %2 : vector<1x8x16x4xbf16> to vector<8x16x4xbf16>
    %c1 = arith.constant 1 : index
    %c1_5 = arith.constant 1 : index
    %c0_6 = arith.constant 0 : index
    %4 = vector.load %arg9[%c1, %c1_5, %c0_6] : memref<10x24x4xbf16, #tpu.memory_space<vmem>>, vector<8x16x4xbf16>
    tpu.vector_store %arg9[%c1, %c1_5, %c0_6], %3 {strides = array<i32>} : memref<10x24x4xbf16, #tpu.memory_space<vmem>>, vector<8x16x4xbf16>,
    %c0_7 = arith.constant 0 : index
    %c0_8 = arith.constant 0 : index
    %c0_9 = arith.constant 0 : index
    %c4_10 = arith.constant 4 : index
    %5 = vector.load %arg3[%c0_7, %c0_8, %c0_9, %c4_10] : memref<1x1x16x8xbf16, #tpu.memory_space<vmem>>, vector<1x1x16x4xbf16>
    %6 = vector.shape_cast %5 : vector<1x1x16x4xbf16> to vector<1x16x4xbf16>
    %c0_11 = arith.constant 0 : index
    %c0_12 = arith.constant 0 : index
    %c0_13 = arith.constant 0 : index
    %c4_14 = arith.constant 4 : index
    %7 = vector.load %arg4[%c0_11, %c0_12, %c0_13, %c4_14] : memref<1x1x16x8xbf16, #tpu.memory_space<vmem>>, vector<1x1x16x4xbf16>
    %8 = vector.shape_cast %7 : vector<1x1x16x4xbf16> to vector<1x16x4xbf16>
    %c0_i32 = arith.constant 0 : i32
    %9 = arith.cmpi sgt, %arg1, %c0_i32 : i32
    %cst_15 = arith.constant 0.000000e+00 : bf16
    %10 = vector.broadcast %cst_15 : bf16 to vector<1x16x4xbf16>
    %11 = arith.select %9, %6, %10 : vector<1x16x4xbf16>
    %c0_16 = arith.constant 0 : index
    %c1_17 = arith.constant 1 : index
    %c0_18 = arith.constant 0 : index
    %12 = vector.load %arg9[%c0_16, %c1_17, %c0_18] : memref<10x24x4xbf16, #tpu.memory_space<vmem>>, vector<1x16x4xbf16>
    tpu.vector_store %arg9[%c0_16, %c1_17, %c0_18], %11 {strides = array<i32>} : memref<10x24x4xbf16, #tpu.memory_space<vmem>>, vector<1x16x4xbf16>,
    %c1_i32 = arith.constant 1 : i32
    %13 = arith.cmpi slt, %arg1, %c1_i32 : i32
    %cst_19 = arith.constant 0.000000e+00 : bf16
    %14 = vector.broadcast %cst_19 : bf16 to vector<1x16x4xbf16>
    %15 = arith.select %13, %8, %14 : vector<1x16x4xbf16>
    %c9 = arith.constant 9 : index
    %c1_20 = arith.constant 1 : index
    %c0_21 = arith.constant 0 : index
    %16 = vector.load %arg9[%c9, %c1_20, %c0_21] : memref<10x24x4xbf16, #tpu.memory_space<vmem>>, vector<1x16x4xbf16>
    tpu.vector_store %arg9[%c9, %c1_20, %c0_21], %15 {strides = array<i32>} : memref<10x24x4xbf16, #tpu.memory_space<vmem>>, vector<1x16x4xbf16>,
    %c0_22 = arith.constant 0 : index
    %c0_23 = arith.constant 0 : index
    %c0_24 = arith.constant 0 : index
    %17 = vector.load %arg9[%c0_22, %c0_23, %c0_24] : memref<10x24x4xbf16, #tpu.memory_space<vmem>>, vector<8x24x4xbf16>
    %18 = vector.shape_cast %17 : vector<8x24x4xbf16> to vector<192x4xbf16>
    %c1_25 = arith.constant 1 : index
    %c0_26 = arith.constant 0 : index
    %c0_27 = arith.constant 0 : index
    %19 = vector.load %arg9[%c1_25, %c0_26, %c0_27] : memref<10x24x4xbf16, #tpu.memory_space<vmem>>, vector<8x24x4xbf16>
    %20 = vector.shape_cast %19 : vector<8x24x4xbf16> to vector<192x4xbf16>
    %c2 = arith.constant 2 : index
    %c0_28 = arith.constant 0 : index
    %c0_29 = arith.constant 0 : index
    %21 = vector.load %arg9[%c2, %c0_28, %c0_29] : memref<10x24x4xbf16, #tpu.memory_space<vmem>>, vector<8x24x4xbf16>
    %22 = vector.shape_cast %21 : vector<8x24x4xbf16> to vector<192x4xbf16>
    %c0_30 = arith.constant 0 : index
    %c0_31 = arith.constant 0 : index
    %c0_32 = arith.constant 0 : index
    %c0_33 = arith.constant 0 : index
    %23 = vector.load %arg6[%c0_30, %c0_31, %c0_32, %c0_33] : memref<3x3x4x4xbf16, #tpu.memory_space<vmem>>, vector<1x1x4x4xbf16>
    %24 = vector.shape_cast %23 : vector<1x1x4x4xbf16> to vector<4x4xbf16>
    %cst_34 = arith.constant dense<0.000000e+00> : vector<192x4xf32>
    %25 = tpu.matmul %18, %24, %cst_34 {dimension_numbers = #tpu.dot_dimension_numbers<[1], [0], [0], [1], [0, 0, 1, 1], [], []>} : vector<192x4xbf16>, vector<4x4xbf16>, vector<192x4xf32> -> vector<192x4xf32>
    %c1_35 = arith.constant 1 : index
    %c0_36 = arith.constant 0 : index
    %c0_37 = arith.constant 0 : index
    %c0_38 = arith.constant 0 : index
    %26 = vector.load %arg6[%c1_35, %c0_36, %c0_37, %c0_38] : memref<3x3x4x4xbf16, #tpu.memory_space<vmem>>, vector<1x1x4x4xbf16>
    %27 = vector.shape_cast %26 : vector<1x1x4x4xbf16> to vector<4x4xbf16>
    %cst_39 = arith.constant dense<0.000000e+00> : vector<192x4xf32>
    %28 = tpu.matmul %20, %27, %cst_39 {dimension_numbers = #tpu.dot_dimension_numbers<[1], [0], [0], [1], [0, 0, 1, 1], [], []>} : vector<192x4xbf16>, vector<4x4xbf16>, vector<192x4xf32> -> vector<192x4xf32>
    %29 = arith.addf %25, %28 : vector<192x4xf32>
    %c2_40 = arith.constant 2 : index
    %c0_41 = arith.constant 0 : index
    %c0_42 = arith.constant 0 : index
    %c0_43 = arith.constant 0 : index
    %30 = vector.load %arg6[%c2_40, %c0_41, %c0_42, %c0_43] : memref<3x3x4x4xbf16, #tpu.memory_space<vmem>>, vector<1x1x4x4xbf16>
    %31 = vector.shape_cast %30 : vector<1x1x4x4xbf16> to vector<4x4xbf16>
    %cst_44 = arith.constant dense<0.000000e+00> : vector<192x4xf32>
    %32 = tpu.matmul %22, %31, %cst_44 {dimension_numbers = #tpu.dot_dimension_numbers<[1], [0], [0], [1], [0, 0, 1, 1], [], []>} : vector<192x4xbf16>, vector<4x4xbf16>, vector<192x4xf32> -> vector<192x4xf32>
    %33 = arith.addf %29, %32 : vector<192x4xf32>
    %34 = vector.shape_cast %33 : vector<192x4xf32> to vector<8x24x4xf32>
    %35 = vector.extract_strided_slice %34 {offsets = [0, 0, 0], sizes = [8, 16, 4], strides = [1, 1, 1]} : vector<8x24x4xf32> to vector<8x16x4xf32>
    %c0_45 = arith.constant 0 : index
    %c1_46 = arith.constant 1 : index
    %c0_47 = arith.constant 0 : index
    %c0_48 = arith.constant 0 : index
    %36 = vector.load %arg6[%c0_45, %c1_46, %c0_47, %c0_48] : memref<3x3x4x4xbf16, #tpu.memory_space<vmem>>, vector<1x1x4x4xbf16>
    %37 = vector.shape_cast %36 : vector<1x1x4x4xbf16> to vector<4x4xbf16>
    %cst_49 = arith.constant dense<0.000000e+00> : vector<192x4xf32>
    %38 = tpu.matmul %18, %37, %cst_49 {dimension_numbers = #tpu.dot_dimension_numbers<[1], [0], [0], [1], [0, 0, 1, 1], [], []>} : vector<192x4xbf16>, vector<4x4xbf16>, vector<192x4xf32> -> vector<192x4xf32>
    %c1_50 = arith.constant 1 : index
    %c1_51 = arith.constant 1 : index
    %c0_52 = arith.constant 0 : index
    %c0_53 = arith.constant 0 : index
    %39 = vector.load %arg6[%c1_50, %c1_51, %c0_52, %c0_53] : memref<3x3x4x4xbf16, #tpu.memory_space<vmem>>, vector<1x1x4x4xbf16>
    %40 = vector.shape_cast %39 : vector<1x1x4x4xbf16> to vector<4x4xbf16>
    %cst_54 = arith.constant dense<0.000000e+00> : vector<192x4xf32>
    %41 = tpu.matmul %20, %40, %cst_54 {dimension_numbers = #tpu.dot_dimension_numbers<[1], [0], [0], [1], [0, 0, 1, 1], [], []>} : vector<192x4xbf16>, vector<4x4xbf16>, vector<192x4xf32> -> vector<192x4xf32>
    %42 = arith.addf %38, %41 : vector<192x4xf32>
    %c2_55 = arith.constant 2 : index
    %c1_56 = arith.constant 1 : index
    %c0_57 = arith.constant 0 : index
    %c0_58 = arith.constant 0 : index
    %43 = vector.load %arg6[%c2_55, %c1_56, %c0_57, %c0_58] : memref<3x3x4x4xbf16, #tpu.memory_space<vmem>>, vector<1x1x4x4xbf16>
    %44 = vector.shape_cast %43 : vector<1x1x4x4xbf16> to vector<4x4xbf16>
    %cst_59 = arith.constant dense<0.000000e+00> : vector<192x4xf32>
    %45 = tpu.matmul %22, %44, %cst_59 {dimension_numbers = #tpu.dot_dimension_numbers<[1], [0], [0], [1], [0, 0, 1, 1], [], []>} : vector<192x4xbf16>, vector<4x4xbf16>, vector<192x4xf32> -> vector<192x4xf32>
    %46 = arith.addf %42, %45 : vector<192x4xf32>
    %47 = vector.shape_cast %46 : vector<192x4xf32> to vector<8x24x4xf32>
    %48 = vector.extract_strided_slice %47 {offsets = [0, 1, 0], sizes = [8, 16, 4], strides = [1, 1, 1]} : vector<8x24x4xf32> to vector<8x16x4xf32>
    %49 = arith.addf %35, %48 : vector<8x16x4xf32>
    %c0_60 = arith.constant 0 : index
    %c2_61 = arith.constant 2 : index
    %c0_62 = arith.constant 0 : index
    %c0_63 = arith.constant 0 : index
    %50 = vector.load %arg6[%c0_60, %c2_61, %c0_62, %c0_63] : memref<3x3x4x4xbf16, #tpu.memory_space<vmem>>, vector<1x1x4x4xbf16>
    %51 = vector.shape_cast %50 : vector<1x1x4x4xbf16> to vector<4x4xbf16>
    %cst_64 = arith.constant dense<0.000000e+00> : vector<192x4xf32>
    %52 = tpu.matmul %18, %51, %cst_64 {dimension_numbers = #tpu.dot_dimension_numbers<[1], [0], [0], [1], [0, 0, 1, 1], [], []>} : vector<192x4xbf16>, vector<4x4xbf16>, vector<192x4xf32> -> vector<192x4xf32>
    %c1_65 = arith.constant 1 : index
    %c2_66 = arith.constant 2 : index
    %c0_67 = arith.constant 0 : index
    %c0_68 = arith.constant 0 : index
    %53 = vector.load %arg6[%c1_65, %c2_66, %c0_67, %c0_68] : memref<3x3x4x4xbf16, #tpu.memory_space<vmem>>, vector<1x1x4x4xbf16>
    %54 = vector.shape_cast %53 : vector<1x1x4x4xbf16> to vector<4x4xbf16>
    %cst_69 = arith.constant dense<0.000000e+00> : vector<192x4xf32>
    %55 = tpu.matmul %20, %54, %cst_69 {dimension_numbers = #tpu.dot_dimension_numbers<[1], [0], [0], [1], [0, 0, 1, 1], [], []>} : vector<192x4xbf16>, vector<4x4xbf16>, vector<192x4xf32> -> vector<192x4xf32>
    %56 = arith.addf %52, %55 : vector<192x4xf32>
    %c2_70 = arith.constant 2 : index
    %c2_71 = arith.constant 2 : index
    %c0_72 = arith.constant 0 : index
    %c0_73 = arith.constant 0 : index
    %57 = vector.load %arg6[%c2_70, %c2_71, %c0_72, %c0_73] : memref<3x3x4x4xbf16, #tpu.memory_space<vmem>>, vector<1x1x4x4xbf16>
    %58 = vector.shape_cast %57 : vector<1x1x4x4xbf16> to vector<4x4xbf16>
    %cst_74 = arith.constant dense<0.000000e+00> : vector<192x4xf32>
    %59 = tpu.matmul %22, %58, %cst_74 {dimension_numbers = #tpu.dot_dimension_numbers<[1], [0], [0], [1], [0, 0, 1, 1], [], []>} : vector<192x4xbf16>, vector<4x4xbf16>, vector<192x4xf32> -> vector<192x4xf32>
    %60 = arith.addf %56, %59 : vector<192x4xf32>
    %61 = vector.shape_cast %60 : vector<192x4xf32> to vector<8x24x4xf32>
    %62 = vector.extract_strided_slice %61 {offsets = [0, 2, 0], sizes = [8, 16, 4], strides = [1, 1, 1]} : vector<8x24x4xf32> to vector<8x16x4xf32>
    %63 = arith.addf %49, %62 : vector<8x16x4xf32>
    %c0_75 = arith.constant 0 : index
    %c0_76 = arith.constant 0 : index
    %64 = vector.load %arg7[%c0_75, %c0_76] : memref<1x4xf32, #tpu.memory_space<vmem>>, vector<1x4xf32>
    %65 = vector.shape_cast %64 : vector<1x4xf32> to vector<4xf32>
    %66 = vector.shape_cast %65 : vector<4xf32> to vector<1x1x4xf32>
    %67 = vector.broadcast %66 : vector<1x1x4xf32> to vector<8x16x4xf32>
    %68 = arith.addf %63, %67 : vector<8x16x4xf32>
    %cst_77 = arith.constant 0.000000e+00 : f32
    %69 = vector.broadcast %cst_77 : f32 to vector<8x16x4xf32>
    %70 = arith.maximumf %68, %69 : vector<8x16x4xf32>
    %c0_78 = arith.constant 0 : index
    %c0_79 = arith.constant 0 : index
    %c0_80 = arith.constant 0 : index
    %c0_81 = arith.constant 0 : index
    %71 = vector.load %arg5[%c0_78, %c0_79, %c0_80, %c0_81] : memref<1x8x16x8xbf16, #tpu.memory_space<vmem>>, vector<1x8x16x8xbf16>
    %72 = vector.shape_cast %71 : vector<1x8x16x8xbf16> to vector<8x16x8xbf16>
    %73 = arith.extf %72 : vector<8x16x8xbf16> to vector<8x16x8xf32>
    %c0_82 = arith.constant 0 : index
    %c0_83 = arith.constant 0 : index
    %c0_84 = arith.constant 0 : index
    %c0_85 = arith.constant 0 : index
    %74 = vector.load %arg8[%c0_82, %c0_83, %c0_84, %c0_85] : memref<1x8x16x16xf32, #tpu.memory_space<vmem>>, vector<1x8x16x8xf32>
    %75 = vector.shape_cast %74 : vector<1x8x16x8xf32> to vector<8x16x8xf32>
    %76 = vector.shape_cast %73 : vector<8x16x8xf32> to vector<1x8x16x8xf32>
    tpu.vector_store %arg8[%c0_82, %c0_83, %c0_84, %c0_85], %76 {strides = array<i32>} : memref<1x8x16x16xf32, #tpu.memory_space<vmem>>, vector<1x8x16x8xf32>,
    %c0_86 = arith.constant 0 : index
    %c0_87 = arith.constant 0 : index
    %c0_88 = arith.constant 0 : index
    %c0_89 = arith.constant 0 : index
    %77 = vector.load %arg2[%c0_86, %c0_87, %c0_88, %c0_89] : memref<1x8x16x8xbf16, #tpu.memory_space<vmem>>, vector<1x8x16x4xbf16>
    %78 = vector.shape_cast %77 : vector<1x8x16x4xbf16> to vector<8x16x4xbf16>
    %79 = arith.extf %78 : vector<8x16x4xbf16> to vector<8x16x4xf32>
    %c0_90 = arith.constant 0 : index
    %c0_91 = arith.constant 0 : index
    %c0_92 = arith.constant 0 : index
    %c8 = arith.constant 8 : index
    %80 = vector.load %arg8[%c0_90, %c0_91, %c0_92, %c8] : memref<1x8x16x16xf32, #tpu.memory_space<vmem>>, vector<1x8x16x4xf32>
    %81 = vector.shape_cast %80 : vector<1x8x16x4xf32> to vector<8x16x4xf32>
    %82 = vector.shape_cast %79 : vector<8x16x4xf32> to vector<1x8x16x4xf32>
    tpu.vector_store %arg8[%c0_90, %c0_91, %c0_92, %c8], %82 {strides = array<i32>} : memref<1x8x16x16xf32, #tpu.memory_space<vmem>>, vector<1x8x16x4xf32>,
    %c0_93 = arith.constant 0 : index
    %c0_94 = arith.constant 0 : index
    %c0_95 = arith.constant 0 : index
    %c12 = arith.constant 12 : index
    %83 = vector.load %arg8[%c0_93, %c0_94, %c0_95, %c12] : memref<1x8x16x16xf32, #tpu.memory_space<vmem>>, vector<1x8x16x4xf32>
    %84 = vector.shape_cast %83 : vector<1x8x16x4xf32> to vector<8x16x4xf32>
    %85 = vector.shape_cast %70 : vector<8x16x4xf32> to vector<1x8x16x4xf32>
    tpu.vector_store %arg8[%c0_93, %c0_94, %c0_95, %c12], %85 {strides = array<i32>} : memref<1x8x16x16xf32, #tpu.memory_space<vmem>>, vector<1x8x16x4xf32>,
    return
  }
  func.func @transform_0(%arg0: i32, %arg1: i32) -> (i32, i32, i32, i32) {
    %c0_i32 = arith.constant 0 : i32
    %c0_i32_0 = arith.constant 0 : i32
    %c0_i32_1 = arith.constant 0 : i32
    return %arg0, %arg1, %c0_i32, %c0_i32_0 : i32, i32, i32, i32
  }
  func.func @transform_1(%arg0: i32, %arg1: i32) -> (i32, i32, i32, i32) {
    %c8_i32 = arith.constant 8 : i32
    %0 = arith.muli %arg1, %c8_i32 : i32
    %c1_i32 = arith.constant 1 : i32
    %1 = arith.subi %0, %c1_i32 : i32
    %c0_i32 = arith.constant 0 : i32
    %2 = arith.maxsi %1, %c0_i32 : i32
    %c0_i32_0 = arith.constant 0 : i32
    %c0_i32_1 = arith.constant 0 : i32
    %c0_i32_2 = arith.constant 0 : i32
    return %arg0, %2, %c0_i32_0, %c0_i32_1 : i32, i32, i32, i32
  }
  func.func @transform_2(%arg0: i32, %arg1: i32) -> (i32, i32, i32, i32) {
    %c1_i32 = arith.constant 1 : i32
    %0 = arith.addi %arg1, %c1_i32 : i32
    %c8_i32 = arith.constant 8 : i32
    %1 = arith.muli %0, %c8_i32 : i32
    %c15_i32 = arith.constant 15 : i32
    %2 = arith.minsi %1, %c15_i32 : i32
    %c0_i32 = arith.constant 0 : i32
    %c0_i32_0 = arith.constant 0 : i32
    %c0_i32_1 = arith.constant 0 : i32
    return %arg0, %2, %c0_i32, %c0_i32_0 : i32, i32, i32, i32
  }
  func.func @transform_3(%arg0: i32, %arg1: i32) -> (i32, i32, i32, i32) {
    %c0_i32 = arith.constant 0 : i32
    %c0_i32_0 = arith.constant 0 : i32
    %c0_i32_1 = arith.constant 0 : i32
    return %arg0, %arg1, %c0_i32, %c0_i32_0 : i32, i32, i32, i32
  }
  func.func @transform_4(%arg0: i32, %arg1: i32) -> (i32, i32, i32, i32) {
    %c0_i32 = arith.constant 0 : i32
    %c0_i32_0 = arith.constant 0 : i32
    %c0_i32_1 = arith.constant 0 : i32
    %c0_i32_2 = arith.constant 0 : i32
    %c0_i32_3 = arith.constant 0 : i32
    return %c0_i32, %c0_i32_0, %c0_i32_1, %c0_i32_2 : i32, i32, i32, i32
  }
  func.func @transform_5(%arg0: i32, %arg1: i32) -> (i32, i32) {
    %c0_i32 = arith.constant 0 : i32
    %c0_i32_0 = arith.constant 0 : i32
    %c0_i32_1 = arith.constant 0 : i32
    return %c0_i32, %c0_i32_0 : i32, i32
  }
  func.func @transform_6(%arg0: i32, %arg1: i32) -> (i32, i32, i32, i32) {
    %c0_i32 = arith.constant 0 : i32
    %c0_i32_0 = arith.constant 0 : i32
    %c0_i32_1 = arith.constant 0 : i32
    return %arg0, %arg1, %c0_i32, %c0_i32_0 : i32, i32, i32, i32
  }
}

</mosaic_0001>

<bundles_post_ra>
// kernel: context_module.4
= control target key start
LH: loop header
LB: loop body
LE: loop exit
PB: predicated region body
PF: predicated region fallthrough
CT: control target
= control target key end

     0   :  { %s3542_s18 = smov 0   ;;  %s3544_s19 = smov 0   ;;  %s4507_s0 = inlined_call_operand.vmem [shape: bf16[2,16,16,4], index: 0, kind: input, shape index: {}, may-alias: {0,1,2}]   ;;  %s4508_s1 = inlined_call_operand.vmem [shape: bf16[2,16,16,4], index: 1, kind: input, shape index: {}, may-alias: {0,1,2}]   ;;  %s4509_s2 = inlined_call_operand.vmem [shape: bf16[2,16,16,4], index: 2, kind: input, shape index: {}, may-alias: {0,1,2}]   ;;  %s4510_s3 = inlined_call_operand.vmem [shape: bf16[3,3,4,8], index: 3, kind: input, shape index: {}]   ;;  %s4511_s4 = inlined_call_operand.vmem [shape: f32[1,8], index: 4, kind: input, shape index: {}]   ;;  %s4512_s5 = inlined_call_operand.vmem [shape: bf16[2,16,16,8], index: 5, kind: output, shape index: {}]  }
   0x1   :  { %s3546_s20 = smov 0   ;;  %s3548_s21 = smov 0  }
   0x2   :  { %s3550_s22 = smov 0  }
   0x3 LB: > { %s24_s23 = sadd.s32 1, %s3501_s20  ;;  %s27_s24 = sadd.s32 1, %s3505_s21  ;;  %s3509_s22 = sphi %s3550_s22, %s15_s22   ;;  %s3505_s21 = sphi %s3548_s21, %s4523_s21   ;;  %s3501_s20 = sphi %s3546_s20, %s4522_s20   ;;  %s3497_s19 = sphi %s3544_s19, %s4521_s19   ;;  %s3493_s18 = sphi %s3542_s18, %s4520_s18  }
   0x4   : > { %p25_p0 = scmp.ge.s32.totalorder %s24_s23, 2  ;;  %p2810_p1 = scmp.ge.s32.totalorder %s3509_s22, 1 }
   0x5   : > { %p273_p2 = scmp.lt.s32.totalorder %s3509_s22, 5 }
   0x6   : > { %s4525_s23 = smov (%p25_p0, %s24_s23), 0  ;;  %s4527_s24 = smov (!%p25_p0, %s27_s24), %s3505_s21 }
   0x7   : > { %p274_p3 = pnand %p2810_p1, %p273_p2  ;;  %p29_p4 = scmp.ge.s32.totalorder %s4527_s24, 2 }
   0x8   : > { %s3578_s27 = sshll.u32 (!%p274_p3), %s3493_s18, 3  ;;  %p338_p5 = scmp.lt.s32.totalorder (!%p274_p3), %s3497_s19, 1 }
   0x9   : > { %s4529_s24 = smov (%p29_p4, %s4527_s24), 0  ;;  %277 = sbr.rel (%p274_p3) target bundleno = 481 (0x1e1), region = 40 }
   0xa   : > { %p340_p6 = scmp.lt.s32.totalorder (!%p274_p3), %s3578_s27, 15  ;;  %s3637_s11 = sadd.s32 (!%p274_p3), 4294967295, %s3578_s27 }
   0xb   : > { %p350_p7 = scmp.gt.s32.totalorder (!%p274_p3), %s3637_s11, 0  ;;  %p2817_p8 = scmp.lt.s32.totalorder (!%p274_p3), %s3637_s11, 15 }
   0xc   : > { %p670_p9 = scmp.gt.s32.totalorder (!%p274_p3), %s3493_s18, 0  ;;  %p703_p11 = scmp.lt.s32.totalorder (!%p274_p3), %s3493_s18, 1 }
   0xe   : > { %v2836_v0 = vld [vmem:[%s4510_s3 + $0x6] sm:$0x3]  ;;  %vm910_vm0 = vcmask 1041408   ;;  %vm394_vm1 = vcmask 27648   ;;  %s4531_s19 = smov (!%p338_p5, %s3497_s19), 1  ;;  %v3511_v2 = vmov 0  }
   0xf   : > { %3385 = vmatprep.subr.msk.bf16.mxu1 %vm910_vm0, %v2836_v0  ;;  %3384 = vmatprep.subr.msk.bf16.mxu0 %vm910_vm0, %v2836_v0  ;;  %v912_v1 = vsel %vm910_vm0, %v2836_v0, 0  ;;  %398 = vst.msk [vmem:[#allocation2 + $0xc] sm:$0xf] %vm394_vm1, %v3511_v2  ;;  %399 = vst.msk [vmem:[#allocation2 + $0x10] sm:$0xf] %vm394_vm1, %v3511_v2  ;;  %s341_s28 = scalar_select %p340_p6, %s3578_s27, 15 }
  0x10   : > { %3383 = vmatpush3.bf16.msra.mxu1 %v912_v1  ;;  %3149 = vmatpush3.bf16.msra.mxu0 %v912_v1  ;;  %395 = vst.msk [vmem:[#allocation2] sm:$0xf] %vm394_vm1, %v3511_v2  ;;  %396 = vst.msk [vmem:[#allocation2 + $0x4] sm:$0xf] %vm394_vm1, %v3511_v2  ;;  %v3622_v3 = vld [vmem:[%s4510_s3] sm:$0x3] }
  0x11   : > { %397 = vst.msk [vmem:[#allocation2 + $0x8] sm:$0xf] %vm394_vm1, %v3511_v2  ;;  %400 = vst.msk [vmem:[#allocation2 + $0x14] sm:$0xf] %vm394_vm1, %v3511_v2  ;;  %v2885_v4 = vld [vmem:[%s4510_s3 + $0xc] sm:$0x3]  ;;  %3386 = vmatprep.subr.msk.bf16.mxu1 %vm910_vm0, %v3622_v3 }
  0x12   : > { %401 = vst.msk [vmem:[#allocation2 + $0x18] sm:$0xf] %vm394_vm1, %v3511_v2  ;;  %402 = vst.msk [vmem:[#allocation2 + $0x1c] sm:$0xf] %vm394_vm1, %v3511_v2  ;;  %s3628_s8 = sshll.u32 %s4531_s19, 5  ;;  %3387 = vmatprep.subr.msk.bf16.mxu0 %vm910_vm0, %v2885_v4  ;;  %s2812_s9 = sshll.u32 %s341_s28, 1 }
  0x13   : > { %403 = vst.msk [vmem:[#allocation2 + $0x20] sm:$0xf] %vm394_vm1, %v3511_v2  ;;  %404 = vst.msk [vmem:[#allocation2 + $0x24] sm:$0xf] %vm394_vm1, %v3511_v2  ;;  %s3634_s10 = sadd.s32 %s3628_s8, %s2812_s9  ;;  %vm441_vm2 = vsmask.f32 256 }
  0x14   : > { %405 = vst.msk [vmem:[#allocation2 + $0x28] sm:$0xf] %vm394_vm1, %v3511_v2  ;;  %406 = vst.msk [vmem:[#allocation2 + $0x2c] sm:$0xf] %vm394_vm1, %v3511_v2  ;;  %s2814_s12 = sshll.u32 %s3634_s10, 2  ;;  %vm612_vm5 = vcmask 24576  }
  0x15   : > { %407 = vst.msk [vmem:[#allocation2 + $0x30] sm:$0xf] %vm394_vm1, %v3511_v2  ;;  %408 = vst.msk [vmem:[#allocation2 + $0x34] sm:$0xf] %vm394_vm1, %v3511_v2  ;;  %s3645_s15 = scalar_lea.vmem %s4507_s0, %s2814_s12  ;;  %vm442_vm3 = vsmask.f32 4368 }
  0x16   : > { %409 = vst.msk [vmem:[#allocation2 + $0x38] sm:$0xf] %vm394_vm1, %v3511_v2  ;;  %410 = vst.msk [vmem:[#allocation2 + $0x3c] sm:$0xf] %vm394_vm1, %v3511_v2  ;;  %vm606_vm4 = vsmask.f32 7938 }
  0x17   : > { %411 = vst.msk [vmem:[#allocation2 + $0x40] sm:$0xf] %vm394_vm1, %v3511_v2  ;;  %412 = vst.msk [vmem:[#allocation2 + $0x44] sm:$0xf] %vm394_vm1, %v3511_v2  ;;  %v3648_v5 = vsel %vm910_vm0, %v2885_v4, 0  ;;  %s351_s16 = scalar_select %p350_p7, %s3637_s11, 0 }
  0x18   : > { %413 = vst.msk [vmem:[#allocation2 + $0x48] sm:$0xf] %vm394_vm1, %v3511_v2  ;;  %414 = vst.msk [vmem:[#allocation2 + $0x4c] sm:$0xf] %vm394_vm1, %v3511_v2  ;;  %v425_v6 = vld [vmem:[%s3645_s15] sm:$0xf] }
  0x19   : > { %415 = vst.msk [vmem:[#allocation2 + $0x50] sm:$0xf] %vm394_vm1, %v3511_v2  ;;  %416 = vst.msk [vmem:[#allocation2 + $0x54] sm:$0xf] %vm394_vm1, %v3511_v2  ;;  %v426_v7 = vld [vmem:[%s3645_s15 + $0x4] sm:$0xf] }
  0x1a   : > { %417 = vst.msk [vmem:[#allocation2 + $0x58] sm:$0xf] %vm394_vm1, %v3511_v2  ;;  %418 = vst.msk [vmem:[#allocation2 + $0x5c] sm:$0xf] %vm394_vm1, %v3511_v2  ;;  %v445_v8 = vshrl.u32 %v425_v6, 16  ;;  %v448_v9 = vshll.u32 %v425_v6, 16 }
  0x1b   : > { %419 = vst.msk [vmem:[#allocation2 + $0x60] sm:$0xf] %vm394_vm1, %v3511_v2  ;;  %420 = vst.msk [vmem:[#allocation2 + $0x64] sm:$0xf] %vm394_vm1, %v3511_v2  ;;  %v453_v10 = vshrl.u32 %v426_v7, 16  ;;  %v456_v11 = vshll.u32 %v426_v7, 16 }
  0x1c   : > { %421 = vst.msk [vmem:[#allocation2 + $0x68] sm:$0xf] %vm394_vm1, %v3511_v2  ;;  %422 = vst.msk [vmem:[#allocation2 + $0x6c] sm:$0xf] %vm394_vm1, %v3511_v2  ;;  %v433_v12 = vld [vmem:[%s3645_s15 + $0x20] sm:$0xf] }
  0x1d   : > { %423 = vst.msk [vmem:[#allocation2 + $0x70] sm:$0xf] %vm394_vm1, %v3511_v2  ;;  %424 = vst.msk [vmem:[#allocation2 + $0x74] sm:$0xf] %vm394_vm1, %v3511_v2  ;;  %v608_v13 = vld [vmem:[#allocation2 + $0xc] sm:$0xf] }
  0x1e   : > { %v434_v14 = vld [vmem:[%s3645_s15 + $0x24] sm:$0xf]  ;;  %v513_v15 = vshrl.u32 %v433_v12, 16  ;;  %v516_v16 = vshll.u32 %v433_v12, 16  ;;  %vm3658_vm6 = vmor %vm441_vm2, %vm442_vm3  ;;  %v447_v18 = vrot.slane %v445_v8, 7  ;;  %v455_v19 = vrot.slane %v453_v10, 7 }
  0x1f   : > { %v521_v20 = vshrl.u32 %v434_v14, 16  ;;  %v524_v21 = vshll.u32 %v434_v14, 16  ;;  %v427_v22 = vld [vmem:[%s3645_s15 + $0x8] sm:$0xf]  ;;  %vm3665_vm7 = vmand %vm394_vm1, %vm606_vm4  ;;  %v638_v25 = vld [vmem:[#allocation2 + $0x3c] sm:$0xf] }
  0x20   : > { %v515_v24 = vrot.slane %v513_v15, 7  ;;  %v462_v26 = vshrl.u32 %v427_v22, 16  ;;  %v465_v27 = vshll.u32 %v427_v22, 16  ;;  %v450_v28 = vor.u32 %v448_v9, %v447_v18  ;;  %vm3674_vm8 = vmand %vm612_vm5, %vm441_vm2  ;;  %v614_v33 = vld [vmem:[#allocation2 + $0x14] sm:$0x1]  ;;  %s4533_s16 = smov (!%p2817_p8, %s351_s16), 15 }
  0x21   : > { %v451_v29 = vrot.slane %v447_v18, 4  ;;  %v458_v30 = vor.u32 %v456_v11, %v455_v19  ;;  %v523_v32 = vrot.slane %v521_v20, 7  ;;  %v435_v34 = vld [vmem:[%s3645_s15 + $0x28] sm:$0xf]  ;;  %vm873_vm9 = vcmask 31744   ;;  %s2822_s17 = sshll.u32 %s4533_s16, 1 }
  0x22   : > { %v518_v35 = vor.u32 %v516_v16, %v515_v24  ;;  %v519_v36 = vrot.slane %v515_v24, 4  ;;  %v460_v37 = vrot.slane %v455_v19, 4  ;;  %v464_v38 = vrot.slane %v462_v26, 7  ;;  %v642_v39 = vld [vmem:[#allocation2 + $0x44] sm:$0x1]  ;;  %s3014_s19 = sadd.s32 8, %s3578_s27  ;;  %s3740_s28 = sadd.s32 %s2822_s17, %s3628_s8 }
  0x23   : > { %v459_v40 = vsel %vm3658_vm6, %v451_v29, %v458_v30  ;;  %v609_v41 = vsel %vm3665_vm7, %v450_v28, %v608_v13  ;;  %v526_v42 = vor.u32 %v524_v21, %v523_v32  ;;  %v617_v43 = vld [vmem:[#allocation2 + $0x18] sm:$0xf]  ;;  %v528_v44 = vrot.slane %v523_v32, 4  ;;  %v428_v45 = vld [vmem:[%s3645_s15 + $0xc] sm:$0xf]  ;;  %p3753_p10 = scmp.lt.s32.totalorder %s3014_s19, 15 }
  0x24   : > { %610 = vst [vmem:[#allocation2 + $0xc] sm:$0xf] %v609_v41  ;;  %611 = vst.msk [vmem:[#allocation2 + $0x10] sm:$0xf] %vm394_vm1, %v459_v40  ;;  %v639_v46 = vsel %vm3665_vm7, %v518_v35, %v638_v25  ;;  %v467_v47 = vor.u32 %v465_v27, %v464_v38  ;;  %v615_v48 = vsel %vm3674_vm8, %v460_v37, %v614_v33  ;;  %v530_v49 = vshrl.u32 %v435_v34, 16  ;;  %s2824_s30 = sshll.u32 %s3740_s28, 2 }
  0x25   : > { %v436_v50 = vld [vmem:[%s3645_s15 + $0x2c] sm:$0xf]  ;;  %v527_v51 = vsel %vm3658_vm6, %v519_v36, %v526_v42  ;;  %640 = vst [vmem:[#allocation2 + $0x3c] sm:$0xf] %v639_v46  ;;  %616 = vst [vmem:[#allocation2 + $0x14] sm:$0x1] %v615_v48  ;;  %v643_v53 = vsel %vm3674_vm8, %v528_v44, %v642_v39  ;;  %s360_s13 = scalar_lea.vmem %s4508_s1, %s2824_s30 }
  0x26   : > { %v533_v52 = vshll.u32 %v435_v34, 16  ;;  %v645_v54 = vld [vmem:[#allocation2 + $0x48] sm:$0xf]  ;;  %v468_v55 = vrot.slane %v464_v38, 4  ;;  %v429_v56 = vld [vmem:[%s3645_s15 + $0x10] sm:$0xf]  ;;  %v618_v57 = vsel %vm3665_vm7, %v467_v47, %v617_v43 }
  0x27   : > { %641 = vst.msk [vmem:[#allocation2 + $0x40] sm:$0xf] %vm394_vm1, %v527_v51  ;;  %v532_v58 = vrot.slane %v530_v49, 7  ;;  %644 = vst [vmem:[#allocation2 + $0x44] sm:$0x1] %v643_v53  ;;  %v470_v59 = vshrl.u32 %v428_v45, 16 }
  0x28   : > { %v473_v60 = vshll.u32 %v428_v45, 16  ;;  %v430_v61 = vld [vmem:[%s3645_s15 + $0x14] sm:$0xf]  ;;  %619 = vst [vmem:[#allocation2 + $0x18] sm:$0xf] %v618_v57  ;;  %v538_v63 = vshrl.u32 %v436_v50, 16 }
  0x29   : > { %v621_v62 = vld [vmem:[#allocation2 + $0x20] sm:$0x1]  ;;  %v541_v0 = vshll.u32 %v436_v50, 16  ;;  %v479_v1 = vshrl.u32 %v429_v56, 16  ;;  %v482_v2 = vshll.u32 %v429_v56, 16  ;;  %v535_v4 = vor.u32 %v533_v52, %v532_v58  ;;  %s4535_s19 = smov (!%p3753_p10, %s3014_s19), 15 }
  0x2a   : > { %v472_v6 = vrot.slane %v470_v59, 7  ;;  %v536_v7 = vrot.slane %v532_v58, 4  ;;  %v649_v8 = vld [vmem:[#allocation2 + $0x50] sm:$0x1]  ;;  %v487_v9 = vshrl.u32 %v430_v61, 16  ;;  %v540_v11 = vrot.slane %v538_v63, 7 }
  0x2b   : > { %v437_v10 = vld [vmem:[%s3645_s15 + $0x30] sm:$0xf]  ;;  %v481_v12 = vrot.slane %v479_v1, 7  ;;  %v490_v13 = vshll.u32 %v430_v61, 16  ;;  %v624_v14 = vld [vmem:[#allocation2 + $0x24] sm:$0xf]  ;;  %v646_v16 = vsel %vm3665_vm7, %v535_v4, %v645_v54 }
  0x2c   : > { %v547_v15 = vshrl.u32 %v437_v10, 16  ;;  %v475_v18 = vor.u32 %v473_v60, %v472_v6  ;;  %v477_v19 = vrot.slane %v472_v6, 4  ;;  %v489_v20 = vrot.slane %v487_v9, 7  ;;  %v438_v21 = vld [vmem:[%s3645_s15 + $0x34] sm:$0xf]  ;;  %v3709_v24 = vld [vmem:[#allocation2 + $0xc] sm:$0xff]  }
  0x2d   : > { %v431_v22 = vld [vmem:[%s3645_s15 + $0x18] sm:$0xf]  ;;  %647 = vst [vmem:[#allocation2 + $0x48] sm:$0xf] %v646_v16  ;;  %v543_v25 = vor.u32 %v541_v0, %v540_v11  ;;  %v545_v26 = vrot.slane %v540_v11, 4  ;;  %v484_v27 = vor.u32 %v482_v2, %v481_v12  ;;  %v485_v30 = vrot.slane %v481_v12, 4  ;;  %3150 = vmatprep.mubr.msk.bf16.mxu0 %vm873_vm9, %v3709_v24 }
  0x2e   : > { %v476_v28 = vsel %vm3658_vm6, %v468_v55, %v475_v18  ;;  %v622_v29 = vsel %vm3674_vm8, %v477_v19, %v621_v62  ;;  %v492_v32 = vor.u32 %v490_v13, %v489_v20  ;;  %v3718_v33 = vld [vmem:[#allocation2 + $0x3c] sm:$0xff]   ;;  %v549_v37 = vrot.slane %v547_v15, 7  ;;  %v652_v38 = vld [vmem:[#allocation2 + $0x54] sm:$0xf]  ;;  %v628_v49 = vld [vmem:[#allocation2 + $0x2c] sm:$0x1] }
  0x2f   : > { %620 = vst.msk [vmem:[#allocation2 + $0x1c] sm:$0xf] %vm394_vm1, %v476_v28  ;;  %623 = vst [vmem:[#allocation2 + $0x20] sm:$0x1] %v622_v29  ;;  %v544_v34 = vsel %vm3658_vm6, %v536_v7, %v543_v25  ;;  %v650_v35 = vsel %vm3674_vm8, %v545_v26, %v649_v8  ;;  %v625_v36 = vsel %vm3665_vm7, %v484_v27, %v624_v14  ;;  %v3730_v39 = vld [vmem:[%s4510_s3 + $0x2] sm:$0x3]  ;;  %3162 = vmatprep.mubr.msk.bf16.mxu1 %vm873_vm9, %v3718_v33 }
  0x30   : > { %v3732_v40 = vld [vmem:[#allocation2 + $0x14] sm:$0xff]   ;;  %648 = vst.msk [vmem:[#allocation2 + $0x4c] sm:$0xf] %vm394_vm1, %v544_v34  ;;  %651 = vst [vmem:[#allocation2 + $0x50] sm:$0x1] %v650_v35  ;;  %v493_v41 = vsel %vm3658_vm6, %v485_v30, %v492_v32  ;;  %v550_v42 = vshll.u32 %v437_v10, 16 }
  0x31   : > { %626 = vst [vmem:[#allocation2 + $0x24] sm:$0xf] %v625_v36  ;;  %v555_v43 = vshrl.u32 %v438_v21, 16  ;;  %v558_v44 = vshll.u32 %v438_v21, 16  ;;  %v1132_v45 = vsel %vm910_vm0, %v3622_v3, 0  ;;  %v494_v46 = vrot.slane %v489_v20, 4  ;;  %3151 = vmatmul.mubr.msk.bf16.vlgmr.msra.gmra.mxu0 %vm873_vm9, %v3732_v40 }
  0x32   : > { %627 = vst.msk [vmem:[#allocation2 + $0x28] sm:$0xf] %vm394_vm1, %v493_v41  ;;  %v496_v47 = vshrl.u32 %v431_v22, 16  ;;  %v499_v48 = vshll.u32 %v431_v22, 16  ;;  %v552_v50 = vor.u32 %v550_v42, %v549_v37  ;;  %v553_v51 = vrot.slane %v549_v37, 4  ;;  %3201 = vmatpush3.bf16.msra.mxu0 %v3648_v5  ;;  %s4537_s19 = smov (!%p3753_p10, %s4535_s19), 15 }
  0x33   : > { %v557_v52 = vrot.slane %v555_v43, 7  ;;  %v439_v53 = vld [vmem:[%s3645_s15 + $0x38] sm:$0xf]  ;;  %v629_v54 = vsel %vm3674_vm8, %v494_v46, %v628_v49  ;;  %v656_v57 = vld [vmem:[#allocation2 + $0x5c] sm:$0x1]  ;;  %3389 = vmatprep.subr.msk.bf16.mxu0 %vm910_vm0, %v3730_v39  ;;  %s2829_s27 = sshll.u32 %s4537_s19, 1 }
  0x34   : > { %v498_v3 = vrot.slane %v496_v47, 7  ;;  %v564_v55 = vshrl.u32 %v439_v53, 16  ;;  %v567_v56 = vshll.u32 %v439_v53, 16  ;;  %v3764_v58 = vld [vmem:[%s4510_s3 + $0x8] sm:$0x3]  ;;  %v653_v5 = vsel %vm3665_vm7, %v552_v50, %v652_v38  ;;  %v3946_v17 = vld [vmem:[#allocation2 + $0x40] sm:$0xff]  }
  0x35   : > { %v3766_v59 = vld [vmem:[#allocation2 + $0x44] sm:$0xff]   ;;  %v560_v60 = vor.u32 %v558_v44, %v557_v52  ;;  %630 = vst [vmem:[#allocation2 + $0x2c] sm:$0x1] %v629_v54  ;;  %v631_v61 = vld [vmem:[#allocation2 + $0x30] sm:$0xf]  ;;  %v562_v62 = vrot.slane %v557_v52, 4 }
  0x36   : > { %654 = vst [vmem:[#allocation2 + $0x54] sm:$0xf] %v653_v5  ;;  %v501_v63 = vor.u32 %v499_v48, %v498_v3  ;;  %v566_v0 = vrot.slane %v564_v55, 7  ;;  %v659_v1 = vld [vmem:[#allocation2 + $0x60] sm:$0xf]  ;;  %v502_v4 = vrot.slane %v498_v3, 4  ;;  %3163 = vmatmul.mubr.msk.bf16.vlgmr.msra.gmra.mxu1 %vm873_vm9, %v3766_v59 }
  0x37   : > { %v432_v2 = vld [vmem:[%s3645_s15 + $0x1c] sm:$0xf]  ;;  %v561_v7 = vsel %vm3658_vm6, %v553_v51, %v560_v60  ;;  %v657_v8 = vsel %vm3674_vm8, %v562_v62, %v656_v57  ;;  %3175 = vmatpush3.bf16.msra.mxu1 %v1132_v45  ;;  %v3781_v10 = vld [vmem:[#allocation2 + $0x4c] sm:$0xff]   ;;  %v635_v18 = vld [vmem:[#allocation2 + $0x38] sm:$0x1]  ;;  %vm1943_vm12 = vcmask 1046528  }
  0x38   : > { %v3775_v6 = vld [vmem:[#allocation2 + $0x1c] sm:$0xff]   ;;  %v504_v9 = vshrl.u32 %v432_v2, 16  ;;  %655 = vst.msk [vmem:[#allocation2 + $0x58] sm:$0xf] %vm394_vm1, %v561_v7  ;;  %v632_v11 = vsel %vm3665_vm7, %v501_v63, %v631_v61  ;;  %v569_v12 = vor.u32 %v567_v56, %v566_v0  ;;  %658 = vst [vmem:[#allocation2 + $0x5c] sm:$0x1] %v657_v8  ;;  %3388 = vmatprep.subr.msk.bf16.mxu1 %vm910_vm0, %v3764_v58  ;;  %3166 = vmatprep.mubr.msk.bf16.mxu1 %vm873_vm9, %v3781_v10 }
  0x39   : > { %v507_v13 = vshll.u32 %v432_v2, 16  ;;  %3154 = vmatprep.mubr.msk.bf16.mxu0 %vm873_vm9, %v3775_v6  ;;  %v3788_v14 = vld [vmem:[#allocation2 + $0x24] sm:$0xff]   ;;  %633 = vst [vmem:[#allocation2 + $0x30] sm:$0xf] %v632_v11  ;;  %v440_v19 = vld [vmem:[%s3645_s15 + $0x3c] sm:$0xf]  ;;  %s375_s15 = sadd.s32 %s2829_s27, %s3628_s8 }
  0x3a   : > { %v506_v15 = vrot.slane %v504_v9, 7  ;;  %v660_v16 = vsel %vm3665_vm7, %v569_v12, %v659_v1  ;;  %3155 = vmatmul.mubr.msk.bf16.gmra.mxu0 %vm873_vm9, %v3788_v14  ;;  %v572_v22 = vshrl.u32 %v440_v19, 16  ;;  %v575_v25 = vshll.u32 %v440_v19, 16  ;;  %v663_v26 = vld [vmem:[#allocation2 + $0x68] sm:$0x1]  ;;  %v3832_v52 = vld [vmem:[#allocation2 + $0x18] sm:$0xff]  }
  0x3b   : > { %661 = vst [vmem:[#allocation2 + $0x60] sm:$0xf] %v660_v16  ;;  %s671_s14 = scalar_select %p670_p9, 1, 0  ;;  %v570_v29 = vrot.slane %v566_v0, 4  ;;  %v3854_v1 = vld [vmem:[#allocation2 + $0x20] sm:$0xff]  }
  0x3c   : > { %v509_v20 = vor.u32 %v507_v13, %v506_v15  ;;  %v511_v21 = vrot.slane %v506_v15, 4  ;;  %v574_v30 = vrot.slane %v572_v22, 7  ;;  %v666_v32 = vld [vmem:[%s360_s13] sm:$0xf]  ;;  %v667_v34 = vld [vmem:[%s360_s13 + $0x4] sm:$0xf] }
  0x3d   : > { %v672_v35 = vstv %s671_s14  ;;  %v696_v51 = vld [vmem:[#allocation2] sm:$0xf]  ;;  %v700_v53 = vld [vmem:[#allocation2 + $0x8] sm:$0x1]  ;;  %v3866_v7 = vld [vmem:[%s4510_s3 + $0xa] sm:$0x3] }
  0x3e   : > { %v510_v27 = vsel %vm3658_vm6, %v502_v4, %v509_v20  ;;  %v636_v28 = vsel %vm3674_vm8, %v511_v21, %v635_v18  ;;  %v577_v37 = vor.u32 %v575_v25, %v574_v30  ;;  %v579_v38 = vrot.slane %v574_v30, 4  ;;  %v3858_v2 = vld [vmem:[#allocation2 + $0x28] sm:$0xff]   ;;  %v3870_v8 = vld [vmem:[#allocation2 + $0x10] sm:$0xff]   ;;  %s2831_s8 = sshll.u32 %s375_s15, 2  ;;  %v3903_v15 = vld [vmem:[#allocation2 + $0x18] sm:$0xff]   ;;  %s4403_s15 = scalar_lea.vmem %s4512_s5, %s2814_s12 }
  0x3f   : > { %634 = vst.msk [vmem:[#allocation2 + $0x34] sm:$0xf] %vm394_vm1, %v510_v27  ;;  %637 = vst [vmem:[#allocation2 + $0x38] sm:$0x1] %v636_v28  ;;  %v3817_v36 = vld [vmem:[#allocation2 + $0x54] sm:$0xff]   ;;  %vm673_vm10 = vcmp.eq.s32.totalorder %v672_v35, 1  ;;  %s377_s29 = scalar_lea.vmem %s4509_s2, %s2831_s8 }
  0x40   : > { %v3819_v41 = vld [vmem:[#allocation2 + $0x2c] sm:$0xff]   ;;  %3167 = vmatmul.mubr.msk.bf16.gmra.mxu1 %vm873_vm9, %v3817_v36  ;;  %v578_v42 = vsel %vm3658_vm6, %v570_v29, %v577_v37  ;;  %v664_v43 = vsel %vm3674_vm8, %v579_v38, %v663_v26  ;;  %v674_v44 = vsel %vm673_vm10, %v666_v32, 0  ;;  %v675_v45 = vsel %vm673_vm10, %v667_v34, 0  ;;  %v3907_v16 = vld [vmem:[#allocation2 + $0x20] sm:$0xff]   ;;  %s704_s18 = scalar_select %p703_p11, 1, 0 }
  0x41   : > { %3158 = vmatprep.mubr.msk.bf16.mxu0 %vm873_vm9, %v3819_v41  ;;  %662 = vst.msk [vmem:[#allocation2 + $0x64] sm:$0xf] %vm394_vm1, %v578_v42  ;;  %665 = vst [vmem:[#allocation2 + $0x68] sm:$0x1] %v664_v43  ;;  %v677_v47 = vshrl.u32 %v674_v44, 16  ;;  %v680_v48 = vshll.u32 %v674_v44, 16 }
  0x42   : > { %v3829_v46 = vld [vmem:[#allocation2 + $0x5c] sm:$0xff]   ;;  %v685_v49 = vshrl.u32 %v675_v45, 16  ;;  %v688_v50 = vshll.u32 %v675_v45, 16  ;;  %v1630_v4 = vsel %vm910_vm0, %v3730_v39, 0  ;;  %v1498_v11 = vsel %vm910_vm0, %v3764_v58, 0  ;;  %v3917_v26 = vld [vmem:[#allocation2 + $0x48] sm:$0xff]  }
  0x43   : > { %3170 = vmatprep.mubr.msk.bf16.mxu1 %vm873_vm9, %v3829_v46  ;;  %v679_v3 = vrot.slane %v677_v47, 7  ;;  %v3887_v12 = vld [vmem:[%s4510_s3 + $0xe] sm:$0x3]  ;;  %v668_v18 = vld [vmem:[%s377_s29] sm:$0xf]  ;;  %v705_v19 = vstv %s704_s18  ;;  %v3940_v23 = vld [vmem:[#allocation2 + $0x58] sm:$0xff]  }
  0x44   : > { %v687_v54 = vrot.slane %v685_v49, 7  ;;  %v669_v20 = vld [vmem:[%s377_s29 + $0x4] sm:$0xf]  ;;  %vm706_vm11 = vcmp.eq.s32.totalorder %v705_v19, 1  ;;  %v3919_v35 = vld [vmem:[#allocation2 + $0x28] sm:$0xff]   ;;  %vm2466_vm13 = vcmask 1045504  }
  0x45   : > { %v682_v56 = vor.u32 %v680_v48, %v679_v3  ;;  %v683_v57 = vrot.slane %v679_v3, 4  ;;  %v3913_v21 = vld [vmem:[#allocation2 + $0x40] sm:$0xff]   ;;  %v707_v22 = vsel %vm706_vm11, %v668_v18, 0  ;;  %v708_v25 = vsel %vm706_vm11, %v669_v20, 0  ;;  %v730_v37 = vld [vmem:[#allocation2 + $0x6c] sm:$0xf] }
  0x46   : > { %v3836_v55 = vld [vmem:[#allocation2 + $0x34] sm:$0xff]   ;;  %v690_v60 = vor.u32 %v688_v50, %v687_v54  ;;  %v692_v5 = vrot.slane %v687_v54, 4  ;;  %v710_v27 = vshrl.u32 %v707_v22, 16  ;;  %v713_v28 = vshll.u32 %v707_v22, 16  ;;  %v3958_v54 = vld [vmem:[#allocation2 + $0x48] sm:$0xff]  }
  0x47   : > { %3159 = vmatmul.mubr.msk.bf16.gmra.mxu0 %vm873_vm9, %v3836_v55  ;;  %v697_v62 = vsel %vm3665_vm7, %v682_v56, %v696_v51  ;;  %v3891_v58 = vld [vmem:[#allocation2 + $0x30] sm:$0xff]   ;;  %v3896_v13 = vld [vmem:[#allocation2 + $0x38] sm:$0xff]   ;;  %v718_v29 = vshrl.u32 %v708_v25, 16  ;;  %v721_v30 = vshll.u32 %v708_v25, 16  ;;  %vm2642_vm14 = vcmask 60416  }
  0x48   : > { %v691_v61 = vsel %vm3658_vm6, %v683_v57, %v690_v60  ;;  %3202 = vmatprep.mubr.msk.bf16.mxu0 %vm873_vm9, %v3832_v52  ;;  %v701_v63 = vsel %vm3674_vm8, %v692_v5, %v700_v53  ;;  %v3851_v0 = vld [vmem:[#allocation2 + $0x64] sm:$0xff]   ;;  %698 = vst [vmem:[#allocation2] sm:$0xf] %v697_v62  ;;  %v712_v32 = vrot.slane %v710_v27, 7  ;;  %v734_v38 = vld [vmem:[#allocation2 + $0x74] sm:$0x1] }
  0x49   : > { %699 = vst.msk [vmem:[#allocation2 + $0x4] sm:$0xf] %vm394_vm1, %v691_v61  ;;  %702 = vst [vmem:[#allocation2 + $0x8] sm:$0x1] %v701_v63  ;;  %3171 = vmatmul.mubr.msk.bf16.gmra.mxu1 %vm873_vm9, %v3851_v0  ;;  %v720_v34 = vrot.slane %v718_v29, 7  ;;  %v3923_v42 = vld [vmem:[#allocation2 + $0x30] sm:$0xff]  }
  0x4a   : > { %v715_v43 = vor.u32 %v713_v28, %v712_v32  ;;  %v716_v44 = vrot.slane %v712_v32, 4  ;;  %v3935_v51 = vld [vmem:[#allocation2 + $0x50] sm:$0xff]   ;;  %v3942_v53 = vld [vmem:[#allocation2 + $0x38] sm:$0xff]   ;;  %v3952_v31 = vld [vmem:[#allocation2 + $0x60] sm:$0xff]   ;;  %v2021_v5 = vsel %vm910_vm0, %v3866_v7, 0  ;;  %v1764_v62 = vsel %vm910_vm0, %v3887_v12, 0 }
  0x4b   : > { %v723_v45 = vor.u32 %v721_v30, %v720_v34  ;;  %v725_v47 = vrot.slane %v720_v34, 4  ;;  %v3962_v56 = vld [vmem:[#allocation2 + $0x50] sm:$0xff]   ;;  %v3972_v60 = vld [vmem:[#allocation2 + $0x58] sm:$0xff]   ;;  %v2949_v63 = vld [vmem:[%s4510_s3 + $0x4] sm:$0x3] }
  0x4c   : > { %v731_v48 = vsel %vm3665_vm7, %v715_v43, %v730_v37  ;;  %v2975_v61 = vld [vmem:[%s4510_s3 + $0x10] sm:$0x3] }
  0x4d   : > { %v724_v49 = vsel %vm3658_vm6, %v716_v44, %v723_v45  ;;  %v735_v50 = vsel %vm3674_vm8, %v725_v47, %v734_v38  ;;  %732 = vst [vmem:[#allocation2 + $0x6c] sm:$0xf] %v731_v48 }
  0x4e   : > { %733 = vst.msk [vmem:[#allocation2 + $0x70] sm:$0xf] %vm394_vm1, %v724_v49  ;;  %736 = vst [vmem:[#allocation2 + $0x74] sm:$0x1] %v735_v50 }
  0x4f   : > { %3203 = vmatmul.mubr.msk.bf16.vlgmr.msra.gmra.mxu0 %vm873_vm9, %v3854_v1 }
  0x50   : > { %v3872_v9 = vld [vmem:[#allocation2] sm:$0xff]   ;;  %3253 = vmatpush3.bf16.msra.mxu0 %v1630_v4  ;;  %3206 = vmatprep.mubr.msk.bf16.mxu0 %vm873_vm9, %v3858_v2  ;;  %v3878_v39 = vld [vmem:[#allocation2 + $0x8] sm:$0xff]   ;;  %v2287_v4 = vsel %vm910_vm0, %v2975_v61, 0 }
  0x51   : > { %3391 = vmatprep.subr.msk.bf16.mxu0 %vm910_vm0, %v3866_v7  ;;  %3176 = vmatprep.mubr.msk.bf16.mxu1 %vm873_vm9, %v3872_v9  ;;  %v2153_v7 = vsel %vm910_vm0, %v2949_v63, 0 }
  0x52   : > { %3177 = vmatmul.mubr.msk.bf16.vlgmr.msra.gmra.mxu1 %vm873_vm9, %v3878_v39 }
  0x53   : > { %3227 = vmatpush3.bf16.msra.mxu1 %v1498_v11  ;;  %3180 = vmatprep.mubr.msk.bf16.mxu1 %vm873_vm9, %v3870_v8 }
  0x54   : > { %3390 = vmatprep.subr.msk.bf16.mxu1 %vm910_vm0, %v3887_v12  ;;  %v3956_v3 = vld [vmem:[#allocation2 + $0x68] sm:$0xff]  }
  0x55   : > { %v3968_v57 = vld [vmem:[#allocation2 + $0x70] sm:$0xff]  }
  0x57   : > { %3207 = vmatmul.mubr.msk.bf16.gmra.mxu0 %vm873_vm9, %v3891_v58 }
  0x58   : > { %3210 = vmatprep.mubr.msk.bf16.mxu0 %vm873_vm9, %v3896_v13 }
  0x5a   : > { %3181 = vmatmul.mubr.msk.bf16.gmra.mxu1 %vm873_vm9, %v3903_v15 }
  0x5b   : > { %3184 = vmatprep.mubr.msk.bf16.mxu1 %vm873_vm9, %v3907_v16 }
  0x5f   : > { %3211 = vmatmul.mubr.msk.bf16.gmra.mxu0 %vm873_vm9, %v3913_v21 }
  0x60   : > { %3214 = vmatprep.mubr.msk.bf16.mxu0 %vm873_vm9, %v3917_v26 }
  0x62   : > { %3185 = vmatmul.mubr.msk.bf16.gmra.mxu1 %vm873_vm9, %v3919_v35 }
  0x63   : > { %3188 = vmatprep.mubr.msk.bf16.mxu1 %vm873_vm9, %v3923_v42 }
  0x67   : > { %3215 = vmatmul.mubr.msk.bf16.gmra.mxu0 %vm873_vm9, %v3935_v51 }
  0x68   : > { %3218 = vmatprep.mubr.msk.bf16.mxu0 %vm873_vm9, %v3940_v23 }
  0x6a   : > { %3189 = vmatmul.mubr.msk.bf16.gmra.mxu1 %vm873_vm9, %v3942_v53 }
  0x6b   : > { %3192 = vmatprep.mubr.msk.bf16.mxu1 %vm873_vm9, %v3946_v17 }
  0x6f   : > { %3219 = vmatmul.mubr.msk.bf16.gmra.mxu0 %vm873_vm9, %v3952_v31 }
  0x70   : > { %3222 = vmatprep.mubr.msk.bf16.mxu0 %vm873_vm9, %v3956_v3 }
  0x72   : > { %3193 = vmatmul.mubr.msk.bf16.gmra.mxu1 %vm873_vm9, %v3958_v54 }
  0x73   : > { %3196 = vmatprep.mubr.msk.bf16.mxu1 %vm873_vm9, %v3962_v56 }
  0x77   : > { %3223 = vmatmul.mubr.msk.bf16.gmra.mxu0 %vm873_vm9, %v3968_v57 }
  0x78   : > { %3254 = vmatprep.mubr.msk.bf16.mxu0 %vm873_vm9, %v3872_v9 }
  0x7a   : > { %3197 = vmatmul.mubr.msk.bf16.gmra.mxu1 %vm873_vm9, %v3972_v60 }
  0x7b   : > { %3228 = vmatprep.mubr.msk.bf16.mxu1 %vm873_vm9, %v3709_v24 }
  0x7f   : > { %3255 = vmatmul.mubr.msk.bf16.vlgmr.msra.gmra.mxu0 %vm873_vm9, %v3878_v39 }
  0x80   : > { %3305 = vmatpush3.bf16.msra.mxu0 %v2021_v5  ;;  %3258 = vmatprep.mubr.msk.bf16.mxu0 %vm873_vm9, %v3870_v8 }
  0x81   : > { %3393 = vmatprep.subr.msk.bf16.mxu0 %vm910_vm0, %v2975_v61 }
  0x82   : > { %3229 = vmatmul.mubr.msk.bf16.vlgmr.msra.gmra.mxu1 %vm873_vm9, %v3732_v40 }
  0x83   : > { %3279 = vmatpush3.bf16.msra.mxu1 %v1764_v62  ;;  %3232 = vmatprep.mubr.msk.bf16.mxu1 %vm873_vm9, %v3775_v6 }
  0x84   : > { %3392 = vmatprep.subr.msk.bf16.mxu1 %vm910_vm0, %v2949_v63 }
  0x87   : > { %3259 = vmatmul.mubr.msk.bf16.gmra.mxu0 %vm873_vm9, %v3903_v15 }
  0x88   : > { %3262 = vmatprep.mubr.msk.bf16.mxu0 %vm873_vm9, %v3907_v16 }
  0x8a   : > { %3233 = vmatmul.mubr.msk.bf16.gmra.mxu1 %vm873_vm9, %v3788_v14 }
  0x8b   : > { %3236 = vmatprep.mubr.msk.bf16.mxu1 %vm873_vm9, %v3819_v41 }
  0x8f   : > { %3263 = vmatmul.mubr.msk.bf16.gmra.mxu0 %vm873_vm9, %v3919_v35 }
  0x90   : > { %3266 = vmatprep.mubr.msk.bf16.mxu0 %vm873_vm9, %v3923_v42 }
  0x92   : > { %3237 = vmatmul.mubr.msk.bf16.gmra.mxu1 %vm873_vm9, %v3836_v55 }
  0x93   : > { %3240 = vmatprep.mubr.msk.bf16.mxu1 %vm873_vm9, %v3718_v33 }
  0x97   : > { %3267 = vmatmul.mubr.msk.bf16.gmra.mxu0 %vm873_vm9, %v3942_v53 }
  0x98   : > { %3270 = vmatprep.mubr.msk.bf16.mxu0 %vm873_vm9, %v3946_v17 }
  0x9a   : > { %3241 = vmatmul.mubr.msk.bf16.gmra.mxu1 %vm873_vm9, %v3766_v59 }
  0x9b   : > { %3244 = vmatprep.mubr.msk.bf16.mxu1 %vm873_vm9, %v3781_v10 }
  0x9f   : > { %3271 = vmatmul.mubr.msk.bf16.gmra.mxu0 %vm873_vm9, %v3958_v54 }
  0xa0   : > { %3274 = vmatprep.mubr.msk.bf16.mxu0 %vm873_vm9, %v3962_v56 }
  0xa2   : > { %3245 = vmatmul.mubr.msk.bf16.gmra.mxu1 %vm873_vm9, %v3817_v36 }
  0xa3   : > { %3248 = vmatprep.mubr.msk.bf16.mxu1 %vm873_vm9, %v3829_v46 }
  0xa7   : > { %3275 = vmatmul.mubr.msk.bf16.gmra.mxu0 %vm873_vm9, %v3972_v60 }
  0xa8   : > { %3306 = vmatprep.mubr.msk.bf16.mxu0 %vm873_vm9, %v3709_v24 }
  0xaa   : > { %3249 = vmatmul.mubr.msk.bf16.gmra.mxu1 %vm873_vm9, %v3851_v0 }
  0xab   : > { %3280 = vmatprep.mubr.msk.bf16.mxu1 %vm873_vm9, %v3832_v52 }
  0xaf   : > { %3307 = vmatmul.mubr.msk.bf16.vlgmr.msra.gmra.mxu0 %vm873_vm9, %v3732_v40 }
  0xb0   : > { %3357 = vmatpush3.bf16.msra.mxu0 %v2287_v4  ;;  %3310 = vmatprep.mubr.msk.bf16.mxu0 %vm873_vm9, %v3775_v6 }
  0xb2   : > { %3281 = vmatmul.mubr.msk.bf16.vlgmr.msra.gmra.mxu1 %vm873_vm9, %v3854_v1 }
  0xb3   : > { %3331 = vmatpush3.bf16.msra.mxu1 %v2153_v7  ;;  %3284 = vmatprep.mubr.msk.bf16.mxu1 %vm873_vm9, %v3858_v2 }
  0xb7   : > { %3311 = vmatmul.mubr.msk.bf16.gmra.mxu0 %vm873_vm9, %v3788_v14 }
  0xb8   : > { %3314 = vmatprep.mubr.msk.bf16.mxu0 %vm873_vm9, %v3819_v41 }
  0xba   : > { %3285 = vmatmul.mubr.msk.bf16.gmra.mxu1 %vm873_vm9, %v3891_v58 }
  0xbb   : > { %3288 = vmatprep.mubr.msk.bf16.mxu1 %vm873_vm9, %v3896_v13 }
  0xbf   : > { %3315 = vmatmul.mubr.msk.bf16.gmra.mxu0 %vm873_vm9, %v3836_v55 }
  0xc0   : > { %3318 = vmatprep.mubr.msk.bf16.mxu0 %vm873_vm9, %v3718_v33 }
  0xc2   : > { %3289 = vmatmul.mubr.msk.bf16.gmra.mxu1 %vm873_vm9, %v3913_v21 }
  0xc3   : > { %3292 = vmatprep.mubr.msk.bf16.mxu1 %vm873_vm9, %v3917_v26 }
  0xc7   : > { %3319 = vmatmul.mubr.msk.bf16.gmra.mxu0 %vm873_vm9, %v3766_v59 }
  0xc8   : > { %3322 = vmatprep.mubr.msk.bf16.mxu0 %vm873_vm9, %v3781_v10 }
  0xca   : > { %3293 = vmatmul.mubr.msk.bf16.gmra.mxu1 %vm873_vm9, %v3935_v51 }
  0xcb   : > { %3296 = vmatprep.mubr.msk.bf16.mxu1 %vm873_vm9, %v3940_v23 }
  0xcf   : > { %3323 = vmatmul.mubr.msk.bf16.gmra.mxu0 %vm873_vm9, %v3817_v36 }
  0xd0   : > { %3326 = vmatprep.mubr.msk.bf16.mxu0 %vm873_vm9, %v3829_v46 }
  0xd2   : > { %3297 = vmatmul.mubr.msk.bf16.gmra.mxu1 %vm873_vm9, %v3952_v31 }
  0xd3   : > { %3300 = vmatprep.mubr.msk.bf16.mxu1 %vm873_vm9, %v3956_v3 }
  0xd7   : > { %3327 = vmatmul.mubr.msk.bf16.gmra.mxu0 %vm873_vm9, %v3851_v0 }
  0xd8   : > { %3358 = vmatprep.mubr.msk.bf16.mxu0 %vm873_vm9, %v3832_v52 }
  0xda   : > { %3301 = vmatmul.mubr.msk.bf16.gmra.mxu1 %vm873_vm9, %v3968_v57 }
  0xdb   : > { %3332 = vmatprep.mubr.msk.bf16.mxu1 %vm873_vm9, %v3872_v9 }
  0xdf   : > { %3359 = vmatmul.mubr.msk.bf16.vlgmr.msra.gmra.mxu0 %vm873_vm9, %v3854_v1 }
  0xe0   : > { %3362 = vmatprep.mubr.msk.bf16.mxu0 %vm873_vm9, %v3858_v2 }
  0xe2   : > { %3333 = vmatmul.mubr.msk.bf16.vlgmr.msra.gmra.mxu1 %vm873_vm9, %v3878_v39 }
  0xe3   : > { %3336 = vmatprep.mubr.msk.bf16.mxu1 %vm873_vm9, %v3870_v8 }
  0xe7   : > { %3363 = vmatmul.mubr.msk.bf16.gmra.mxu0 %vm873_vm9, %v3891_v58 }
  0xe8   : > { %3366 = vmatprep.mubr.msk.bf16.mxu0 %vm873_vm9, %v3896_v13 }
  0xea   : > { %3337 = vmatmul.mubr.msk.bf16.gmra.mxu1 %vm873_vm9, %v3903_v15 }
  0xeb   : > { %3340 = vmatprep.mubr.msk.bf16.mxu1 %vm873_vm9, %v3907_v16 }
  0xef   : > { %3367 = vmatmul.mubr.msk.bf16.gmra.mxu0 %vm873_vm9, %v3913_v21 }
  0xf0   : > { %3370 = vmatprep.mubr.msk.bf16.mxu0 %vm873_vm9, %v3917_v26 }
  0xf1   : > { %v3152_v24 = vpop.f32.mrf.mxu0 }
  0xf2   : > { %3341 = vmatmul.mubr.msk.bf16.gmra.mxu1 %vm873_vm9, %v3919_v35 }
  0xf3   : > { %3344 = vmatprep.mubr.msk.bf16.mxu1 %vm873_vm9, %v3923_v42  ;;  %v948_v33 = vpop.f32.mrf.mxu0 }
  0xf5   : > { %v3153_v59 = vpop.f32.mrf.mxu0 }
  0xf6   : > { %v3164_v40 = vpop.f32.mrf.mxu1 }
  0xf7   : > { %3371 = vmatmul.mubr.msk.bf16.gmra.mxu0 %vm873_vm9, %v3935_v51  ;;  %v951_v10 = vpop.f32.mrf.mxu0 }
  0xf8   : > { %3374 = vmatprep.mubr.msk.bf16.mxu0 %vm873_vm9, %v3940_v23  ;;  %v4120_v6 = vpop.f32.mrf.mxu1 }
  0xfa   : > { %3345 = vmatmul.mubr.msk.bf16.gmra.mxu1 %vm873_vm9, %v3942_v53  ;;  %v4124_v14 = vpop.f32.mrf.mxu1  ;;  %v3156_v36 = vpop.f32.mrf.mxu0 }
  0xfb   : > { %3348 = vmatprep.mubr.msk.bf16.mxu1 %vm873_vm9, %v3946_v17 }
  0xfc   : > { %v4128_v41 = vpop.f32.mrf.mxu1  ;;  %v963_v46 = vpop.f32.mrf.mxu0 }
  0xfe   : > { %v3157_v52 = vpop.f32.mrf.mxu0 }
  0xff   : > { %3375 = vmatmul.mubr.msk.bf16.gmra.mxu0 %vm873_vm9, %v3952_v31 }
 0x100   : > { %3378 = vmatprep.mubr.msk.bf16.mxu0 %vm873_vm9, %v3956_v3  ;;  %v4134_v55 = vpop.f32.mrf.mxu1  ;;  %v966_v0 = vpop.f32.mrf.mxu0 }
 0x102   : > { %3349 = vmatmul.mubr.msk.bf16.gmra.mxu1 %vm873_vm9, %v3958_v54  ;;  %v4138_v1 = vpop.f32.mrf.mxu1 }
 0x103   : > { %3352 = vmatprep.mubr.msk.bf16.mxu1 %vm873_vm9, %v3962_v56 }
 0x104   : > { %v4142_v2 = vpop.f32.mrf.mxu1 }
 0x106   : > { %v1010_v8 = vpop.f32.mrf.mxu1 }
 0x107   : > { %v3160_v9 = vpop.f32.mrf.mxu0  ;;  %3379 = vmatmul.mubr.msk.bf16.gmra.mxu0 %vm873_vm9, %v3968_v57 }
 0x109   : > { %v978_v11 = vpop.f32.mrf.mxu0  ;;  %v4146_v39 = vpop.f32.mrf.mxu1 }
 0x10a   : > { %3353 = vmatmul.mubr.msk.bf16.gmra.mxu1 %vm873_vm9, %v3972_v60 }
 0x10b   : > { %v3161_v12 = vpop.f32.mrf.mxu0  ;;  %v1022_v58 = vpop.f32.mrf.mxu1 }
 0x10d   : > { %v980_v13 = vpop.f32.mrf.mxu0  ;;  %v3173_v15 = vpop.f32.mrf.mxu1 }
 0x10f   : > { %v3204_v16 = vpop.f32.mrf.mxu0  ;;  %v4150_v18 = vpop.f32.mrf.mxu1 }
 0x111   : > { %v1390_v19 = vpop.f32.mrf.mxu0 }
 0x112   : > { %v3178_v20 = vpop.f32.mrf.mxu1 }
 0x113   : > { %v3205_v21 = vpop.f32.mrf.mxu0 }
 0x114   : > { %v1168_v22 = vpop.f32.mrf.mxu1 }
 0x115   : > { %v1393_v25 = vpop.f32.mrf.mxu0  ;;  %v1169_v26 = vadd.f32 %v1168_v22, %v948_v33 }
 0x116   : > { %v3179_v27 = vpop.f32.mrf.mxu1 }
 0x117   : > { %v3208_v28 = vpop.f32.mrf.mxu0  ;;  %v4152_v29 = vadd.f32 %v1390_v19, %v1169_v26  ;;  %v1179_v30 = vadd.f32 %v3179_v27, %v3153_v59 }
 0x118   : > { %v1171_v32 = vpop.f32.mrf.mxu1 }
 0x119   : > { %v1405_v34 = vpop.f32.mrf.mxu0  ;;  %v4154_v35 = vadd.f32 %v3205_v21, %v1179_v30  ;;  %v1172_v37 = vadd.f32 %v1171_v32, %v951_v10 }
 0x11a   : > { %v3182_v38 = vpop.f32.mrf.mxu1 }
 0x11b   : > { %v3209_v42 = vpop.f32.mrf.mxu0  ;;  %v4156_v43 = vadd.f32 %v1393_v25, %v1172_v37  ;;  %v1191_v44 = vadd.f32 %v3182_v38, %v3156_v36 }
 0x11c   : > { %v1183_v45 = vpop.f32.mrf.mxu1 }
 0x11d   : > { %v1408_v47 = vpop.f32.mrf.mxu0  ;;  %v4158_v48 = vadd.f32 %v3208_v28, %v1191_v44  ;;  %v1184_v49 = vadd.f32 %v1183_v45, %v963_v46 }
 0x11e   : > { %v3183_v50 = vpop.f32.mrf.mxu1 }
 0x11f   : > { %v3212_v51 = vpop.f32.mrf.mxu0  ;;  %v4160_v23 = vadd.f32 %v1405_v34, %v1184_v49  ;;  %v1194_v53 = vadd.f32 %v3183_v50, %v3157_v52 }
 0x120   : > { %v1186_v17 = vpop.f32.mrf.mxu1 }
 0x121   : > { %v1420_v31 = vpop.f32.mrf.mxu0  ;;  %v4162_v3 = vadd.f32 %v3209_v42, %v1194_v53 }
 0x122   : > { %v3186_v54 = vpop.f32.mrf.mxu1 }
 0x123   : > { %v3213_v56 = vpop.f32.mrf.mxu0  ;;  %v1206_v57 = vadd.f32 %v3186_v54, %v3160_v9 }
 0x124   : > { %v1198_v60 = vpop.f32.mrf.mxu1 }
 0x125   : > { %v1422_v5 = vpop.f32.mrf.mxu0  ;;  %v4164_v61 = vadd.f32 %v3212_v51, %v1206_v57 }
 0x126   : > { %v3187_v62 = vpop.f32.mrf.mxu1 }
 0x127   : > { %v3216_v63 = vpop.f32.mrf.mxu0 }
 0x128   : > { %v1200_v4 = vpop.f32.mrf.mxu1 }
 0x129   : > { %v1434_v7 = vpop.f32.mrf.mxu0  ;;  %v1201_v24 = vadd.f32 %v1200_v4, %v980_v13 }
 0x12a   : > { %v3190_v33 = vpop.f32.mrf.mxu1 }
 0x12b   : > { %v3217_v40 = vpop.f32.mrf.mxu0  ;;  %v4166_v59 = vadd.f32 %v1422_v5, %v1201_v24 }
 0x12c   : > { %v1212_v10 = vpop.f32.mrf.mxu1 }
 0x12d   : > { %v1437_v36 = vpop.f32.mrf.mxu0  ;;  %v1213_v46 = vadd.f32 %v1212_v10, %v4120_v6 }
 0x12e   : > { %v3191_v52 = vpop.f32.mrf.mxu1 }
 0x12f   : > { %v3220_v0 = vpop.f32.mrf.mxu0  ;;  %v4169_v8 = vadd.f32 %v1434_v7, %v1213_v46  ;;  %v1223_v9 = vadd.f32 %v3191_v52, %v4124_v14 }
 0x130   : > { %v1215_v11 = vpop.f32.mrf.mxu1 }
 0x131   : > { %v1449_v12 = vpop.f32.mrf.mxu0  ;;  %v4172_v58 = vadd.f32 %v3217_v40, %v1223_v9  ;;  %v1216_v13 = vadd.f32 %v1215_v11, %v4128_v41 }
 0x132   : > { %v3194_v15 = vpop.f32.mrf.mxu1 }
 0x133   : > { %v3221_v16 = vpop.f32.mrf.mxu0  ;;  %v4175_v19 = vadd.f32 %v1437_v36, %v1216_v13  ;;  %v1235_v20 = vadd.f32 %v3194_v15, %v4134_v55 }
 0x134   : > { %v1227_v21 = vpop.f32.mrf.mxu1 }
 0x135   : > { %v1452_v6 = vpop.f32.mrf.mxu0  ;;  %v4178_v22 = vadd.f32 %v3220_v0, %v1235_v20  ;;  %v1228_v25 = vadd.f32 %v1227_v21, %v4138_v1 }
 0x136   : > { %v3195_v26 = vpop.f32.mrf.mxu1 }
 0x137   : > { %v3224_v14 = vpop.f32.mrf.mxu0  ;;  %v4181_v27 = vadd.f32 %v1449_v12, %v1228_v25  ;;  %v1238_v28 = vadd.f32 %v3195_v26, %v4142_v2 }
 0x138   : > { %v1230_v30 = vpop.f32.mrf.mxu1 }
 0x139   : > { %v1464_v41 = vpop.f32.mrf.mxu0  ;;  %v4184_v32 = vadd.f32 %v3221_v16, %v1238_v28 }
 0x13a   : > { %v3198_v34 = vpop.f32.mrf.mxu1 }
 0x13b   : > { %v3225_v37 = vpop.f32.mrf.mxu0  ;;  %v1250_v55 = vadd.f32 %v3198_v34, %v4146_v39 }
 0x13c   : > { %v1242_v38 = vpop.f32.mrf.mxu1 }
 0x13d   : > { %v1466_v42 = vpop.f32.mrf.mxu0  ;;  %v4187_v44 = vadd.f32 %v3224_v14, %v1250_v55 }
 0x13e   : > { %v3199_v45 = vpop.f32.mrf.mxu1 }
 0x13f   : > { %v3256_v1 = vpop.f32.mrf.mxu0 }
 0x140   : > { %v1244_v47 = vpop.f32.mrf.mxu1 }
 0x141   : > { %v1666_v49 = vpop.f32.mrf.mxu0  ;;  %v1245_v50 = vadd.f32 %v1244_v47, %v4150_v18 }
 0x142   : > { %v3230_v51 = vpop.f32.mrf.mxu1 }
 0x143   : > { %v3257_v2 = vpop.f32.mrf.mxu0  ;;  %v4190_v53 = vadd.f32 %v1466_v42, %v1245_v50  ;;  %v4192_v17 = vadd.f32 %v3256_v1, %v3230_v51 }
 0x144   : > { %v1534_v31 = vpop.f32.mrf.mxu1 }
 0x145   : > { %v1669_v54 = vpop.f32.mrf.mxu0  ;;  %v4194_v56 = vadd.f32 %v1666_v49, %v1534_v31 }
 0x146   : > { %v3231_v39 = vpop.f32.mrf.mxu1 }
 0x147   : > { %v3260_v57 = vpop.f32.mrf.mxu0  ;;  %v4196_v60 = vadd.f32 %v3257_v2, %v3231_v39 }
 0x148   : > { %v1537_v5 = vpop.f32.mrf.mxu1 }
 0x149   : > { %v1682_v62 = vpop.f32.mrf.mxu0  ;;  %v4198_v63 = vadd.f32 %v1669_v54, %v1537_v5 }
 0x14a   : > { %v3234_v4 = vpop.f32.mrf.mxu1 }
 0x14b   : > { %v3261_v18 = vpop.f32.mrf.mxu0  ;;  %v4200_v7 = vadd.f32 %v3260_v57, %v3234_v4 }
 0x14c   : > { %v1550_v24 = vpop.f32.mrf.mxu1 }
 0x14d   : > { %v1685_v33 = vpop.f32.mrf.mxu0  ;;  %v4202_v40 = vadd.f32 %v1682_v62, %v1550_v24 }
 0x14e   : > { %v3235_v10 = vpop.f32.mrf.mxu1 }
 0x14f   : > { %v3264_v36 = vpop.f32.mrf.mxu0  ;;  %v4204_v46 = vadd.f32 %v3261_v18, %v3235_v10 }
 0x150   : > { %v1553_v52 = vpop.f32.mrf.mxu1 }
 0x151   : > { %v1698_v0 = vpop.f32.mrf.mxu0  ;;  %v4206_v9 = vadd.f32 %v1685_v33, %v1553_v52 }
 0x152   : > { %v3238_v11 = vpop.f32.mrf.mxu1 }
 0x153   : > { %v3265_v12 = vpop.f32.mrf.mxu0  ;;  %v4208_v13 = vadd.f32 %v3264_v36, %v3238_v11 }
 0x154   : > { %v1566_v15 = vpop.f32.mrf.mxu1 }
 0x155   : > { %v1701_v16 = vpop.f32.mrf.mxu0  ;;  %v4210_v20 = vadd.f32 %v1698_v0, %v1566_v15 }
 0x156   : > { %v3239_v21 = vpop.f32.mrf.mxu1 }
 0x157   : > { %v3268_v6 = vpop.f32.mrf.mxu0  ;;  %v4212_v25 = vadd.f32 %v3265_v12, %v3239_v21 }
 0x158   : > { %v1569_v26 = vpop.f32.mrf.mxu1 }
 0x159   : > { %v1714_v14 = vpop.f32.mrf.mxu0  ;;  %v4214_v28 = vadd.f32 %v1701_v16, %v1569_v26 }
 0x15a   : > { %v3242_v30 = vpop.f32.mrf.mxu1 }
 0x15b   : > { %v3269_v41 = vpop.f32.mrf.mxu0  ;;  %v4216_v34 = vadd.f32 %v3268_v6, %v3242_v30 }
 0x15c   : > { %v1582_v37 = vpop.f32.mrf.mxu1 }
 0x15d   : > { %v1717_v55 = vpop.f32.mrf.mxu0  ;;  %v4218_v38 = vadd.f32 %v1714_v14, %v1582_v37 }
 0x15e   : > { %v3243_v42 = vpop.f32.mrf.mxu1 }
 0x15f   : > { %v3272_v45 = vpop.f32.mrf.mxu0  ;;  %v4220_v1 = vadd.f32 %v3269_v41, %v3243_v42 }
 0x160   : > { %v1585_v47 = vpop.f32.mrf.mxu1 }
 0x161   : > { %v1730_v49 = vpop.f32.mrf.mxu0  ;;  %v4222_v50 = vadd.f32 %v1717_v55, %v1585_v47 }
 0x162   : > { %v3246_v51 = vpop.f32.mrf.mxu1 }
 0x163   : > { %v3273_v2 = vpop.f32.mrf.mxu0  ;;  %v4224_v31 = vadd.f32 %v3272_v45, %v3246_v51 }
 0x164   : > { %v1598_v54 = vpop.f32.mrf.mxu1 }
 0x165   : > { %v1733_v39 = vpop.f32.mrf.mxu0  ;;  %v4226_v57 = vadd.f32 %v1730_v49, %v1598_v54 }
 0x166   : > { %v3247_v5 = vpop.f32.mrf.mxu1 }
 0x167   : > { %v3276_v62 = vpop.f32.mrf.mxu0  ;;  %v4228_v4 = vadd.f32 %v3273_v2, %v3247_v5 }
 0x168   : > { %v1601_v18 = vpop.f32.mrf.mxu1 }
 0x169   : > { %v1746_v24 = vpop.f32.mrf.mxu0  ;;  %v4230_v33 = vadd.f32 %v1733_v39, %v1601_v18 }
 0x16a   : > { %v3250_v10 = vpop.f32.mrf.mxu1 }
 0x16b   : > { %v3277_v36 = vpop.f32.mrf.mxu0  ;;  %v4232_v52 = vadd.f32 %v3276_v62, %v3250_v10 }
 0x16c   : > { %v1614_v0 = vpop.f32.mrf.mxu1 }
 0x16d   : > { %v1749_v11 = vpop.f32.mrf.mxu0  ;;  %v4234_v12 = vadd.f32 %v1746_v24, %v1614_v0 }
 0x16e   : > { %v3251_v15 = vpop.f32.mrf.mxu1 }
 0x16f   : > { %v4236_v16 = vpop.f32.mrf.mxu0  ;;  %v4238_v21 = vadd.f32 %v3277_v36, %v3251_v15 }
 0x170   : > { %v1617_v6 = vpop.f32.mrf.mxu1 }
 0x171   : > { %v4240_v26 = vpop.f32.mrf.mxu0  ;;  %v4242_v14 = vadd.f32 %v1749_v11, %v1617_v6 }
 0x172   : > { %v3282_v30 = vpop.f32.mrf.mxu1 }
 0x173   : > { %v4244_v41 = vpop.f32.mrf.mxu0  ;;  %v1897_v47 = vadd.f32 %v3282_v30, %v4192_v17 }
 0x174   : > { %v1800_v37 = vpop.f32.mrf.mxu1 }
 0x175   : > { %v4246_v55 = vpop.f32.mrf.mxu0  ;;  %v1895_v49 = vadd.f32 %v1800_v37, %v4194_v56  ;;  %v1947_v62 = vrot.slane %v1897_v47, 1 }
 0x176   : > { %v3283_v42 = vpop.f32.mrf.mxu1 }
 0x177   : > { %v4248_v45 = vpop.f32.mrf.mxu0  ;;  %v1944_v18 = vrot.slane %v1895_v49, 1  ;;  %v1898_v24 = vadd.f32 %v3283_v42, %v4196_v60 }
 0x178   : > { %v1803_v51 = vpop.f32.mrf.mxu1 }
 0x179   : > { %v4252_v2 = vpop.f32.mrf.mxu0  ;;  %v1896_v54 = vadd.f32 %v1803_v51, %v4198_v63  ;;  %v1949_v37 = vrot.slane %v1898_v24, 1 }
 0x17a   : > { %v3286_v39 = vpop.f32.mrf.mxu1 }
 0x17b   : > { %v4255_v5 = vpop.f32.mrf.mxu0  ;;  %v1945_v10 = vrot.slane %v1896_v54, 1  ;;  %v1901_v11 = vadd.f32 %v3286_v39, %v4200_v7 }
 0x17c   : > { %v1816_v36 = vpop.f32.mrf.mxu1 }
 0x17d   : > { %v4258_v0 = vpop.f32.mrf.mxu0  ;;  %v1946_v17 = vsel %vm1943_vm12, %v1944_v18, %v1945_v10  ;;  %v1948_v56 = vsel %vm1943_vm12, %v1945_v10, %v1947_v62  ;;  %v1899_v63 = vadd.f32 %v1816_v36, %v4202_v40  ;;  %v1954_v54 = vrot.slane %v1901_v11, 1 }
 0x17e   : > { %v4265_v15 = vadd.f32 %v1946_v17, %v4152_v29  ;;  %v4268_v6 = vadd.f32 %v1948_v56, %v4156_v43  ;;  %v3287_v30 = vpop.f32.mrf.mxu1 }
 0x17f   : > { %v4270_v60 = vpop.f32.mrf.mxu0  ;;  %v1950_v42 = vrot.slane %v1899_v63, 1  ;;  %v1902_v47 = vadd.f32 %v3287_v30, %v4204_v46 }
 0x180   : > { %v1819_v49 = vpop.f32.mrf.mxu1 }
 0x181   : > { %v4273_v51 = vpop.f32.mrf.mxu0  ;;  %v1951_v7 = vsel %vm1943_vm12, %v1949_v37, %v1950_v42  ;;  %v1955_v40 = vrot.slane %v1902_v47, 1  ;;  %v1900_v29 = vadd.f32 %v1819_v49, %v4206_v9 }
 0x182   : > { %v4278_v39 = vadd.f32 %v1951_v7, %v4154_v35  ;;  %v3290_v43 = vpop.f32.mrf.mxu1 }
 0x183   : > { %v4280_v62 = vpop.f32.mrf.mxu0  ;;  %v1956_v18 = vsel %vm1943_vm12, %v1954_v54, %v1955_v40  ;;  %v1952_v24 = vrot.slane %v1900_v29, 1  ;;  %v1905_v56 = vadd.f32 %v3290_v43, %v4208_v13 }
 0x184   : > { %v4284_v46 = vadd.f32 %v1956_v18, %v4158_v48  ;;  %v1832_v10 = vpop.f32.mrf.mxu1 }
 0x185   : > { %v4286_v36 = vpop.f32.mrf.mxu0  ;;  %v1953_v17 = vsel %vm1943_vm12, %v1950_v42, %v1952_v24  ;;  %v1903_v9 = vadd.f32 %v1832_v10, %v4210_v20  ;;  %v1960_v49 = vrot.slane %v1905_v56, 1 }
 0x186   : > { %v4292_v35 = vadd.f32 %v1953_v17, %v4160_v23  ;;  %v3291_v11 = vpop.f32.mrf.mxu1 }
 0x187   : > { %v4294_v63 = vpop.f32.mrf.mxu0  ;;  %v1957_v30 = vrot.slane %v1903_v9, 1  ;;  %v1906_v37 = vadd.f32 %v3291_v11, %v4212_v25 }
 0x188   : > { %v1835_v48 = vpop.f32.mrf.mxu1 }
 0x189   : > { %v4297_v47 = vpop.f32.mrf.mxu0  ;;  %v1958_v54 = vsel %vm1943_vm12, %v1955_v40, %v1957_v30  ;;  %v1962_v42 = vrot.slane %v1906_v37, 1  ;;  %v1904_v13 = vadd.f32 %v1835_v48, %v4214_v28 }
 0x18a   : > { %v4302_v20 = vadd.f32 %v1958_v54, %v4162_v3  ;;  %v3294_v23 = vpop.f32.mrf.mxu1 }
 0x18b   : > { %v4304_v7 = vpop.f32.mrf.mxu0  ;;  %v1963_v29 = vsel %vm1943_vm12, %v1960_v49, %v1962_v42  ;;  %v1959_v43 = vrot.slane %v1904_v13, 1  ;;  %v1909_v17 = vadd.f32 %v3294_v23, %v4216_v34 }
 0x18c   : > { %v4308_v25 = vadd.f32 %v1963_v29, %v4164_v61  ;;  %v1848_v18 = vpop.f32.mrf.mxu1 }
 0x18d   : > { %v4310_v24 = vpop.f32.mrf.mxu0  ;;  %v1961_v40 = vsel %vm1943_vm12, %v1959_v43, %v1960_v49  ;;  %v1907_v56 = vadd.f32 %v1848_v18, %v4218_v38  ;;  %v1967_v48 = vrot.slane %v1909_v17, 1 }
 0x18e   : > { %v4314_v10 = vadd.f32 %v1961_v40, %v4166_v59  ;;  %v3295_v28 = vpop.f32.mrf.mxu1 }
 0x18f   : > { %v4316_v3 = vpop.f32.mrf.mxu0  ;;  %v1964_v49 = vrot.slane %v1907_v56, 1  ;;  %v1910_v59 = vadd.f32 %v3295_v28, %v4220_v1 }
 0x190   : > { %v1851_v9 = vpop.f32.mrf.mxu1 }
 0x191   : > { %v4320_v11 = vpop.f32.mrf.mxu0  ;;  %v1908_v61 = vadd.f32 %v1851_v9, %v4222_v50  ;;  %v1969_v40 = vrot.slane %v1910_v59, 1 }
 0x192   : > { %v3298_v30 = vpop.f32.mrf.mxu1 }
 0x193   : > { %v4323_v37 = vpop.f32.mrf.mxu0  ;;  %v1965_v54 = vrot.slane %v1908_v61, 1  ;;  %v1913_v23 = vadd.f32 %v3298_v30, %v4224_v31 }
 0x194   : > { %v1864_v42 = vpop.f32.mrf.mxu1 }
 0x195   : > { %v4326_v13 = vpop.f32.mrf.mxu0  ;;  %v1966_v34 = vsel %vm1943_vm12, %v1964_v49, %v1965_v54  ;;  %v1968_v38 = vsel %vm1943_vm12, %v1965_v54, %v1967_v48  ;;  %v1911_v29 = vadd.f32 %v1864_v42, %v4226_v57  ;;  %v1974_v61 = vrot.slane %v1913_v23, 1 }
 0x196   : > { %v4333_v50 = vadd.f32 %v1966_v34, %v4169_v8  ;;  %v4336_v43 = vadd.f32 %v1968_v38, %v4175_v19  ;;  %v3299_v18 = vpop.f32.mrf.mxu1 }
 0x197   : > { %v4338_v1 = vpop.f32.mrf.mxu0  ;;  %v1970_v28 = vrot.slane %v1911_v29, 1  ;;  %v1914_v17 = vadd.f32 %v3299_v18, %v4228_v4 }
 0x198   : > { %v1867_v56 = vpop.f32.mrf.mxu1 }
 0x199   : > { %v4341_v9 = vpop.f32.mrf.mxu0  ;;  %v1971_v31 = vsel %vm1943_vm12, %v1969_v40, %v1970_v28  ;;  %v1975_v57 = vrot.slane %v1914_v17, 1  ;;  %v1912_v8 = vadd.f32 %v1867_v56, %v4230_v33 }
 0x19a   : > { %v4346_v30 = vadd.f32 %v1971_v31, %v4172_v58  ;;  %v3302_v19 = vpop.f32.mrf.mxu1 }
 0x19b   : > { %v4348_v48 = vpop.f32.mrf.mxu0  ;;  %v1976_v49 = vsel %vm1943_vm12, %v1974_v61, %v1975_v57  ;;  %v1972_v59 = vrot.slane %v1912_v8, 1  ;;  %v1917_v38 = vadd.f32 %v3302_v19, %v4232_v52 }
 0x19c   : > { %v4352_v4 = vadd.f32 %v1976_v49, %v4178_v22  ;;  %v1880_v54 = vpop.f32.mrf.mxu1 }
 0x19d   : > { %v4354_v42 = vpop.f32.mrf.mxu0  ;;  %v1973_v34 = vsel %vm1943_vm12, %v1970_v28, %v1972_v59  ;;  %v1915_v33 = vadd.f32 %v1880_v54, %v4234_v12  ;;  %v1980_v56 = vrot.slane %v1917_v38, 1 }
 0x19e   : > { %v4360_v58 = vadd.f32 %v1973_v34, %v4181_v27  ;;  %v3303_v23 = vpop.f32.mrf.mxu1 }
 0x19f   : > { %v3360_v29 = vpop.f32.mrf.mxu0  ;;  %v1977_v18 = vrot.slane %v1915_v33, 1  ;;  %v1918_v40 = vadd.f32 %v3303_v23, %v4238_v21 }
 0x1a0   : > { %v1883_v17 = vpop.f32.mrf.mxu1 }
 0x1a1   : > { %v2323_v22 = vpop.f32.mrf.mxu0  ;;  %v1978_v61 = vsel %vm1943_vm12, %v1975_v57, %v1977_v18  ;;  %v1982_v31 = vrot.slane %v1918_v40, 1  ;;  %v1916_v28 = vadd.f32 %v1883_v17, %v4242_v14 }
 0x1a2   : > { %v4366_v52 = vadd.f32 %v1978_v61, %v4184_v32  ;;  %v3334_v12 = vpop.f32.mrf.mxu1 }
 0x1a3   : > { %v3361_v8 = vpop.f32.mrf.mxu0  ;;  %v1983_v27 = vsel %vm1943_vm12, %v1980_v56, %v1982_v31  ;;  %v1979_v19 = vrot.slane %v1916_v28, 1  ;;  %v2198_v21 = vadd.f32 %v3334_v12, %v4236_v16 }
 0x1a4   : > { %v4370_v49 = vadd.f32 %v1983_v27, %v4187_v44  ;;  %v2189_v59 = vpop.f32.mrf.mxu1 }
 0x1a5   : > { %v2326_v54 = vpop.f32.mrf.mxu0  ;;  %v1981_v57 = vsel %vm1943_vm12, %v1979_v19, %v1980_v56  ;;  %v2190_v34 = vadd.f32 %v2189_v59, %v4240_v26  ;;  %v2420_v33 = vadd.f32 %v3360_v29, %v2198_v21  ;;  %v4387_v59 = vld [vmem:[%s4511_s4] ss:$0 sm:$0xff] }
 0x1a6   : > { %v4376_v14 = vadd.f32 %v1981_v57, %v4190_v53  ;;  %v3335_v32 = vpop.f32.mrf.mxu1 }
 0x1a7   : > { %v3364_v38 = vpop.f32.mrf.mxu0  ;;  %v2418_v40 = vadd.f32 %v2323_v22, %v2190_v34  ;;  %v2201_v44 = vadd.f32 %v3335_v32, %v4244_v41  ;;  %v2470_v28 = vrot.slane %v2420_v33, 2 }
 0x1a8   : > { %v2192_v23 = vpop.f32.mrf.mxu1 }
 0x1a9   : > { %v2339_v18 = vpop.f32.mrf.mxu0  ;;  %v2193_v17 = vadd.f32 %v2192_v23, %v4246_v55  ;;  %v2467_v12 = vrot.slane %v2418_v40, 2  ;;  %v2421_v27 = vadd.f32 %v3361_v8, %v2201_v44 }
 0x1aa   : > { %v3338_v16 = vpop.f32.mrf.mxu1 }
 0x1ab   : > { %v3365_v61 = vpop.f32.mrf.mxu0  ;;  %v2419_v31 = vadd.f32 %v2326_v54, %v2193_v17  ;;  %v2214_v56 = vadd.f32 %v3338_v16, %v4248_v45  ;;  %v2472_v33 = vrot.slane %v2421_v27, 2 }
 0x1ac   : > { %v2205_v26 = vpop.f32.mrf.mxu1 }
 0x1ad   : > { %v2342_v53 = vpop.f32.mrf.mxu0  ;;  %v2468_v19 = vrot.slane %v2419_v31, 2  ;;  %v2206_v29 = vadd.f32 %v2205_v26, %v4252_v2  ;;  %v2424_v45 = vadd.f32 %v3364_v38, %v2214_v56 }
 0x1ae   : > { %v3339_v21 = vpop.f32.mrf.mxu1 }
 0x1af   : > { %v3368_v22 = vpop.f32.mrf.mxu0  ;;  %v2469_v41 = vsel %vm2466_vm13, %v2467_v12, %v2468_v19  ;;  %v2471_v55 = vsel %vm2466_vm13, %v2468_v19, %v2470_v28  ;;  %v2422_v54 = vadd.f32 %v2339_v18, %v2206_v29  ;;  %v2217_v34 = vadd.f32 %v3339_v21, %v4255_v5 }
 0x1b0   : > { %v2523_v57 = vadd.f32 %v2469_v41, %v4265_v15  ;;  %v2524_v8 = vadd.f32 %v2471_v55, %v4268_v6  ;;  %v2208_v2 = vpop.f32.mrf.mxu1  ;;  %v2477_v31 = vrot.slane %v2424_v45, 2 }
 0x1b1   : > { %v2355_v32 = vpop.f32.mrf.mxu0  ;;  %v2473_v23 = vrot.slane %v2422_v54, 2  ;;  %v2209_v40 = vadd.f32 %v2208_v2, %v4258_v0  ;;  %v2425_v16 = vadd.f32 %v3365_v61, %v2217_v34 }
 0x1b2   : > { %v2546_v44 = vadd.f32 %v4387_v59, %v2523_v57  ;;  %v2547_v17 = vadd.f32 %v4387_v59, %v2524_v8  ;;  %v3342_v38 = vpop.f32.mrf.mxu1 }
 0x1b3   : > { %v3369_v18 = vpop.f32.mrf.mxu0  ;;  %v2474_v15 = vsel %vm2466_vm13, %v2472_v33, %v2473_v23  ;;  %v2423_v6 = vadd.f32 %v2342_v53, %v2209_v40  ;;  %v2230_v5 = vadd.f32 %v3342_v38, %v4270_v60  ;;  %v2478_v12 = vrot.slane %v2425_v16, 2 }
 0x1b4   : > { %v2562_v56 = vmax.f32 %v2546_v44, 0.0  ;;  %v2563_v28 = vmax.f32 %v2547_v17, 0.0  ;;  %v2525_v26 = vadd.f32 %v2474_v15, %v4278_v39  ;;  %v2221_v0 = vpop.f32.mrf.mxu1 }
 0x1b5   : > { %v2358_v27 = vpop.f32.mrf.mxu0  ;;  %v2475_v61 = vrot.slane %v2423_v6, 2  ;;  %v2222_v53 = vadd.f32 %v2221_v0, %v4273_v51  ;;  %v2479_v39 = vsel %vm2466_vm13, %v2477_v31, %v2478_v12  ;;  %v2428_v54 = vadd.f32 %v3368_v22, %v2230_v5 }
 0x1b6   : > { %v3015_v60 = vpack.c.bf16 %v2562_v56, %v2562_v56  ;;  %v3016_v19 = vpack.c.bf16 %v2563_v28, %v2563_v28  ;;  %v2548_v29 = vadd.f32 %v4387_v59, %v2525_v26  ;;  %v3343_v21 = vpop.f32.mrf.mxu1  ;;  %v2527_v55 = vadd.f32 %v2479_v39, %v4284_v46 }
 0x1b7   : > { %v3372_v41 = vpop.f32.mrf.mxu0  ;;  %v2476_v45 = vsel %vm2466_vm13, %v2473_v23, %v2475_v61  ;;  %v2426_v57 = vadd.f32 %v2355_v32, %v2222_v53  ;;  %v2233_v34 = vadd.f32 %v3343_v21, %v4280_v62  ;;  %v2483_v31 = vrot.slane %v2428_v54, 2 }
 0x1b8   : > { %2643 = vst.msk [vmem:[%s4403_s15] sm:$0xf] %vm2642_vm14, %v3015_v60  ;;  %2644 = vst.msk [vmem:[%s4403_s15 + $0x4] sm:$0xf] %vm2642_vm14, %v3016_v19  ;;  %v2564_v8 = vmax.f32 %v2548_v29, 0.0  ;;  %v2526_v51 = vadd.f32 %v2476_v45, %v4292_v35  ;;  %v2224_v2 = vpop.f32.mrf.mxu1  ;;  %v2550_v40 = vadd.f32 %v4387_v59, %v2527_v55 }
 0x1b9   : > { %v2371_v33 = vpop.f32.mrf.mxu0  ;;  %v2480_v44 = vrot.slane %v2426_v57, 2  ;;  %v2225_v46 = vadd.f32 %v2224_v2, %v4286_v36  ;;  %v2429_v32 = vadd.f32 %v3369_v18, %v2233_v34 }
 0x1ba   : > { %v3017_v23 = vpack.c.bf16 %v2564_v8, %v2564_v8  ;;  %v2549_v22 = vadd.f32 %v4387_v59, %v2526_v51  ;;  %v3346_v17 = vpop.f32.mrf.mxu1  ;;  %v2566_v38 = vmax.f32 %v2550_v40, 0.0 }
 0x1bb   : > { %v3373_v16 = vpop.f32.mrf.mxu0  ;;  %v2481_v35 = vsel %vm2466_vm13, %v2478_v12, %v2480_v44  ;;  %v2427_v15 = vadd.f32 %v2358_v27, %v2225_v46  ;;  %v2485_v5 = vrot.slane %v2429_v32, 2  ;;  %v2246_v36 = vadd.f32 %v3346_v17, %v4294_v63 }
 0x1bc   : > { %2645 = vst.msk [vmem:[%s4403_s15 + $0x8] sm:$0xf] %vm2642_vm14, %v3017_v23  ;;  %v2565_v62 = vmax.f32 %v2549_v22, 0.0  ;;  %v2528_v6 = vadd.f32 %v2481_v35, %v4302_v20  ;;  %v2237_v56 = vpop.f32.mrf.mxu1  ;;  %v3019_v18 = vpack.c.bf16 %v2566_v38, %v2566_v38 }
 0x1bd   : > { %v2374_v28 = vpop.f32.mrf.mxu0  ;;  %v2482_v26 = vrot.slane %v2427_v15, 2  ;;  %v2238_v0 = vadd.f32 %v2237_v56, %v4297_v47  ;;  %v2486_v27 = vsel %vm2466_vm13, %v2483_v31, %v2485_v5  ;;  %v2432_v47 = vadd.f32 %v3372_v41, %v2246_v36 }
 0x1be   : > { %v3018_v61 = vpack.c.bf16 %v2565_v62, %v2565_v62  ;;  %v2551_v12 = vadd.f32 %v4387_v59, %v2528_v6  ;;  %v3347_v53 = vpop.f32.mrf.mxu1  ;;  %2647 = vst.msk [vmem:[%s4403_s15 + $0x10] sm:$0xf] %vm2642_vm14, %v3019_v18  ;;  %v2530_v20 = vadd.f32 %v2486_v27, %v4308_v25 }
 0x1bf   : > { %v3376_v60 = vpop.f32.mrf.mxu0  ;;  %v2484_v19 = vsel %vm2466_vm13, %v2482_v26, %v2483_v31  ;;  %v2430_v39 = vadd.f32 %v2371_v33, %v2238_v0  ;;  %v2249_v54 = vadd.f32 %v3347_v53, %v4304_v7  ;;  %v2490_v33 = vrot.slane %v2432_v47, 2 }
 0x1c0   : > { %2646 = vst.msk [vmem:[%s4403_s15 + $0xc] sm:$0xf] %vm2642_vm14, %v3018_v61  ;;  %v2567_v63 = vmax.f32 %v2551_v12, 0.0  ;;  %v2529_v29 = vadd.f32 %v2484_v19, %v4314_v10  ;;  %v2240_v21 = vpop.f32.mrf.mxu1  ;;  %v2553_v45 = vadd.f32 %v4387_v59, %v2530_v20 }
 0x1c1   : > { %v2387_v55 = vpop.f32.mrf.mxu0  ;;  %v2241_v57 = vadd.f32 %v2240_v21, %v4310_v24  ;;  %v2487_v44 = vrot.slane %v2430_v39, 2  ;;  %v2433_v24 = vadd.f32 %v3373_v16, %v2249_v54 }
 0x1c2   : > { %v3020_v8 = vpack.c.bf16 %v2567_v63, %v2567_v63  ;;  %v2552_v25 = vadd.f32 %v4387_v59, %v2529_v29  ;;  %v3350_v51 = vpop.f32.mrf.mxu1  ;;  %v2569_v2 = vmax.f32 %v2553_v45, 0.0 }
 0x1c3   : > { %v3377_v34 = vpop.f32.mrf.mxu0  ;;  %v2431_v40 = vadd.f32 %v2374_v28, %v2241_v57  ;;  %v2262_v10 = vadd.f32 %v3350_v51, %v4316_v3  ;;  %v2492_v36 = vrot.slane %v2433_v24, 2 }
 0x1c4   : > { %2648 = vst.msk [vmem:[%s4403_s15 + $0x14] sm:$0xf] %vm2642_vm14, %v3020_v8  ;;  %v2568_v41 = vmax.f32 %v2552_v25, 0.0  ;;  %v2253_v46 = vpop.f32.mrf.mxu1  ;;  %v3022_v23 = vpack.c.bf16 %v2569_v2, %v2569_v2 }
 0x1c5   : > { %v2390_v7 = vpop.f32.mrf.mxu0  ;;  %v2488_v22 = vrot.slane %v2431_v40, 2  ;;  %v2254_v32 = vadd.f32 %v2253_v46, %v4320_v11  ;;  %v2436_v15 = vadd.f32 %v3376_v60, %v2262_v10 }
 0x1c6   : > { %v3021_v17 = vpack.c.bf16 %v2568_v41, %v2568_v41  ;;  %v3351_v38 = vpop.f32.mrf.mxu1  ;;  %2650 = vst.msk [vmem:[%s4403_s15 + $0x1c] sm:$0xf] %vm2642_vm14, %v3022_v23 }
 0x1c7   : > { %v3380_v31 = vpop.f32.mrf.mxu0  ;;  %v2489_v3 = vsel %vm2466_vm13, %v2487_v44, %v2488_v22  ;;  %v2491_v35 = vsel %vm2466_vm13, %v2488_v22, %v2490_v33  ;;  %v2434_v62 = vadd.f32 %v2387_v55, %v2254_v32  ;;  %v2265_v5 = vadd.f32 %v3351_v38, %v4323_v37 }
 0x1c8   : > { %2649 = vst.msk [vmem:[%s4403_s15 + $0x18] sm:$0xf] %vm2642_vm14, %v3021_v17  ;;  %v2531_v6 = vadd.f32 %v2489_v3, %v4333_v50  ;;  %v2532_v16 = vadd.f32 %v2491_v35, %v4336_v43  ;;  %v2256_v11 = vpop.f32.mrf.mxu1  ;;  %v2497_v27 = vrot.slane %v2436_v15, 2 }
 0x1c9   : > { %v2493_v56 = vrot.slane %v2434_v62, 2  ;;  %v2257_v28 = vadd.f32 %v2256_v11, %v4326_v13  ;;  %v2437_v0 = vadd.f32 %v3377_v34, %v2265_v5  ;;  %v2403_v12 = vpop.f32.mrf.mxu0 }
 0x1ca   : > { %v2554_v18 = vadd.f32 %v4387_v59, %v2531_v6  ;;  %v2555_v26 = vadd.f32 %v4387_v59, %v2532_v16  ;;  %v3354_v61 = vpop.f32.mrf.mxu1 }
 0x1cb   : > { %v2494_v53 = vsel %vm2466_vm13, %v2492_v36, %v2493_v56  ;;  %v2435_v50 = vadd.f32 %v2390_v7, %v2257_v28  ;;  %v2278_v43 = vadd.f32 %v3354_v61, %v4338_v1  ;;  %v2498_v13 = vrot.slane %v2437_v0, 2  ;;  %v3381_v54 = vpop.f32.mrf.mxu0 }
 0x1cc   : > { %v2570_v60 = vmax.f32 %v2554_v18, 0.0  ;;  %v2571_v37 = vmax.f32 %v2555_v26, 0.0  ;;  %v2533_v20 = vadd.f32 %v2494_v53, %v4346_v30  ;;  %v2269_v19 = vpop.f32.mrf.mxu1 }
 0x1cd   : > { %v2495_v63 = vrot.slane %v2435_v50, 2  ;;  %v2270_v29 = vadd.f32 %v2269_v19, %v4341_v9  ;;  %v2499_v55 = vsel %vm2466_vm13, %v2497_v27, %v2498_v13  ;;  %v2440_v25 = vadd.f32 %v3380_v31, %v2278_v43  ;;  %v2406_v44 = vpop.f32.mrf.mxu0 }
 0x1ce   : > { %v3023_v47 = vpack.c.bf16 %v2570_v60, %v2570_v60  ;;  %v3024_v39 = vpack.c.bf16 %v2571_v37, %v2571_v37  ;;  %v2556_v21 = vadd.f32 %v4387_v59, %v2533_v20  ;;  %v3355_v45 = vpop.f32.mrf.mxu1  ;;  %v2535_v1 = vadd.f32 %v2499_v55, %v4352_v4 }
 0x1cf   : > { %v2496_v57 = vsel %vm2466_vm13, %v2493_v56, %v2495_v63  ;;  %v2438_v8 = vadd.f32 %v2403_v12, %v2270_v29  ;;  %v2281_v51 = vadd.f32 %v3355_v45, %v4348_v48  ;;  %v2503_v23 = vrot.slane %v2440_v25, 2 }
 0x1d0   : > { %2651 = vst.msk [vmem:[%s4403_s15 + $0x20] sm:$0xf] %vm2642_vm14, %v3023_v47  ;;  %2652 = vst.msk [vmem:[%s4403_s15 + $0x24] sm:$0xf] %vm2642_vm14, %v3024_v39  ;;  %v2572_v30 = vmax.f32 %v2556_v21, 0.0  ;;  %v2534_v9 = vadd.f32 %v2496_v57, %v4360_v58  ;;  %v2272_v34 = vpop.f32.mrf.mxu1  ;;  %v2558_v2 = vadd.f32 %v4387_v59, %v2535_v1 }
 0x1d1   : > { %v2500_v40 = vrot.slane %v2438_v8, 2  ;;  %v2273_v4 = vadd.f32 %v2272_v34, %v4354_v42  ;;  %v2441_v33 = vadd.f32 %v3381_v54, %v2281_v51 }
 0x1d2   : > { %v3025_v10 = vpack.c.bf16 %v2572_v30, %v2572_v30  ;;  %v2557_v41 = vadd.f32 %v4387_v59, %v2534_v9  ;;  %v2574_v46 = vmax.f32 %v2558_v2, 0.0 }
 0x1d3   : > { %v2501_v7 = vsel %vm2466_vm13, %v2498_v13, %v2500_v40  ;;  %v2439_v58 = vadd.f32 %v2406_v44, %v2273_v4  ;;  %v2505_v22 = vrot.slane %v2441_v33, 2 }
 0x1d4   : > { %2653 = vst.msk [vmem:[%s4403_s15 + $0x28] sm:$0xf] %vm2642_vm14, %v3025_v10  ;;  %v2573_v48 = vmax.f32 %v2557_v41, 0.0  ;;  %v2536_v24 = vadd.f32 %v2501_v7, %v4366_v52  ;;  %v3027_v42 = vpack.c.bf16 %v2574_v46, %v2574_v46 }
 0x1d5   : > { %v2502_v32 = vrot.slane %v2439_v58, 2  ;;  %v2506_v31 = vsel %vm2466_vm13, %v2503_v23, %v2505_v22 }
 0x1d6   : > { %v3026_v17 = vpack.c.bf16 %v2573_v48, %v2573_v48  ;;  %v2559_v38 = vadd.f32 %v4387_v59, %v2536_v24  ;;  %2655 = vst.msk [vmem:[%s4403_s15 + $0x30] sm:$0xf] %vm2642_vm14, %v3027_v42  ;;  %v2538_v3 = vadd.f32 %v2506_v31, %v4370_v49 }
 0x1d7   : > { %v2504_v35 = vsel %vm2466_vm13, %v2502_v32, %v2503_v23 }
 0x1d8   : > { %2654 = vst.msk [vmem:[%s4403_s15 + $0x2c] sm:$0xf] %vm2642_vm14, %v3026_v17  ;;  %v2575_v52 = vmax.f32 %v2559_v38, 0.0  ;;  %v2537_v15 = vadd.f32 %v2504_v35, %v4376_v14  ;;  %v2561_v62 = vadd.f32 %v4387_v59, %v2538_v3 }
 0x1da   : > { %v3028_v6 = vpack.c.bf16 %v2575_v52, %v2575_v52  ;;  %v2560_v16 = vadd.f32 %v4387_v59, %v2537_v15  ;;  %v2577_v5 = vmax.f32 %v2561_v62, 0.0 }
 0x1dc   : > { %2656 = vst.msk [vmem:[%s4403_s15 + $0x34] sm:$0xf] %vm2642_vm14, %v3028_v6  ;;  %v2576_v11 = vmax.f32 %v2560_v16, 0.0  ;;  %v3030_v36 = vpack.c.bf16 %v2577_v5, %v2577_v5 }
 0x1de   : > { %v3029_v56 = vpack.c.bf16 %v2576_v11, %v2576_v11  ;;  %2658 = vst.msk [vmem:[%s4403_s15 + $0x3c] sm:$0xf] %vm2642_vm14, %v3030_v36 }
 0x1e0   : > { %2657 = vst.msk [vmem:[%s4403_s15 + $0x38] sm:$0xf] %vm2642_vm14, %v3029_v56 }
 0x1e1 PF: > { %s15_s22 = sadd.s32 1, %s3509_s22   ;;  %s4520_s18 = smov %s3501_s20 }
 0x1e2   : > { %p12_p12 = scmp.ge.s32.totalorder %s15_s22, 6   ;;  %s4521_s19 = smov %s3505_s21 }
 0x1e3   : > { %s4522_s20 = smov %s4525_s23  ;;  %s4523_s21 = smov %s4529_s24 }
 0x1e4   :  { %14 = sbr.rel (!%p12_p12) target bundleno = 3 (0x3), region = 87 }

// kernel: context_module.3
= control target key start
LH: loop header
LB: loop body
LE: loop exit
PB: predicated region body
PF: predicated region fallthrough
CT: control target
= control target key end

     0   :  { %s3726_s21 = smov 0   ;;  %s3728_s22 = smov 0   ;;  %s4742_s0 = inlined_call_operand.vmem [shape: bf16[2,16,16,8], index: 0, kind: input, shape index: {}, may-alias: {0,1,2}]   ;;  %s4743_s1 = inlined_call_operand.vmem [shape: bf16[2,16,16,8], index: 1, kind: input, shape index: {}, may-alias: {0,1,2}]   ;;  %s4744_s2 = inlined_call_operand.vmem [shape: bf16[2,16,16,8], index: 2, kind: input, shape index: {}, may-alias: {0,1,2}]   ;;  %s4745_s3 = inlined_call_operand.vmem [shape: bf16[3,3,8,12], index: 3, kind: input, shape index: {}]   ;;  %s4746_s4 = inlined_call_operand.vmem [shape: f32[1,12], index: 4, kind: input, shape index: {}]   ;;  %s4747_s5 = inlined_call_operand.vmem [shape: bf16[2,16,16,8], index: 5, kind: output, shape index: {0}]   ;;  %s4748_s6 = inlined_call_operand.vmem [shape: bf16[2,16,16,4], index: 6, kind: output, shape index: {1}]  }
   0x1   :  { %s3730_s23 = smov 0   ;;  %s3732_s24 = smov 0  }
   0x2   :  { %s3734_s25 = smov 0  }
   0x3 LB: > { %s26_s26 = sadd.s32 1, %s3679_s23  ;;  %s29_s27 = sadd.s32 1, %s3683_s24  ;;  %s3687_s25 = sphi %s3734_s25, %s17_s25   ;;  %s3683_s24 = sphi %s3732_s24, %s4759_s24   ;;  %s3679_s23 = sphi %s3730_s23, %s4758_s23   ;;  %s3675_s22 = sphi %s3728_s22, %s4757_s22   ;;  %s3671_s21 = sphi %s3726_s21, %s4756_s21  }
   0x4   : > { %p27_p0 = scmp.ge.s32.totalorder %s26_s26, 2  ;;  %p2983_p1 = scmp.ge.s32.totalorder %s3687_s25, 1 }
   0x5   : > { %p303_p2 = scmp.lt.s32.totalorder %s3687_s25, 5 }
   0x6   : > { %s4761_s26 = smov (%p27_p0, %s26_s26), 0  ;;  %s4763_s27 = smov (!%p27_p0, %s29_s27), %s3683_s24 }
   0x7   : > { %p304_p3 = pnand %p2983_p1, %p303_p2  ;;  %p31_p4 = scmp.ge.s32.totalorder %s4763_s27, 2 }
   0x8   : > { %s3762_s30 = sshll.u32 (!%p304_p3), %s3671_s21, 3  ;;  %p380_p5 = scmp.lt.s32.totalorder (!%p304_p3), %s3675_s22, 1 }
   0x9   : > { %s4765_s27 = smov (%p31_p4, %s4763_s27), 0  ;;  %307 = sbr.rel (%p304_p3) target bundleno = 595 (0x253), region = 40 }
   0xa   : > { %p382_p6 = scmp.lt.s32.totalorder (!%p304_p3), %s3762_s30, 15  ;;  %s3819_s15 = sadd.s32 (!%p304_p3), 4294967295, %s3762_s30 }
   0xb   : > { %p392_p7 = scmp.gt.s32.totalorder (!%p304_p3), %s3819_s15, 0  ;;  %p2990_p8 = scmp.lt.s32.totalorder (!%p304_p3), %s3819_s15, 15 }
   0xc   : > { %s3191_s28 = sadd.s32 (!%p304_p3), 8, %s3762_s30  ;;  %p723_p9 = scmp.gt.s32.totalorder (!%p304_p3), %s3671_s21, 0 }
   0xd   : > { %p3935_p10 = scmp.lt.s32.totalorder (!%p304_p3), %s3191_s28, 15  ;;  %p756_p11 = scmp.lt.s32.totalorder (!%p304_p3), %s3671_s21, 1 }
   0xe   : > { %v3013_v0 = vld [vmem:[%s4745_s3 + $0xc] sm:$0xf]  ;;  %vm963_vm0 = vcmask 1043456   ;;  %vm447_vm1 = vcmask 60416   ;;  %s4767_s22 = smov (!%p380_p5, %s3675_s22), 1  ;;  %v3689_v2 = vmov 0  }
   0xf   : > { %3562 = vmatprep.subr.msk.bf16.mxu1 %vm963_vm0, %v3013_v0  ;;  %3561 = vmatprep.subr.msk.bf16.mxu0 %vm963_vm0, %v3013_v0  ;;  %v965_v1 = vsel %vm963_vm0, %v3013_v0, 0  ;;  %451 = vst.msk [vmem:[#allocation2 + $0xc] sm:$0xf] %vm447_vm1, %v3689_v2  ;;  %452 = vst.msk [vmem:[#allocation2 + $0x10] sm:$0xf] %vm447_vm1, %v3689_v2  ;;  %s383_s7 = scalar_select %p382_p6, %s3762_s30, 15 }
  0x10   : > { %3560 = vmatpush3.bf16.msra.mxu1 %v965_v1  ;;  %3326 = vmatpush3.bf16.msra.mxu0 %v965_v1  ;;  %448 = vst.msk [vmem:[#allocation2] sm:$0xf] %vm447_vm1, %v3689_v2  ;;  %449 = vst.msk [vmem:[#allocation2 + $0x4] sm:$0xf] %vm447_vm1, %v3689_v2  ;;  %v3806_v3 = vld [vmem:[%s4745_s3] sm:$0xf] }
  0x11   : > { %450 = vst.msk [vmem:[#allocation2 + $0x8] sm:$0xf] %vm447_vm1, %v3689_v2  ;;  %453 = vst.msk [vmem:[#allocation2 + $0x14] sm:$0xf] %vm447_vm1, %v3689_v2  ;;  %v3062_v4 = vld [vmem:[%s4745_s3 + $0x18] sm:$0xf]  ;;  %3563 = vmatprep.subr.msk.bf16.mxu1 %vm963_vm0, %v3806_v3 }
  0x12   : > { %454 = vst.msk [vmem:[#allocation2 + $0x18] sm:$0xf] %vm447_vm1, %v3689_v2  ;;  %455 = vst.msk [vmem:[#allocation2 + $0x1c] sm:$0xf] %vm447_vm1, %v3689_v2  ;;  %s3812_s12 = sshll.u32 %s4767_s22, 5  ;;  %3564 = vmatprep.subr.msk.bf16.mxu0 %vm963_vm0, %v3062_v4  ;;  %s2985_s13 = sshll.u32 %s383_s7, 1 }
  0x13   : > { %456 = vst.msk [vmem:[#allocation2 + $0x20] sm:$0xf] %vm447_vm1, %v3689_v2  ;;  %457 = vst.msk [vmem:[#allocation2 + $0x24] sm:$0xf] %vm447_vm1, %v3689_v2  ;;  %s386_s14 = sadd.s32 %s3812_s12, %s2985_s13  ;;  %vm494_vm2 = vsmask.f32 256 }
  0x14   : > { %458 = vst.msk [vmem:[#allocation2 + $0x28] sm:$0xf] %vm447_vm1, %v3689_v2  ;;  %459 = vst.msk [vmem:[#allocation2 + $0x2c] sm:$0xf] %vm447_vm1, %v3689_v2  ;;  %s3821_s16 = sshll.u32 %s386_s14, 2  ;;  %vm665_vm5 = vcmask 57344  }
  0x15   : > { %460 = vst.msk [vmem:[#allocation2 + $0x30] sm:$0xf] %vm447_vm1, %v3689_v2  ;;  %461 = vst.msk [vmem:[#allocation2 + $0x34] sm:$0xf] %vm447_vm1, %v3689_v2  ;;  %s3827_s19 = scalar_lea.vmem %s4742_s0, %s3821_s16  ;;  %vm495_vm3 = vsmask.f32 4368 }
  0x16   : > { %462 = vst.msk [vmem:[#allocation2 + $0x38] sm:$0xf] %vm447_vm1, %v3689_v2  ;;  %463 = vst.msk [vmem:[#allocation2 + $0x3c] sm:$0xf] %vm447_vm1, %v3689_v2  ;;  %vm659_vm4 = vsmask.f32 7938 }
  0x17   : > { %464 = vst.msk [vmem:[#allocation2 + $0x40] sm:$0xf] %vm447_vm1, %v3689_v2  ;;  %465 = vst.msk [vmem:[#allocation2 + $0x44] sm:$0xf] %vm447_vm1, %v3689_v2  ;;  %v3830_v5 = vsel %vm963_vm0, %v3062_v4, 0  ;;  %s393_s20 = scalar_select %p392_p7, %s3819_s15, 0 }
  0x18   : > { %466 = vst.msk [vmem:[#allocation2 + $0x48] sm:$0xf] %vm447_vm1, %v3689_v2  ;;  %467 = vst.msk [vmem:[#allocation2 + $0x4c] sm:$0xf] %vm447_vm1, %v3689_v2  ;;  %v478_v6 = vld [vmem:[%s3827_s19] sm:$0xf] }
  0x19   : > { %468 = vst.msk [vmem:[#allocation2 + $0x50] sm:$0xf] %vm447_vm1, %v3689_v2  ;;  %469 = vst.msk [vmem:[#allocation2 + $0x54] sm:$0xf] %vm447_vm1, %v3689_v2  ;;  %v479_v7 = vld [vmem:[%s3827_s19 + $0x4] sm:$0xf] }
  0x1a   : > { %470 = vst.msk [vmem:[#allocation2 + $0x58] sm:$0xf] %vm447_vm1, %v3689_v2  ;;  %471 = vst.msk [vmem:[#allocation2 + $0x5c] sm:$0xf] %vm447_vm1, %v3689_v2  ;;  %v498_v8 = vshrl.u32 %v478_v6, 16  ;;  %v501_v9 = vshll.u32 %v478_v6, 16 }
  0x1b   : > { %472 = vst.msk [vmem:[#allocation2 + $0x60] sm:$0xf] %vm447_vm1, %v3689_v2  ;;  %473 = vst.msk [vmem:[#allocation2 + $0x64] sm:$0xf] %vm447_vm1, %v3689_v2  ;;  %v506_v10 = vshrl.u32 %v479_v7, 16  ;;  %v509_v11 = vshll.u32 %v479_v7, 16 }
  0x1c   : > { %474 = vst.msk [vmem:[#allocation2 + $0x68] sm:$0xf] %vm447_vm1, %v3689_v2  ;;  %475 = vst.msk [vmem:[#allocation2 + $0x6c] sm:$0xf] %vm447_vm1, %v3689_v2  ;;  %v486_v12 = vld [vmem:[%s3827_s19 + $0x20] sm:$0xf] }
  0x1d   : > { %476 = vst.msk [vmem:[#allocation2 + $0x70] sm:$0xf] %vm447_vm1, %v3689_v2  ;;  %477 = vst.msk [vmem:[#allocation2 + $0x74] sm:$0xf] %vm447_vm1, %v3689_v2  ;;  %v661_v13 = vld [vmem:[#allocation2 + $0xc] sm:$0xf] }
  0x1e   : > { %v487_v14 = vld [vmem:[%s3827_s19 + $0x24] sm:$0xf]  ;;  %v566_v15 = vshrl.u32 %v486_v12, 16  ;;  %v569_v16 = vshll.u32 %v486_v12, 16  ;;  %vm3840_vm6 = vmor %vm494_vm2, %vm495_vm3  ;;  %v500_v18 = vrot.slane %v498_v8, 7  ;;  %v508_v19 = vrot.slane %v506_v10, 7 }
  0x1f   : > { %v574_v20 = vshrl.u32 %v487_v14, 16  ;;  %v577_v21 = vshll.u32 %v487_v14, 16  ;;  %v480_v22 = vld [vmem:[%s3827_s19 + $0x8] sm:$0xf]  ;;  %vm3847_vm7 = vmand %vm447_vm1, %vm659_vm4  ;;  %v691_v25 = vld [vmem:[#allocation2 + $0x3c] sm:$0xf] }
  0x20   : > { %v568_v24 = vrot.slane %v566_v15, 7  ;;  %v515_v26 = vshrl.u32 %v480_v22, 16  ;;  %v518_v27 = vshll.u32 %v480_v22, 16  ;;  %v503_v28 = vor.u32 %v501_v9, %v500_v18  ;;  %vm3856_vm8 = vmand %vm665_vm5, %vm494_vm2  ;;  %v667_v33 = vld [vmem:[#allocation2 + $0x14] sm:$0x1]  ;;  %s4769_s20 = smov (!%p2990_p8, %s393_s20), 15 }
  0x21   : > { %v504_v29 = vrot.slane %v500_v18, 4  ;;  %v511_v30 = vor.u32 %v509_v11, %v508_v19  ;;  %v576_v32 = vrot.slane %v574_v20, 7  ;;  %v488_v34 = vld [vmem:[%s3827_s19 + $0x28] sm:$0xf]  ;;  %vm926_vm9 = vcmask 64512   ;;  %s2995_s22 = sshll.u32 %s4769_s20, 1 }
  0x22   : > { %v571_v35 = vor.u32 %v569_v16, %v568_v24  ;;  %v572_v36 = vrot.slane %v568_v24, 4  ;;  %v513_v37 = vrot.slane %v508_v19, 4  ;;  %v517_v38 = vrot.slane %v515_v26, 7  ;;  %v695_v39 = vld [vmem:[#allocation2 + $0x44] sm:$0x1]  ;;  %s3922_s8 = sadd.s32 %s2995_s22, %s3812_s12  ;;  %s4771_s28 = smov (!%p3935_p10, %s3191_s28), 15 }
  0x23   : > { %v512_v40 = vsel %vm3840_vm6, %v504_v29, %v511_v30  ;;  %v662_v41 = vsel %vm3847_vm7, %v503_v28, %v661_v13  ;;  %v579_v42 = vor.u32 %v577_v21, %v576_v32  ;;  %v670_v43 = vld [vmem:[#allocation2 + $0x18] sm:$0xf]  ;;  %v581_v44 = vrot.slane %v576_v32, 4  ;;  %v481_v45 = vld [vmem:[%s3827_s19 + $0xc] sm:$0xf]  ;;  %s2997_s10 = sshll.u32 %s3922_s8, 2 }
  0x24   : > { %663 = vst [vmem:[#allocation2 + $0xc] sm:$0xf] %v662_v41  ;;  %664 = vst.msk [vmem:[#allocation2 + $0x10] sm:$0xf] %vm447_vm1, %v512_v40  ;;  %v692_v46 = vsel %vm3847_vm7, %v571_v35, %v691_v25  ;;  %v520_v47 = vor.u32 %v518_v27, %v517_v38  ;;  %v668_v48 = vsel %vm3856_vm8, %v513_v37, %v667_v33  ;;  %v583_v49 = vshrl.u32 %v488_v34, 16  ;;  %s402_s17 = scalar_lea.vmem %s4743_s1, %s2997_s10  ;;  %s4773_s28 = smov (!%p3935_p10, %s4771_s28), 15 }
  0x25   : > { %v489_v50 = vld [vmem:[%s3827_s19 + $0x2c] sm:$0xf]  ;;  %v580_v51 = vsel %vm3840_vm6, %v572_v36, %v579_v42  ;;  %693 = vst [vmem:[#allocation2 + $0x3c] sm:$0xf] %v692_v46  ;;  %669 = vst [vmem:[#allocation2 + $0x14] sm:$0x1] %v668_v48  ;;  %v696_v53 = vsel %vm3856_vm8, %v581_v44, %v695_v39 }
  0x26   : > { %v586_v52 = vshll.u32 %v488_v34, 16  ;;  %v698_v54 = vld [vmem:[#allocation2 + $0x48] sm:$0xf]  ;;  %v521_v55 = vrot.slane %v517_v38, 4  ;;  %v482_v56 = vld [vmem:[%s3827_s19 + $0x10] sm:$0xf]  ;;  %v671_v57 = vsel %vm3847_vm7, %v520_v47, %v670_v43 }
  0x27   : > { %694 = vst.msk [vmem:[#allocation2 + $0x40] sm:$0xf] %vm447_vm1, %v580_v51  ;;  %v585_v58 = vrot.slane %v583_v49, 7  ;;  %697 = vst [vmem:[#allocation2 + $0x44] sm:$0x1] %v696_v53  ;;  %v523_v59 = vshrl.u32 %v481_v45, 16 }
  0x28   : > { %v526_v60 = vshll.u32 %v481_v45, 16  ;;  %v483_v61 = vld [vmem:[%s3827_s19 + $0x14] sm:$0xf]  ;;  %672 = vst [vmem:[#allocation2 + $0x18] sm:$0xf] %v671_v57  ;;  %v591_v63 = vshrl.u32 %v489_v50, 16 }
  0x29   : > { %v674_v62 = vld [vmem:[#allocation2 + $0x20] sm:$0x1]  ;;  %v594_v0 = vshll.u32 %v489_v50, 16  ;;  %v532_v1 = vshrl.u32 %v482_v56, 16  ;;  %v535_v2 = vshll.u32 %v482_v56, 16  ;;  %v588_v4 = vor.u32 %v586_v52, %v585_v58  ;;  %s3002_s30 = sshll.u32 %s4773_s28, 1  ;;  %s4693_s28 = scalar_lea.vmem %s4748_s6, %s3821_s16 }
  0x2a   : > { %v525_v6 = vrot.slane %v523_v59, 7  ;;  %v589_v7 = vrot.slane %v585_v58, 4  ;;  %v702_v8 = vld [vmem:[#allocation2 + $0x50] sm:$0x1]  ;;  %v540_v9 = vshrl.u32 %v483_v61, 16  ;;  %v593_v11 = vrot.slane %v591_v63, 7 }
  0x2b   : > { %v490_v10 = vld [vmem:[%s3827_s19 + $0x30] sm:$0xf]  ;;  %v534_v12 = vrot.slane %v532_v1, 7  ;;  %v543_v13 = vshll.u32 %v483_v61, 16  ;;  %v677_v14 = vld [vmem:[#allocation2 + $0x24] sm:$0xf]  ;;  %v699_v16 = vsel %vm3847_vm7, %v588_v4, %v698_v54 }
  0x2c   : > { %v600_v15 = vshrl.u32 %v490_v10, 16  ;;  %v528_v18 = vor.u32 %v526_v60, %v525_v6  ;;  %v530_v19 = vrot.slane %v525_v6, 4  ;;  %v542_v20 = vrot.slane %v540_v9, 7  ;;  %v491_v21 = vld [vmem:[%s3827_s19 + $0x34] sm:$0xf]  ;;  %v3891_v24 = vld [vmem:[#allocation2 + $0xc] sm:$0xff]  }
  0x2d   : > { %v484_v22 = vld [vmem:[%s3827_s19 + $0x18] sm:$0xf]  ;;  %700 = vst [vmem:[#allocation2 + $0x48] sm:$0xf] %v699_v16  ;;  %v596_v25 = vor.u32 %v594_v0, %v593_v11  ;;  %v598_v26 = vrot.slane %v593_v11, 4  ;;  %v537_v27 = vor.u32 %v535_v2, %v534_v12  ;;  %v538_v30 = vrot.slane %v534_v12, 4  ;;  %3327 = vmatprep.mubr.msk.bf16.mxu0 %vm926_vm9, %v3891_v24 }
  0x2e   : > { %v529_v28 = vsel %vm3840_vm6, %v521_v55, %v528_v18  ;;  %v675_v29 = vsel %vm3856_vm8, %v530_v19, %v674_v62  ;;  %v545_v32 = vor.u32 %v543_v13, %v542_v20  ;;  %v3900_v33 = vld [vmem:[#allocation2 + $0x3c] sm:$0xff]   ;;  %v602_v37 = vrot.slane %v600_v15, 7  ;;  %v705_v38 = vld [vmem:[#allocation2 + $0x54] sm:$0xf]  ;;  %v3912_v39 = vld [vmem:[%s4745_s3 + $0x4] sm:$0xf] }
  0x2f   : > { %673 = vst.msk [vmem:[#allocation2 + $0x1c] sm:$0xf] %vm447_vm1, %v529_v28  ;;  %676 = vst [vmem:[#allocation2 + $0x20] sm:$0x1] %v675_v29  ;;  %v597_v34 = vsel %vm3840_vm6, %v589_v7, %v596_v25  ;;  %v703_v35 = vsel %vm3856_vm8, %v598_v26, %v702_v8  ;;  %v678_v36 = vsel %vm3847_vm7, %v537_v27, %v677_v14  ;;  %v3914_v40 = vld [vmem:[#allocation2 + $0x14] sm:$0xff]   ;;  %v603_v42 = vshll.u32 %v490_v10, 16 }
  0x30   : > { %701 = vst.msk [vmem:[#allocation2 + $0x4c] sm:$0xf] %vm447_vm1, %v597_v34  ;;  %704 = vst [vmem:[#allocation2 + $0x50] sm:$0x1] %v703_v35  ;;  %v546_v41 = vsel %vm3840_vm6, %v538_v30, %v545_v32  ;;  %v608_v43 = vshrl.u32 %v491_v21, 16  ;;  %v611_v44 = vshll.u32 %v491_v21, 16  ;;  %3339 = vmatprep.mubr.msk.bf16.mxu1 %vm926_vm9, %v3900_v33  ;;  %3328 = vmatmul.mubr.msk.bf16.vlgmr.msra.gmra.mxu0 %vm926_vm9, %v3914_v40 }
  0x31   : > { %679 = vst [vmem:[#allocation2 + $0x24] sm:$0xf] %v678_v36  ;;  %v1185_v45 = vsel %vm963_vm0, %v3806_v3, 0  ;;  %680 = vst.msk [vmem:[#allocation2 + $0x28] sm:$0xf] %vm447_vm1, %v546_v41  ;;  %v547_v46 = vrot.slane %v542_v20, 4  ;;  %v605_v50 = vor.u32 %v603_v42, %v602_v37  ;;  %3378 = vmatpush3.bf16.msra.mxu0 %v3830_v5 }
  0x32   : > { %v549_v47 = vshrl.u32 %v484_v22, 16  ;;  %v552_v48 = vshll.u32 %v484_v22, 16  ;;  %v681_v49 = vld [vmem:[#allocation2 + $0x2c] sm:$0x1]  ;;  %v606_v51 = vrot.slane %v602_v37, 4  ;;  %v610_v52 = vrot.slane %v608_v43, 7  ;;  %3566 = vmatprep.subr.msk.bf16.mxu0 %vm963_vm0, %v3912_v39 }
  0x33   : > { %v492_v53 = vld [vmem:[%s3827_s19 + $0x38] sm:$0xf]  ;;  %v682_v54 = vsel %vm3856_vm8, %v547_v46, %v681_v49  ;;  %v709_v57 = vld [vmem:[#allocation2 + $0x5c] sm:$0x1]  ;;  %v3946_v58 = vld [vmem:[%s4745_s3 + $0x10] sm:$0xf]  ;;  %v706_v5 = vsel %vm3847_vm7, %v605_v50, %v705_v38 }
  0x34   : > { %v551_v3 = vrot.slane %v549_v47, 7  ;;  %v617_v55 = vshrl.u32 %v492_v53, 16  ;;  %v620_v56 = vshll.u32 %v492_v53, 16  ;;  %v3948_v59 = vld [vmem:[#allocation2 + $0x44] sm:$0xff]   ;;  %v613_v60 = vor.u32 %v611_v44, %v610_v52  ;;  %683 = vst [vmem:[#allocation2 + $0x2c] sm:$0x1] %v682_v54 }
  0x35   : > { %v684_v61 = vld [vmem:[#allocation2 + $0x30] sm:$0xf]  ;;  %v615_v62 = vrot.slane %v610_v52, 4  ;;  %707 = vst [vmem:[#allocation2 + $0x54] sm:$0xf] %v706_v5  ;;  %3340 = vmatmul.mubr.msk.bf16.vlgmr.msra.gmra.mxu1 %vm926_vm9, %v3948_v59  ;;  %v4128_v17 = vld [vmem:[#allocation2 + $0x40] sm:$0xff]  }
  0x36   : > { %v554_v63 = vor.u32 %v552_v48, %v551_v3  ;;  %v619_v0 = vrot.slane %v617_v55, 7  ;;  %v712_v1 = vld [vmem:[#allocation2 + $0x60] sm:$0xf]  ;;  %v485_v2 = vld [vmem:[%s3827_s19 + $0x1c] sm:$0xf]  ;;  %v555_v4 = vrot.slane %v551_v3, 4  ;;  %v614_v7 = vsel %vm3840_vm6, %v606_v51, %v613_v60  ;;  %3352 = vmatpush3.bf16.msra.mxu1 %v1185_v45 }
  0x37   : > { %v3957_v6 = vld [vmem:[#allocation2 + $0x1c] sm:$0xff]   ;;  %v710_v8 = vsel %vm3856_vm8, %v615_v62, %v709_v57  ;;  %v557_v9 = vshrl.u32 %v485_v2, 16  ;;  %v3963_v10 = vld [vmem:[#allocation2 + $0x4c] sm:$0xff]   ;;  %708 = vst.msk [vmem:[#allocation2 + $0x58] sm:$0xf] %vm447_vm1, %v614_v7  ;;  %v560_v13 = vshll.u32 %v485_v2, 16  ;;  %3565 = vmatprep.subr.msk.bf16.mxu1 %vm963_vm0, %v3946_v58 }
  0x38   : > { %v685_v11 = vsel %vm3847_vm7, %v554_v63, %v684_v61  ;;  %v622_v12 = vor.u32 %v620_v56, %v619_v0  ;;  %711 = vst [vmem:[#allocation2 + $0x5c] sm:$0x1] %v710_v8  ;;  %3331 = vmatprep.mubr.msk.bf16.mxu0 %vm926_vm9, %v3957_v6  ;;  %v3970_v14 = vld [vmem:[#allocation2 + $0x24] sm:$0xff]   ;;  %3343 = vmatprep.mubr.msk.bf16.mxu1 %vm926_vm9, %v3963_v10  ;;  %v688_v18 = vld [vmem:[#allocation2 + $0x38] sm:$0x1]  ;;  %v623_v29 = vrot.slane %v619_v0, 4 }
  0x39   : > { %686 = vst [vmem:[#allocation2 + $0x30] sm:$0xf] %v685_v11  ;;  %v559_v15 = vrot.slane %v557_v9, 7  ;;  %v493_v19 = vld [vmem:[%s3827_s19 + $0x3c] sm:$0xf]  ;;  %3332 = vmatmul.mubr.msk.bf16.gmra.mxu0 %vm926_vm9, %v3970_v14  ;;  %s417_s19 = sadd.s32 %s3002_s30, %s3812_s12  ;;  %v4052_v8 = vld [vmem:[#allocation2 + $0x10] sm:$0xff]  }
  0x3a   : > { %v713_v16 = vsel %vm3847_vm7, %v622_v12, %v712_v1  ;;  %v625_v22 = vshrl.u32 %v493_v19, 16  ;;  %v628_v25 = vshll.u32 %v493_v19, 16  ;;  %v716_v26 = vld [vmem:[#allocation2 + $0x68] sm:$0x1]  ;;  %s724_s18 = scalar_select %p723_p9, 1, 0 }
  0x3b   : > { %714 = vst [vmem:[#allocation2 + $0x60] sm:$0xf] %v713_v16  ;;  %v562_v20 = vor.u32 %v560_v13, %v559_v15  ;;  %v564_v21 = vrot.slane %v559_v15, 4  ;;  %v719_v32 = vld [vmem:[%s402_s17] sm:$0xf]  ;;  %v4014_v52 = vld [vmem:[#allocation2 + $0x18] sm:$0xff]  }
  0x3c   : > { %v627_v30 = vrot.slane %v625_v22, 7  ;;  %v720_v34 = vld [vmem:[%s402_s17 + $0x4] sm:$0xf]  ;;  %v725_v35 = vstv %s724_s18  ;;  %v749_v51 = vld [vmem:[#allocation2] sm:$0xf]  ;;  %v4040_v2 = vld [vmem:[#allocation2 + $0x28] sm:$0xff]  }
  0x3d   : > { %v563_v27 = vsel %vm3840_vm6, %v555_v4, %v562_v20  ;;  %v689_v28 = vsel %vm3856_vm8, %v564_v21, %v688_v18  ;;  %vm726_vm10 = vcmp.eq.s32.totalorder %v725_v35, 1  ;;  %v753_v53 = vld [vmem:[#allocation2 + $0x8] sm:$0x1]  ;;  %v4036_v1 = vld [vmem:[#allocation2 + $0x20] sm:$0xff]   ;;  %v1683_v4 = vsel %vm963_vm0, %v3912_v39, 0  ;;  %s3004_s12 = sshll.u32 %s417_s19, 2  ;;  %s4585_s19 = scalar_lea.vmem %s4747_s5, %s3821_s16 }
  0x3e   : > { %687 = vst.msk [vmem:[#allocation2 + $0x34] sm:$0xf] %vm447_vm1, %v563_v27  ;;  %690 = vst [vmem:[#allocation2 + $0x38] sm:$0x1] %v689_v28  ;;  %v3999_v36 = vld [vmem:[#allocation2 + $0x54] sm:$0xff]   ;;  %v630_v37 = vor.u32 %v628_v25, %v627_v30  ;;  %v632_v38 = vrot.slane %v627_v30, 4  ;;  %s419_s9 = scalar_lea.vmem %s4744_s2, %s3004_s12 }
  0x3f   : > { %3344 = vmatmul.mubr.msk.bf16.gmra.mxu1 %vm926_vm9, %v3999_v36  ;;  %v727_v44 = vsel %vm726_vm10, %v719_v32, 0  ;;  %v728_v45 = vsel %vm726_vm10, %v720_v34, 0  ;;  %v4048_v7 = vld [vmem:[%s4745_s3 + $0x14] sm:$0xf]  ;;  %v1551_v11 = vsel %vm963_vm0, %v3946_v58, 0  ;;  %v4085_v15 = vld [vmem:[#allocation2 + $0x18] sm:$0xff]  }
  0x40   : > { %v4001_v41 = vld [vmem:[#allocation2 + $0x2c] sm:$0xff]   ;;  %v631_v42 = vsel %vm3840_vm6, %v623_v29, %v630_v37  ;;  %v717_v43 = vsel %vm3856_vm8, %v632_v38, %v716_v26  ;;  %v730_v47 = vshrl.u32 %v727_v44, 16  ;;  %v733_v48 = vshll.u32 %v727_v44, 16  ;;  %v4069_v12 = vld [vmem:[%s4745_s3 + $0x1c] sm:$0xf]  ;;  %v4089_v16 = vld [vmem:[#allocation2 + $0x20] sm:$0xff]  }
  0x41   : > { %3335 = vmatprep.mubr.msk.bf16.mxu0 %vm926_vm9, %v4001_v41  ;;  %715 = vst.msk [vmem:[#allocation2 + $0x64] sm:$0xf] %vm447_vm1, %v631_v42  ;;  %718 = vst [vmem:[#allocation2 + $0x68] sm:$0x1] %v717_v43  ;;  %v738_v49 = vshrl.u32 %v728_v45, 16  ;;  %v741_v50 = vshll.u32 %v728_v45, 16 }
  0x42   : > { %v4011_v46 = vld [vmem:[#allocation2 + $0x5c] sm:$0xff]   ;;  %v732_v3 = vrot.slane %v730_v47, 7  ;;  %s757_s21 = scalar_select %p756_p11, 1, 0  ;;  %v722_v20 = vld [vmem:[%s419_s9 + $0x4] sm:$0xf] }
  0x43   : > { %3347 = vmatprep.mubr.msk.bf16.mxu1 %vm926_vm9, %v4011_v46  ;;  %v740_v54 = vrot.slane %v738_v49, 7  ;;  %v721_v18 = vld [vmem:[%s419_s9] sm:$0xf]  ;;  %v4099_v26 = vld [vmem:[#allocation2 + $0x48] sm:$0xff]   ;;  %v787_v38 = vld [vmem:[#allocation2 + $0x74] sm:$0x1] }
  0x44   : > { %v735_v56 = vor.u32 %v733_v48, %v732_v3  ;;  %v736_v57 = vrot.slane %v732_v3, 4  ;;  %v758_v19 = vstv %s757_s21  ;;  %v4095_v21 = vld [vmem:[#allocation2 + $0x40] sm:$0xff]   ;;  %v4101_v35 = vld [vmem:[#allocation2 + $0x28] sm:$0xff]   ;;  %v4122_v23 = vld [vmem:[#allocation2 + $0x58] sm:$0xff]   ;;  %vm1996_vm12 = vcmask 1046528   ;;  %s3690_s20 = smov 120  }
  0x45   : > { %v4018_v55 = vld [vmem:[#allocation2 + $0x34] sm:$0xff]   ;;  %v743_v60 = vor.u32 %v741_v50, %v740_v54  ;;  %v745_v5 = vrot.slane %v740_v54, 4  ;;  %vm759_vm11 = vcmp.eq.s32.totalorder %v758_v19, 1  ;;  %v783_v37 = vld [vmem:[#allocation2 + $0x6c] sm:$0xf]  ;;  %vm2519_vm13 = vcmask 1045504  }
  0x46   : > { %3336 = vmatmul.mubr.msk.bf16.gmra.mxu0 %vm926_vm9, %v4018_v55  ;;  %v750_v62 = vsel %vm3847_vm7, %v735_v56, %v749_v51  ;;  %v4073_v58 = vld [vmem:[#allocation2 + $0x30] sm:$0xff]   ;;  %v4078_v13 = vld [vmem:[#allocation2 + $0x38] sm:$0xff]   ;;  %v760_v22 = vsel %vm759_vm11, %v721_v18, 0  ;;  %v761_v25 = vsel %vm759_vm11, %v722_v20, 0  ;;  %v4140_v54 = vld [vmem:[#allocation2 + $0x48] sm:$0xff]   ;;  %vm2759_vm14 = vcmask 27648  }
  0x47   : > { %v744_v61 = vsel %vm3840_vm6, %v736_v57, %v743_v60  ;;  %3379 = vmatprep.mubr.msk.bf16.mxu0 %vm926_vm9, %v4014_v52  ;;  %v754_v63 = vsel %vm3856_vm8, %v745_v5, %v753_v53  ;;  %751 = vst [vmem:[#allocation2] sm:$0xf] %v750_v62  ;;  %v763_v27 = vshrl.u32 %v760_v22, 16  ;;  %v766_v28 = vshll.u32 %v760_v22, 16  ;;  %v4105_v42 = vld [vmem:[#allocation2 + $0x30] sm:$0xff]   ;;  %v4124_v53 = vld [vmem:[#allocation2 + $0x38] sm:$0xff]  }
  0x48   : > { %v4033_v0 = vld [vmem:[#allocation2 + $0x64] sm:$0xff]   ;;  %752 = vst.msk [vmem:[#allocation2 + $0x4] sm:$0xf] %vm447_vm1, %v744_v61  ;;  %755 = vst [vmem:[#allocation2 + $0x8] sm:$0x1] %v754_v63  ;;  %v771_v29 = vshrl.u32 %v761_v25, 16 }
  0x49   : > { %3348 = vmatmul.mubr.msk.bf16.gmra.mxu1 %vm926_vm9, %v4033_v0  ;;  %v774_v30 = vshll.u32 %v761_v25, 16  ;;  %v765_v32 = vrot.slane %v763_v27, 7  ;;  %v4117_v51 = vld [vmem:[#allocation2 + $0x50] sm:$0xff]   ;;  %v4134_v31 = vld [vmem:[#allocation2 + $0x60] sm:$0xff]   ;;  %v4154_v60 = vld [vmem:[#allocation2 + $0x58] sm:$0xff]   ;;  %v2074_v5 = vsel %vm963_vm0, %v4048_v7, 0 }
  0x4a   : > { %v773_v34 = vrot.slane %v771_v29, 7  ;;  %v4144_v56 = vld [vmem:[#allocation2 + $0x50] sm:$0xff]   ;;  %v3152_v61 = vld [vmem:[%s4745_s3 + $0x20] sm:$0xf]  ;;  %v1817_v62 = vsel %vm963_vm0, %v4069_v12, 0 }
  0x4b   : > { %v768_v43 = vor.u32 %v766_v28, %v765_v32  ;;  %v769_v44 = vrot.slane %v765_v32, 4  ;;  %v3126_v63 = vld [vmem:[%s4745_s3 + $0x8] sm:$0xf] }
  0x4c   : > { %v776_v45 = vor.u32 %v774_v30, %v773_v34  ;;  %v778_v47 = vrot.slane %v773_v34, 4 }
  0x4d   : > { %v784_v48 = vsel %vm3847_vm7, %v768_v43, %v783_v37 }
  0x4e   : > { %3380 = vmatmul.mubr.msk.bf16.vlgmr.msra.gmra.mxu0 %vm926_vm9, %v4036_v1  ;;  %v777_v49 = vsel %vm3840_vm6, %v769_v44, %v776_v45  ;;  %v788_v50 = vsel %vm3856_vm8, %v778_v47, %v787_v38  ;;  %785 = vst [vmem:[#allocation2 + $0x6c] sm:$0xf] %v784_v48 }
  0x4f   : > { %v4054_v9 = vld [vmem:[#allocation2] sm:$0xff]   ;;  %3430 = vmatpush3.bf16.msra.mxu0 %v1683_v4  ;;  %3383 = vmatprep.mubr.msk.bf16.mxu0 %vm926_vm9, %v4040_v2  ;;  %v4060_v39 = vld [vmem:[#allocation2 + $0x8] sm:$0xff]   ;;  %786 = vst.msk [vmem:[#allocation2 + $0x70] sm:$0xf] %vm447_vm1, %v777_v49  ;;  %789 = vst [vmem:[#allocation2 + $0x74] sm:$0x1] %v788_v50 }
  0x50   : > { %3568 = vmatprep.subr.msk.bf16.mxu0 %vm963_vm0, %v4048_v7  ;;  %3353 = vmatprep.mubr.msk.bf16.mxu1 %vm926_vm9, %v4054_v9  ;;  %v2340_v4 = vsel %vm963_vm0, %v3152_v61, 0  ;;  %v2206_v7 = vsel %vm963_vm0, %v3126_v63, 0 }
  0x51   : > { %3354 = vmatmul.mubr.msk.bf16.vlgmr.msra.gmra.mxu1 %vm926_vm9, %v4060_v39 }
  0x52   : > { %3404 = vmatpush3.bf16.msra.mxu1 %v1551_v11  ;;  %3357 = vmatprep.mubr.msk.bf16.mxu1 %vm926_vm9, %v4052_v8 }
  0x53   : > { %3567 = vmatprep.subr.msk.bf16.mxu1 %vm963_vm0, %v4069_v12 }
  0x55   : > { %v4138_v3 = vld [vmem:[#allocation2 + $0x68] sm:$0xff]  }
  0x56   : > { %3384 = vmatmul.mubr.msk.bf16.gmra.mxu0 %vm926_vm9, %v4073_v58  ;;  %v4150_v57 = vld [vmem:[#allocation2 + $0x70] sm:$0xff]  }
  0x57   : > { %3387 = vmatprep.mubr.msk.bf16.mxu0 %vm926_vm9, %v4078_v13 }
  0x59   : > { %3358 = vmatmul.mubr.msk.bf16.gmra.mxu1 %vm926_vm9, %v4085_v15 }
  0x5a   : > { %3361 = vmatprep.mubr.msk.bf16.mxu1 %vm926_vm9, %v4089_v16 }
  0x5e   : > { %3388 = vmatmul.mubr.msk.bf16.gmra.mxu0 %vm926_vm9, %v4095_v21 }
  0x5f   : > { %3391 = vmatprep.mubr.msk.bf16.mxu0 %vm926_vm9, %v4099_v26 }
  0x61   : > { %3362 = vmatmul.mubr.msk.bf16.gmra.mxu1 %vm926_vm9, %v4101_v35 }
  0x62   : > { %3365 = vmatprep.mubr.msk.bf16.mxu1 %vm926_vm9, %v4105_v42 }
  0x66   : > { %3392 = vmatmul.mubr.msk.bf16.gmra.mxu0 %vm926_vm9, %v4117_v51 }
  0x67   : > { %3395 = vmatprep.mubr.msk.bf16.mxu0 %vm926_vm9, %v4122_v23 }
  0x69   : > { %3366 = vmatmul.mubr.msk.bf16.gmra.mxu1 %vm926_vm9, %v4124_v53 }
  0x6a   : > { %3369 = vmatprep.mubr.msk.bf16.mxu1 %vm926_vm9, %v4128_v17 }
  0x6e   : > { %3396 = vmatmul.mubr.msk.bf16.gmra.mxu0 %vm926_vm9, %v4134_v31 }
  0x6f   : > { %3399 = vmatprep.mubr.msk.bf16.mxu0 %vm926_vm9, %v4138_v3 }
  0x71   : > { %3370 = vmatmul.mubr.msk.bf16.gmra.mxu1 %vm926_vm9, %v4140_v54 }
  0x72   : > { %3373 = vmatprep.mubr.msk.bf16.mxu1 %vm926_vm9, %v4144_v56 }
  0x76   : > { %3400 = vmatmul.mubr.msk.bf16.gmra.mxu0 %vm926_vm9, %v4150_v57 }
  0x77   : > { %3431 = vmatprep.mubr.msk.bf16.mxu0 %vm926_vm9, %v4054_v9 }
  0x79   : > { %3374 = vmatmul.mubr.msk.bf16.gmra.mxu1 %vm926_vm9, %v4154_v60 }
  0x7a   : > { %3405 = vmatprep.mubr.msk.bf16.mxu1 %vm926_vm9, %v3891_v24 }
  0x7e   : > { %3432 = vmatmul.mubr.msk.bf16.vlgmr.msra.gmra.mxu0 %vm926_vm9, %v4060_v39 }
  0x7f   : > { %3482 = vmatpush3.bf16.msra.mxu0 %v2074_v5  ;;  %3435 = vmatprep.mubr.msk.bf16.mxu0 %vm926_vm9, %v4052_v8 }
  0x80   : > { %3570 = vmatprep.subr.msk.bf16.mxu0 %vm963_vm0, %v3152_v61 }
  0x81   : > { %3406 = vmatmul.mubr.msk.bf16.vlgmr.msra.gmra.mxu1 %vm926_vm9, %v3914_v40 }
  0x82   : > { %3456 = vmatpush3.bf16.msra.mxu1 %v1817_v62  ;;  %3409 = vmatprep.mubr.msk.bf16.mxu1 %vm926_vm9, %v3957_v6 }
  0x83   : > { %3569 = vmatprep.subr.msk.bf16.mxu1 %vm963_vm0, %v3126_v63 }
  0x86   : > { %3436 = vmatmul.mubr.msk.bf16.gmra.mxu0 %vm926_vm9, %v4085_v15 }
  0x87   : > { %3439 = vmatprep.mubr.msk.bf16.mxu0 %vm926_vm9, %v4089_v16 }
  0x89   : > { %3410 = vmatmul.mubr.msk.bf16.gmra.mxu1 %vm926_vm9, %v3970_v14 }
  0x8a   : > { %3413 = vmatprep.mubr.msk.bf16.mxu1 %vm926_vm9, %v4001_v41 }
  0x8e   : > { %3440 = vmatmul.mubr.msk.bf16.gmra.mxu0 %vm926_vm9, %v4101_v35 }
  0x8f   : > { %3443 = vmatprep.mubr.msk.bf16.mxu0 %vm926_vm9, %v4105_v42 }
  0x91   : > { %3414 = vmatmul.mubr.msk.bf16.gmra.mxu1 %vm926_vm9, %v4018_v55 }
  0x92   : > { %3417 = vmatprep.mubr.msk.bf16.mxu1 %vm926_vm9, %v3900_v33 }
  0x96   : > { %3444 = vmatmul.mubr.msk.bf16.gmra.mxu0 %vm926_vm9, %v4124_v53 }
  0x97   : > { %3447 = vmatprep.mubr.msk.bf16.mxu0 %vm926_vm9, %v4128_v17 }
  0x99   : > { %3418 = vmatmul.mubr.msk.bf16.gmra.mxu1 %vm926_vm9, %v3948_v59 }
  0x9a   : > { %3421 = vmatprep.mubr.msk.bf16.mxu1 %vm926_vm9, %v3963_v10 }
  0x9e   : > { %3448 = vmatmul.mubr.msk.bf16.gmra.mxu0 %vm926_vm9, %v4140_v54 }
  0x9f   : > { %3451 = vmatprep.mubr.msk.bf16.mxu0 %vm926_vm9, %v4144_v56 }
  0xa1   : > { %3422 = vmatmul.mubr.msk.bf16.gmra.mxu1 %vm926_vm9, %v3999_v36 }
  0xa2   : > { %3425 = vmatprep.mubr.msk.bf16.mxu1 %vm926_vm9, %v4011_v46 }
  0xa6   : > { %3452 = vmatmul.mubr.msk.bf16.gmra.mxu0 %vm926_vm9, %v4154_v60 }
  0xa7   : > { %3483 = vmatprep.mubr.msk.bf16.mxu0 %vm926_vm9, %v3891_v24 }
  0xa9   : > { %3426 = vmatmul.mubr.msk.bf16.gmra.mxu1 %vm926_vm9, %v4033_v0 }
  0xaa   : > { %3457 = vmatprep.mubr.msk.bf16.mxu1 %vm926_vm9, %v4014_v52 }
  0xae   : > { %3484 = vmatmul.mubr.msk.bf16.vlgmr.msra.gmra.mxu0 %vm926_vm9, %v3914_v40 }
  0xaf   : > { %3534 = vmatpush3.bf16.msra.mxu0 %v2340_v4  ;;  %3487 = vmatprep.mubr.msk.bf16.mxu0 %vm926_vm9, %v3957_v6 }
  0xb1   : > { %3458 = vmatmul.mubr.msk.bf16.vlgmr.msra.gmra.mxu1 %vm926_vm9, %v4036_v1 }
  0xb2   : > { %3508 = vmatpush3.bf16.msra.mxu1 %v2206_v7  ;;  %3461 = vmatprep.mubr.msk.bf16.mxu1 %vm926_vm9, %v4040_v2 }
  0xb6   : > { %3488 = vmatmul.mubr.msk.bf16.gmra.mxu0 %vm926_vm9, %v3970_v14 }
  0xb7   : > { %3491 = vmatprep.mubr.msk.bf16.mxu0 %vm926_vm9, %v4001_v41 }
  0xb9   : > { %3462 = vmatmul.mubr.msk.bf16.gmra.mxu1 %vm926_vm9, %v4073_v58 }
  0xba   : > { %3465 = vmatprep.mubr.msk.bf16.mxu1 %vm926_vm9, %v4078_v13 }
  0xbe   : > { %3492 = vmatmul.mubr.msk.bf16.gmra.mxu0 %vm926_vm9, %v4018_v55 }
  0xbf   : > { %3495 = vmatprep.mubr.msk.bf16.mxu0 %vm926_vm9, %v3900_v33 }
  0xc1   : > { %3466 = vmatmul.mubr.msk.bf16.gmra.mxu1 %vm926_vm9, %v4095_v21 }
  0xc2   : > { %3469 = vmatprep.mubr.msk.bf16.mxu1 %vm926_vm9, %v4099_v26 }
  0xc6   : > { %3496 = vmatmul.mubr.msk.bf16.gmra.mxu0 %vm926_vm9, %v3948_v59 }
  0xc7   : > { %3499 = vmatprep.mubr.msk.bf16.mxu0 %vm926_vm9, %v3963_v10 }
  0xc9   : > { %3470 = vmatmul.mubr.msk.bf16.gmra.mxu1 %vm926_vm9, %v4117_v51 }
  0xca   : > { %3473 = vmatprep.mubr.msk.bf16.mxu1 %vm926_vm9, %v4122_v23 }
  0xce   : > { %3500 = vmatmul.mubr.msk.bf16.gmra.mxu0 %vm926_vm9, %v3999_v36 }
  0xcf   : > { %3503 = vmatprep.mubr.msk.bf16.mxu0 %vm926_vm9, %v4011_v46 }
  0xd1   : > { %3474 = vmatmul.mubr.msk.bf16.gmra.mxu1 %vm926_vm9, %v4134_v31 }
  0xd2   : > { %3477 = vmatprep.mubr.msk.bf16.mxu1 %vm926_vm9, %v4138_v3 }
  0xd6   : > { %3504 = vmatmul.mubr.msk.bf16.gmra.mxu0 %vm926_vm9, %v4033_v0 }
  0xd7   : > { %3535 = vmatprep.mubr.msk.bf16.mxu0 %vm926_vm9, %v4014_v52 }
  0xd9   : > { %3478 = vmatmul.mubr.msk.bf16.gmra.mxu1 %vm926_vm9, %v4150_v57 }
  0xda   : > { %3509 = vmatprep.mubr.msk.bf16.mxu1 %vm926_vm9, %v4054_v9 }
  0xde   : > { %3536 = vmatmul.mubr.msk.bf16.vlgmr.msra.gmra.mxu0 %vm926_vm9, %v4036_v1 }
  0xdf   : > { %3539 = vmatprep.mubr.msk.bf16.mxu0 %vm926_vm9, %v4040_v2 }
  0xe1   : > { %3510 = vmatmul.mubr.msk.bf16.vlgmr.msra.gmra.mxu1 %vm926_vm9, %v4060_v39 }
  0xe2   : > { %3513 = vmatprep.mubr.msk.bf16.mxu1 %vm926_vm9, %v4052_v8 }
  0xe6   : > { %3540 = vmatmul.mubr.msk.bf16.gmra.mxu0 %vm926_vm9, %v4073_v58 }
  0xe7   : > { %3543 = vmatprep.mubr.msk.bf16.mxu0 %vm926_vm9, %v4078_v13 }
  0xe9   : > { %3514 = vmatmul.mubr.msk.bf16.gmra.mxu1 %vm926_vm9, %v4085_v15 }
  0xea   : > { %3517 = vmatprep.mubr.msk.bf16.mxu1 %vm926_vm9, %v4089_v16 }
  0xee   : > { %3544 = vmatmul.mubr.msk.bf16.gmra.mxu0 %vm926_vm9, %v4095_v21 }
  0xef   : > { %3547 = vmatprep.mubr.msk.bf16.mxu0 %vm926_vm9, %v4099_v26 }
  0xf0   : > { %v3329_v24 = vpop.f32.mrf.mxu0 }
  0xf1   : > { %3518 = vmatmul.mubr.msk.bf16.gmra.mxu1 %vm926_vm9, %v4101_v35 }
  0xf2   : > { %3521 = vmatprep.mubr.msk.bf16.mxu1 %vm926_vm9, %v4105_v42  ;;  %v1001_v33 = vpop.f32.mrf.mxu0 }
  0xf4   : > { %v3330_v59 = vpop.f32.mrf.mxu0 }
  0xf5   : > { %v3341_v40 = vpop.f32.mrf.mxu1 }
  0xf6   : > { %3548 = vmatmul.mubr.msk.bf16.gmra.mxu0 %vm926_vm9, %v4117_v51  ;;  %v1004_v10 = vpop.f32.mrf.mxu0 }
  0xf7   : > { %3551 = vmatprep.mubr.msk.bf16.mxu0 %vm926_vm9, %v4122_v23  ;;  %v4302_v6 = vpop.f32.mrf.mxu1 }
  0xf9   : > { %3522 = vmatmul.mubr.msk.bf16.gmra.mxu1 %vm926_vm9, %v4124_v53  ;;  %v4306_v14 = vpop.f32.mrf.mxu1  ;;  %v3333_v36 = vpop.f32.mrf.mxu0 }
  0xfa   : > { %3525 = vmatprep.mubr.msk.bf16.mxu1 %vm926_vm9, %v4128_v17 }
  0xfb   : > { %v4310_v41 = vpop.f32.mrf.mxu1  ;;  %v1016_v46 = vpop.f32.mrf.mxu0 }
  0xfd   : > { %v3334_v52 = vpop.f32.mrf.mxu0 }
  0xfe   : > { %3552 = vmatmul.mubr.msk.bf16.gmra.mxu0 %vm926_vm9, %v4134_v31 }
  0xff   : > { %3555 = vmatprep.mubr.msk.bf16.mxu0 %vm926_vm9, %v4138_v3  ;;  %v4316_v55 = vpop.f32.mrf.mxu1  ;;  %v1019_v0 = vpop.f32.mrf.mxu0 }
 0x101   : > { %3526 = vmatmul.mubr.msk.bf16.gmra.mxu1 %vm926_vm9, %v4140_v54  ;;  %v4320_v1 = vpop.f32.mrf.mxu1 }
 0x102   : > { %3529 = vmatprep.mubr.msk.bf16.mxu1 %vm926_vm9, %v4144_v56 }
 0x103   : > { %v4324_v2 = vpop.f32.mrf.mxu1 }
 0x105   : > { %v1063_v8 = vpop.f32.mrf.mxu1 }
 0x106   : > { %v3337_v9 = vpop.f32.mrf.mxu0  ;;  %3556 = vmatmul.mubr.msk.bf16.gmra.mxu0 %vm926_vm9, %v4150_v57 }
 0x108   : > { %v1031_v11 = vpop.f32.mrf.mxu0 }
 0x109   : > { %v4328_v39 = vpop.f32.mrf.mxu1  ;;  %3530 = vmatmul.mubr.msk.bf16.gmra.mxu1 %vm926_vm9, %v4154_v60 }
 0x10a   : > { %v3338_v12 = vpop.f32.mrf.mxu0 }
 0x10b   : > { %v1075_v58 = vpop.f32.mrf.mxu1 }
 0x10c   : > { %v1033_v13 = vpop.f32.mrf.mxu0 }
 0x10d   : > { %v3350_v15 = vpop.f32.mrf.mxu1 }
 0x10e   : > { %v3381_v16 = vpop.f32.mrf.mxu0 }
 0x10f   : > { %v4332_v18 = vpop.f32.mrf.mxu1 }
 0x110   : > { %v1443_v19 = vpop.f32.mrf.mxu0 }
 0x111   : > { %v3355_v20 = vpop.f32.mrf.mxu1 }
 0x112   : > { %v3382_v21 = vpop.f32.mrf.mxu0 }
 0x113   : > { %v1221_v22 = vpop.f32.mrf.mxu1 }
 0x114   : > { %v1446_v25 = vpop.f32.mrf.mxu0  ;;  %v1222_v26 = vadd.f32 %v1221_v22, %v1001_v33 }
 0x115   : > { %v3356_v27 = vpop.f32.mrf.mxu1 }
 0x116   : > { %v3385_v28 = vpop.f32.mrf.mxu0  ;;  %v4334_v29 = vadd.f32 %v1443_v19, %v1222_v26  ;;  %v1232_v30 = vadd.f32 %v3356_v27, %v3330_v59 }
 0x117   : > { %v1224_v32 = vpop.f32.mrf.mxu1 }
 0x118   : > { %v1458_v34 = vpop.f32.mrf.mxu0  ;;  %v4336_v35 = vadd.f32 %v3382_v21, %v1232_v30  ;;  %v1225_v37 = vadd.f32 %v1224_v32, %v1004_v10 }
 0x119   : > { %v3359_v38 = vpop.f32.mrf.mxu1 }
 0x11a   : > { %v3386_v42 = vpop.f32.mrf.mxu0  ;;  %v4338_v43 = vadd.f32 %v1446_v25, %v1225_v37  ;;  %v1244_v44 = vadd.f32 %v3359_v38, %v3333_v36 }
 0x11b   : > { %v1236_v45 = vpop.f32.mrf.mxu1 }
 0x11c   : > { %v1461_v47 = vpop.f32.mrf.mxu0  ;;  %v4340_v48 = vadd.f32 %v3385_v28, %v1244_v44  ;;  %v1237_v49 = vadd.f32 %v1236_v45, %v1016_v46 }
 0x11d   : > { %v3360_v50 = vpop.f32.mrf.mxu1 }
 0x11e   : > { %v3389_v51 = vpop.f32.mrf.mxu0  ;;  %v4342_v23 = vadd.f32 %v1458_v34, %v1237_v49  ;;  %v1247_v53 = vadd.f32 %v3360_v50, %v3334_v52 }
 0x11f   : > { %v1239_v17 = vpop.f32.mrf.mxu1 }
 0x120   : > { %v1473_v31 = vpop.f32.mrf.mxu0  ;;  %v4344_v3 = vadd.f32 %v3386_v42, %v1247_v53 }
 0x121   : > { %v3363_v54 = vpop.f32.mrf.mxu1 }
 0x122   : > { %v3390_v56 = vpop.f32.mrf.mxu0  ;;  %v1259_v57 = vadd.f32 %v3363_v54, %v3337_v9 }
 0x123   : > { %v1251_v60 = vpop.f32.mrf.mxu1 }
 0x124   : > { %v1475_v5 = vpop.f32.mrf.mxu0  ;;  %v4346_v61 = vadd.f32 %v3389_v51, %v1259_v57 }
 0x125   : > { %v3364_v62 = vpop.f32.mrf.mxu1 }
 0x126   : > { %v3393_v63 = vpop.f32.mrf.mxu0 }
 0x127   : > { %v1253_v4 = vpop.f32.mrf.mxu1 }
 0x128   : > { %v1487_v7 = vpop.f32.mrf.mxu0  ;;  %v1254_v24 = vadd.f32 %v1253_v4, %v1033_v13 }
 0x129   : > { %v3367_v33 = vpop.f32.mrf.mxu1 }
 0x12a   : > { %v3394_v40 = vpop.f32.mrf.mxu0  ;;  %v4348_v59 = vadd.f32 %v1475_v5, %v1254_v24 }
 0x12b   : > { %v1265_v10 = vpop.f32.mrf.mxu1 }
 0x12c   : > { %v1490_v36 = vpop.f32.mrf.mxu0  ;;  %v1266_v46 = vadd.f32 %v1265_v10, %v4302_v6 }
 0x12d   : > { %v3368_v52 = vpop.f32.mrf.mxu1 }
 0x12e   : > { %v3397_v0 = vpop.f32.mrf.mxu0  ;;  %v4351_v8 = vadd.f32 %v1487_v7, %v1266_v46  ;;  %v1276_v9 = vadd.f32 %v3368_v52, %v4306_v14 }
 0x12f   : > { %v1268_v11 = vpop.f32.mrf.mxu1 }
 0x130   : > { %v1502_v12 = vpop.f32.mrf.mxu0  ;;  %v4354_v58 = vadd.f32 %v3394_v40, %v1276_v9  ;;  %v1269_v13 = vadd.f32 %v1268_v11, %v4310_v41 }
 0x131   : > { %v3371_v15 = vpop.f32.mrf.mxu1 }
 0x132   : > { %v3398_v16 = vpop.f32.mrf.mxu0  ;;  %v4357_v19 = vadd.f32 %v1490_v36, %v1269_v13  ;;  %v1288_v20 = vadd.f32 %v3371_v15, %v4316_v55 }
 0x133   : > { %v1280_v21 = vpop.f32.mrf.mxu1 }
 0x134   : > { %v1505_v6 = vpop.f32.mrf.mxu0  ;;  %v4360_v22 = vadd.f32 %v3397_v0, %v1288_v20  ;;  %v1281_v25 = vadd.f32 %v1280_v21, %v4320_v1 }
 0x135   : > { %v3372_v26 = vpop.f32.mrf.mxu1 }
 0x136   : > { %v3401_v14 = vpop.f32.mrf.mxu0  ;;  %v4363_v27 = vadd.f32 %v1502_v12, %v1281_v25  ;;  %v1291_v28 = vadd.f32 %v3372_v26, %v4324_v2 }
 0x137   : > { %v1283_v30 = vpop.f32.mrf.mxu1 }
 0x138   : > { %v1517_v41 = vpop.f32.mrf.mxu0  ;;  %v4366_v32 = vadd.f32 %v3398_v16, %v1291_v28 }
 0x139   : > { %v3375_v34 = vpop.f32.mrf.mxu1 }
 0x13a   : > { %v3402_v37 = vpop.f32.mrf.mxu0  ;;  %v1303_v55 = vadd.f32 %v3375_v34, %v4328_v39 }
 0x13b   : > { %v1295_v38 = vpop.f32.mrf.mxu1 }
 0x13c   : > { %v1519_v42 = vpop.f32.mrf.mxu0  ;;  %v4369_v44 = vadd.f32 %v3401_v14, %v1303_v55 }
 0x13d   : > { %v3376_v45 = vpop.f32.mrf.mxu1 }
 0x13e   : > { %v3433_v1 = vpop.f32.mrf.mxu0 }
 0x13f   : > { %v1297_v47 = vpop.f32.mrf.mxu1 }
 0x140   : > { %v1719_v49 = vpop.f32.mrf.mxu0  ;;  %v1298_v50 = vadd.f32 %v1297_v47, %v4332_v18 }
 0x141   : > { %v3407_v51 = vpop.f32.mrf.mxu1 }
 0x142   : > { %v3434_v2 = vpop.f32.mrf.mxu0  ;;  %v4372_v53 = vadd.f32 %v1519_v42, %v1298_v50  ;;  %v4374_v17 = vadd.f32 %v3433_v1, %v3407_v51 }
 0x143   : > { %v1587_v31 = vpop.f32.mrf.mxu1 }
 0x144   : > { %v1722_v54 = vpop.f32.mrf.mxu0  ;;  %v4376_v56 = vadd.f32 %v1719_v49, %v1587_v31 }
 0x145   : > { %v3408_v39 = vpop.f32.mrf.mxu1 }
 0x146   : > { %v3437_v57 = vpop.f32.mrf.mxu0  ;;  %v4378_v60 = vadd.f32 %v3434_v2, %v3408_v39 }
 0x147   : > { %v1590_v5 = vpop.f32.mrf.mxu1 }
 0x148   : > { %v1735_v62 = vpop.f32.mrf.mxu0  ;;  %v4380_v63 = vadd.f32 %v1722_v54, %v1590_v5 }
 0x149   : > { %v3411_v4 = vpop.f32.mrf.mxu1 }
 0x14a   : > { %v3438_v18 = vpop.f32.mrf.mxu0  ;;  %v4382_v7 = vadd.f32 %v3437_v57, %v3411_v4 }
 0x14b   : > { %v1603_v24 = vpop.f32.mrf.mxu1 }
 0x14c   : > { %v1738_v33 = vpop.f32.mrf.mxu0  ;;  %v4384_v40 = vadd.f32 %v1735_v62, %v1603_v24 }
 0x14d   : > { %v3412_v10 = vpop.f32.mrf.mxu1 }
 0x14e   : > { %v3441_v36 = vpop.f32.mrf.mxu0  ;;  %v4386_v46 = vadd.f32 %v3438_v18, %v3412_v10 }
 0x14f   : > { %v1606_v52 = vpop.f32.mrf.mxu1 }
 0x150   : > { %v1751_v0 = vpop.f32.mrf.mxu0  ;;  %v4388_v9 = vadd.f32 %v1738_v33, %v1606_v52 }
 0x151   : > { %v3415_v11 = vpop.f32.mrf.mxu1 }
 0x152   : > { %v3442_v12 = vpop.f32.mrf.mxu0  ;;  %v4390_v13 = vadd.f32 %v3441_v36, %v3415_v11 }
 0x153   : > { %v1619_v15 = vpop.f32.mrf.mxu1 }
 0x154   : > { %v1754_v16 = vpop.f32.mrf.mxu0  ;;  %v4392_v20 = vadd.f32 %v1751_v0, %v1619_v15 }
 0x155   : > { %v3416_v21 = vpop.f32.mrf.mxu1 }
 0x156   : > { %v3445_v6 = vpop.f32.mrf.mxu0  ;;  %v4394_v25 = vadd.f32 %v3442_v12, %v3416_v21 }
 0x157   : > { %v1622_v26 = vpop.f32.mrf.mxu1 }
 0x158   : > { %v1767_v14 = vpop.f32.mrf.mxu0  ;;  %v4396_v28 = vadd.f32 %v1754_v16, %v1622_v26 }
 0x159   : > { %v3419_v30 = vpop.f32.mrf.mxu1 }
 0x15a   : > { %v3446_v41 = vpop.f32.mrf.mxu0  ;;  %v4398_v34 = vadd.f32 %v3445_v6, %v3419_v30 }
 0x15b   : > { %v1635_v37 = vpop.f32.mrf.mxu1 }
 0x15c   : > { %v1770_v55 = vpop.f32.mrf.mxu0  ;;  %v4400_v38 = vadd.f32 %v1767_v14, %v1635_v37 }
 0x15d   : > { %v3420_v42 = vpop.f32.mrf.mxu1 }
 0x15e   : > { %v3449_v45 = vpop.f32.mrf.mxu0  ;;  %v4402_v1 = vadd.f32 %v3446_v41, %v3420_v42 }
 0x15f   : > { %v1638_v47 = vpop.f32.mrf.mxu1 }
 0x160   : > { %v1783_v49 = vpop.f32.mrf.mxu0  ;;  %v4404_v50 = vadd.f32 %v1770_v55, %v1638_v47 }
 0x161   : > { %v3423_v51 = vpop.f32.mrf.mxu1 }
 0x162   : > { %v3450_v2 = vpop.f32.mrf.mxu0  ;;  %v4406_v31 = vadd.f32 %v3449_v45, %v3423_v51 }
 0x163   : > { %v1651_v54 = vpop.f32.mrf.mxu1 }
 0x164   : > { %v1786_v39 = vpop.f32.mrf.mxu0  ;;  %v4408_v57 = vadd.f32 %v1783_v49, %v1651_v54 }
 0x165   : > { %v3424_v5 = vpop.f32.mrf.mxu1 }
 0x166   : > { %v3453_v62 = vpop.f32.mrf.mxu0  ;;  %v4410_v4 = vadd.f32 %v3450_v2, %v3424_v5 }
 0x167   : > { %v1654_v18 = vpop.f32.mrf.mxu1 }
 0x168   : > { %v1799_v24 = vpop.f32.mrf.mxu0  ;;  %v4412_v33 = vadd.f32 %v1786_v39, %v1654_v18 }
 0x169   : > { %v3427_v10 = vpop.f32.mrf.mxu1 }
 0x16a   : > { %v3454_v36 = vpop.f32.mrf.mxu0  ;;  %v4414_v52 = vadd.f32 %v3453_v62, %v3427_v10 }
 0x16b   : > { %v1667_v0 = vpop.f32.mrf.mxu1 }
 0x16c   : > { %v1802_v11 = vpop.f32.mrf.mxu0  ;;  %v4416_v12 = vadd.f32 %v1799_v24, %v1667_v0 }
 0x16d   : > { %v3428_v15 = vpop.f32.mrf.mxu1 }
 0x16e   : > { %v4418_v16 = vpop.f32.mrf.mxu0  ;;  %v4420_v21 = vadd.f32 %v3454_v36, %v3428_v15 }
 0x16f   : > { %v1670_v6 = vpop.f32.mrf.mxu1 }
 0x170   : > { %v4422_v26 = vpop.f32.mrf.mxu0  ;;  %v4424_v14 = vadd.f32 %v1802_v11, %v1670_v6 }
 0x171   : > { %v3459_v30 = vpop.f32.mrf.mxu1 }
 0x172   : > { %v4426_v41 = vpop.f32.mrf.mxu0  ;;  %v1950_v47 = vadd.f32 %v3459_v30, %v4374_v17 }
 0x173   : > { %v1853_v37 = vpop.f32.mrf.mxu1 }
 0x174   : > { %v4428_v55 = vpop.f32.mrf.mxu0  ;;  %v1948_v49 = vadd.f32 %v1853_v37, %v4376_v56  ;;  %v2000_v62 = vrot.slane %v1950_v47, 1 }
 0x175   : > { %v3460_v42 = vpop.f32.mrf.mxu1 }
 0x176   : > { %v4430_v45 = vpop.f32.mrf.mxu0  ;;  %v1997_v18 = vrot.slane %v1948_v49, 1  ;;  %v1951_v24 = vadd.f32 %v3460_v42, %v4378_v60 }
 0x177   : > { %v1856_v51 = vpop.f32.mrf.mxu1 }
 0x178   : > { %v4434_v2 = vpop.f32.mrf.mxu0  ;;  %v1949_v54 = vadd.f32 %v1856_v51, %v4380_v63  ;;  %v2002_v37 = vrot.slane %v1951_v24, 1 }
 0x179   : > { %v3463_v39 = vpop.f32.mrf.mxu1 }
 0x17a   : > { %v4437_v5 = vpop.f32.mrf.mxu0  ;;  %v1998_v10 = vrot.slane %v1949_v54, 1  ;;  %v1954_v11 = vadd.f32 %v3463_v39, %v4382_v7 }
 0x17b   : > { %v1869_v36 = vpop.f32.mrf.mxu1 }
 0x17c   : > { %v4440_v0 = vpop.f32.mrf.mxu0  ;;  %v1999_v17 = vsel %vm1996_vm12, %v1997_v18, %v1998_v10  ;;  %v2001_v56 = vsel %vm1996_vm12, %v1998_v10, %v2000_v62  ;;  %v1952_v63 = vadd.f32 %v1869_v36, %v4384_v40  ;;  %v2007_v54 = vrot.slane %v1954_v11, 1 }
 0x17d   : > { %v4447_v15 = vadd.f32 %v2001_v56, %v4338_v43  ;;  %v3464_v6 = vpop.f32.mrf.mxu1  ;;  %v4452_v60 = vadd.f32 %v1999_v17, %v4334_v29 }
 0x17e   : > { %v4449_v30 = vpop.f32.mrf.mxu0  ;;  %v2003_v42 = vrot.slane %v1952_v63, 1  ;;  %v1955_v47 = vadd.f32 %v3464_v6, %v4386_v46 }
 0x17f   : > { %v1872_v49 = vpop.f32.mrf.mxu1 }
 0x180   : > { %v4455_v51 = vpop.f32.mrf.mxu0  ;;  %v2004_v7 = vsel %vm1996_vm12, %v2002_v37, %v2003_v42  ;;  %v2008_v40 = vrot.slane %v1955_v47, 1  ;;  %v1953_v43 = vadd.f32 %v1872_v49, %v4388_v9 }
 0x181   : > { %v3467_v39 = vpop.f32.mrf.mxu1  ;;  %v4462_v18 = vadd.f32 %v2004_v7, %v4336_v35 }
 0x182   : > { %v4459_v62 = vpop.f32.mrf.mxu0  ;;  %v2009_v29 = vsel %vm1996_vm12, %v2007_v54, %v2008_v40  ;;  %v2005_v24 = vrot.slane %v1953_v43, 1  ;;  %v1958_v56 = vadd.f32 %v3467_v39, %v4390_v13 }
 0x183   : > { %v4466_v46 = vadd.f32 %v2009_v29, %v4340_v48  ;;  %v1885_v10 = vpop.f32.mrf.mxu1 }
 0x184   : > { %v4468_v36 = vpop.f32.mrf.mxu0  ;;  %v2006_v17 = vsel %vm1996_vm12, %v2003_v42, %v2005_v24  ;;  %v1956_v9 = vadd.f32 %v1885_v10, %v4392_v20  ;;  %v2013_v49 = vrot.slane %v1958_v56, 1 }
 0x185   : > { %v4474_v11 = vadd.f32 %v2006_v17, %v4342_v23  ;;  %v3468_v35 = vpop.f32.mrf.mxu1 }
 0x186   : > { %v4476_v63 = vpop.f32.mrf.mxu0  ;;  %v2010_v6 = vrot.slane %v1956_v9, 1  ;;  %v1959_v37 = vadd.f32 %v3468_v35, %v4394_v25 }
 0x187   : > { %v1888_v48 = vpop.f32.mrf.mxu1 }
 0x188   : > { %v4479_v47 = vpop.f32.mrf.mxu0  ;;  %v2011_v54 = vsel %vm1996_vm12, %v2008_v40, %v2010_v6  ;;  %v2015_v42 = vrot.slane %v1959_v37, 1  ;;  %v1957_v13 = vadd.f32 %v1888_v48, %v4396_v28 }
 0x189   : > { %v4484_v20 = vadd.f32 %v2011_v54, %v4344_v3  ;;  %v3471_v23 = vpop.f32.mrf.mxu1 }
 0x18a   : > { %v4486_v7 = vpop.f32.mrf.mxu0  ;;  %v2016_v43 = vsel %vm1996_vm12, %v2013_v49, %v2015_v42  ;;  %v2012_v39 = vrot.slane %v1957_v13, 1  ;;  %v1962_v17 = vadd.f32 %v3471_v23, %v4398_v34 }
 0x18b   : > { %v4490_v25 = vadd.f32 %v2016_v43, %v4346_v61  ;;  %v1901_v29 = vpop.f32.mrf.mxu1 }
 0x18c   : > { %v4492_v24 = vpop.f32.mrf.mxu0  ;;  %v2014_v40 = vsel %vm1996_vm12, %v2012_v39, %v2013_v49  ;;  %v1960_v56 = vadd.f32 %v1901_v29, %v4400_v38  ;;  %v2020_v48 = vrot.slane %v1962_v17, 1 }
 0x18d   : > { %v4496_v10 = vadd.f32 %v2014_v40, %v4348_v59  ;;  %v3472_v28 = vpop.f32.mrf.mxu1 }
 0x18e   : > { %v4498_v3 = vpop.f32.mrf.mxu0  ;;  %v2017_v49 = vrot.slane %v1960_v56, 1  ;;  %v1963_v59 = vadd.f32 %v3472_v28, %v4402_v1 }
 0x18f   : > { %v1904_v9 = vpop.f32.mrf.mxu1 }
 0x190   : > { %v4502_v35 = vpop.f32.mrf.mxu0  ;;  %v1961_v61 = vadd.f32 %v1904_v9, %v4404_v50  ;;  %v2022_v40 = vrot.slane %v1963_v59, 1 }
 0x191   : > { %v3475_v6 = vpop.f32.mrf.mxu1 }
 0x192   : > { %v4505_v37 = vpop.f32.mrf.mxu0  ;;  %v2018_v54 = vrot.slane %v1961_v61, 1  ;;  %v1966_v23 = vadd.f32 %v3475_v6, %v4406_v31 }
 0x193   : > { %v1917_v42 = vpop.f32.mrf.mxu1 }
 0x194   : > { %v4508_v13 = vpop.f32.mrf.mxu0  ;;  %v2019_v34 = vsel %vm1996_vm12, %v2017_v49, %v2018_v54  ;;  %v2021_v38 = vsel %vm1996_vm12, %v2018_v54, %v2020_v48  ;;  %v1964_v43 = vadd.f32 %v1917_v42, %v4408_v57  ;;  %v2027_v61 = vrot.slane %v1966_v23, 1 }
 0x195   : > { %v4515_v50 = vadd.f32 %v2019_v34, %v4351_v8  ;;  %v4518_v39 = vadd.f32 %v2021_v38, %v4357_v19  ;;  %v3476_v29 = vpop.f32.mrf.mxu1 }
 0x196   : > { %v4520_v1 = vpop.f32.mrf.mxu0  ;;  %v2023_v28 = vrot.slane %v1964_v43, 1  ;;  %v1967_v17 = vadd.f32 %v3476_v29, %v4410_v4 }
 0x197   : > { %v1920_v56 = vpop.f32.mrf.mxu1 }
 0x198   : > { %v4523_v9 = vpop.f32.mrf.mxu0  ;;  %v2024_v31 = vsel %vm1996_vm12, %v2022_v40, %v2023_v28  ;;  %v2028_v57 = vrot.slane %v1967_v17, 1  ;;  %v1965_v8 = vadd.f32 %v1920_v56, %v4412_v33 }
 0x199   : > { %v4528_v6 = vadd.f32 %v2024_v31, %v4354_v58  ;;  %v3479_v19 = vpop.f32.mrf.mxu1 }
 0x19a   : > { %v4530_v48 = vpop.f32.mrf.mxu0  ;;  %v2029_v49 = vsel %vm1996_vm12, %v2027_v61, %v2028_v57  ;;  %v2025_v59 = vrot.slane %v1965_v8, 1  ;;  %v1970_v38 = vadd.f32 %v3479_v19, %v4414_v52 }
 0x19b   : > { %v4534_v4 = vadd.f32 %v2029_v49, %v4360_v22  ;;  %v1933_v54 = vpop.f32.mrf.mxu1 }
 0x19c   : > { %v4536_v42 = vpop.f32.mrf.mxu0  ;;  %v2026_v34 = vsel %vm1996_vm12, %v2023_v28, %v2025_v59  ;;  %v1968_v33 = vadd.f32 %v1933_v54, %v4416_v12  ;;  %v2033_v56 = vrot.slane %v1970_v38, 1 }
 0x19d   : > { %v4542_v58 = vadd.f32 %v2026_v34, %v4363_v27  ;;  %v3480_v23 = vpop.f32.mrf.mxu1 }
 0x19e   : > { %v3537_v43 = vpop.f32.mrf.mxu0  ;;  %v2030_v29 = vrot.slane %v1968_v33, 1  ;;  %v1971_v40 = vadd.f32 %v3480_v23, %v4420_v21 }
 0x19f   : > { %v1936_v17 = vpop.f32.mrf.mxu1 }
 0x1a0   : > { %v2376_v22 = vpop.f32.mrf.mxu0  ;;  %v2031_v61 = vsel %vm1996_vm12, %v2028_v57, %v2030_v29  ;;  %v2035_v31 = vrot.slane %v1971_v40, 1  ;;  %v1969_v28 = vadd.f32 %v1936_v17, %v4424_v14 }
 0x1a1   : > { %v4548_v52 = vadd.f32 %v2031_v61, %v4366_v32  ;;  %v3511_v12 = vpop.f32.mrf.mxu1 }
 0x1a2   : > { %v3538_v8 = vpop.f32.mrf.mxu0  ;;  %v2036_v27 = vsel %vm1996_vm12, %v2033_v56, %v2035_v31  ;;  %v2032_v19 = vrot.slane %v1969_v28, 1  ;;  %v2251_v57 = vadd.f32 %v3511_v12, %v4418_v16 }
 0x1a3   : > { %v4552_v49 = vadd.f32 %v2036_v27, %v4369_v44  ;;  %v2242_v21 = vpop.f32.mrf.mxu1 }
 0x1a4   : > { %v2379_v59 = vpop.f32.mrf.mxu0  ;;  %v2034_v54 = vsel %vm1996_vm12, %v2032_v19, %v2033_v56  ;;  %v2243_v32 = vadd.f32 %v2242_v21, %v4422_v26  ;;  %v2473_v29 = vadd.f32 %v3537_v43, %v2251_v57 }
 0x1a5   : > { %v4557_v34 = vadd.f32 %v2034_v54, %v4372_v53  ;;  %v3512_v14 = vpop.f32.mrf.mxu1 }
 0x1a6   : > { %v3541_v38 = vpop.f32.mrf.mxu0  ;;  %v2471_v44 = vadd.f32 %v2376_v22, %v2243_v32  ;;  %v2254_v17 = vadd.f32 %v3512_v14, %v4426_v41  ;;  %v2523_v12 = vrot.slane %v2473_v29, 2 }
 0x1a7   : > { %v2245_v33 = vpop.f32.mrf.mxu1 }
 0x1a8   : > { %v2392_v23 = vpop.f32.mrf.mxu0  ;;  %v2246_v40 = vadd.f32 %v2245_v33, %v4428_v55  ;;  %v2520_v19 = vrot.slane %v2471_v44, 2  ;;  %v2474_v21 = vadd.f32 %v3538_v8, %v2254_v17 }
 0x1a9   : > { %v3515_v61 = vpop.f32.mrf.mxu1 }
 0x1aa   : > { %v3542_v31 = vpop.f32.mrf.mxu0  ;;  %v2472_v56 = vadd.f32 %v2379_v59, %v2246_v40  ;;  %v2267_v16 = vadd.f32 %v3515_v61, %v4430_v45  ;;  %v4569_v45 = vld [vmem:[%s4746_s4] ss:$0 sm:$0xff] }
 0x1ab   : > { %v2258_v53 = vpop.f32.mrf.mxu1 }
 0x1ac   : > { %v2395_v28 = vpop.f32.mrf.mxu0  ;;  %v2521_v26 = vrot.slane %v2472_v56, 2  ;;  %v2259_v27 = vadd.f32 %v2258_v53, %v4434_v2  ;;  %v2477_v43 = vadd.f32 %v3541_v38, %v2267_v16 }
 0x1ad   : > { %v3516_v54 = vpop.f32.mrf.mxu1 }
 0x1ae   : > { %v3545_v55 = vpop.f32.mrf.mxu0  ;;  %v2524_v22 = vsel %vm2519_vm13, %v2521_v26, %v2523_v12  ;;  %v2475_v41 = vadd.f32 %v2392_v23, %v2259_v27  ;;  %v2270_v57 = vadd.f32 %v3516_v54, %v4437_v5  ;;  %v2522_v2 = vsel %vm2519_vm13, %v2520_v19, %v2521_v26 }
 0x1af   : > { %v2577_v59 = vadd.f32 %v2524_v22, %v4447_v15  ;;  %v2261_v32 = vpop.f32.mrf.mxu1  ;;  %v2576_v29 = vadd.f32 %v2522_v2, %v4452_v60  ;;  %v2525_v23 = vrot.slane %v2474_v21, 2  ;;  %v2530_v40 = vrot.slane %v2477_v43, 2 }
 0x1b0   : > { %v2408_v14 = vpop.f32.mrf.mxu0  ;;  %v2526_v8 = vrot.slane %v2475_v41, 2  ;;  %v2478_v38 = vadd.f32 %v3542_v31, %v2270_v57  ;;  %v2262_v33 = vadd.f32 %v2261_v32, %v4440_v0 }
 0x1b1   : > { %v3519_v5 = vpop.f32.mrf.mxu1  ;;  %v2600_v17 = vadd.f32 %v4569_v45, %v2577_v59  ;;  %v2599_v16 = vadd.f32 %v4569_v45, %v2576_v29 }
 0x1b2   : > { %v3546_v44 = vpop.f32.mrf.mxu0  ;;  %v2531_v61 = vrot.slane %v2478_v38, 2  ;;  %v2476_v56 = vadd.f32 %v2395_v28, %v2262_v33  ;;  %v2283_v15 = vadd.f32 %v3519_v5, %v4449_v30  ;;  %v2527_v31 = vsel %vm2519_vm13, %v2525_v23, %v2526_v8 }
 0x1b3   : > { %v2274_v53 = vpop.f32.mrf.mxu1  ;;  %v2616_v0 = vmax.f32 %v2600_v17, 0.0  ;;  %v2615_v21 = vmax.f32 %v2599_v16, 0.0  ;;  %v2578_v54 = vadd.f32 %v2527_v31, %v4462_v18 }
 0x1b4   : > { %v2411_v12 = vpop.f32.mrf.mxu0  ;;  %v2532_v60 = vsel %vm2519_vm13, %v2530_v40, %v2531_v61  ;;  %v2528_v26 = vrot.slane %v2476_v56, 2  ;;  %v2481_v27 = vadd.f32 %v3545_v55, %v2283_v15  ;;  %v2275_v19 = vadd.f32 %v2274_v53, %v4455_v51 }
 0x1b5   : > { %v2580_v30 = vadd.f32 %v2532_v60, %v4466_v46  ;;  %v3520_v28 = vpop.f32.mrf.mxu1  ;;  %v3193_v22 = vpack.c.bf16 %v2616_v0, %v2616_v0  ;;  %v3192_v32 = vpack.c.bf16 %v2615_v21, %v2615_v21  ;;  %v2601_v38 = vadd.f32 %v4569_v45, %v2578_v54 }
 0x1b6   : > { %v3549_v43 = vpop.f32.mrf.mxu0  ;;  %v2529_v41 = vsel %vm2519_vm13, %v2526_v8, %v2528_v26  ;;  %v2479_v55 = vadd.f32 %v2408_v14, %v2275_v19  ;;  %v2286_v51 = vadd.f32 %v3520_v28, %v4459_v62  ;;  %v2536_v8 = vrot.slane %v2481_v27, 2 }
 0x1b7   : > { %v2579_v57 = vadd.f32 %v2529_v41, %v4474_v11  ;;  %v2277_v59 = vpop.f32.mrf.mxu1  ;;  %2696 = vst.msk [vmem:[%s4585_s19 + $0x4] sm:$0xf] %vm447_vm1, %v3193_v22  ;;  %v2603_v46 = vadd.f32 %v4569_v45, %v2580_v30  ;;  %2711 = vrot.lane.b32.xlu0 %v3192_v32, %s3690_s20  ;;  %2695 = vst.msk [vmem:[%s4585_s19] sm:$0xf] %vm447_vm1, %v3192_v32  ;;  %v2617_v11 = vmax.f32 %v2601_v38, 0.0 }
 0x1b8   : > { %v2424_v2 = vpop.f32.mrf.mxu0  ;;  %v2533_v33 = vrot.slane %v2479_v55, 2  ;;  %v2482_v18 = vadd.f32 %v3546_v44, %v2286_v51  ;;  %v2278_v29 = vadd.f32 %v2277_v59, %v4468_v36 }
 0x1b9   : > { %v3523_v62 = vpop.f32.mrf.mxu1  ;;  %v2602_v23 = vadd.f32 %v4569_v45, %v2579_v57  ;;  %v2619_v40 = vmax.f32 %v2603_v46, 0.0  ;;  %v3194_v16 = vpack.c.bf16 %v2617_v11, %v2617_v11 }
 0x1ba   : > { %v3550_v14 = vpop.f32.mrf.mxu0  ;;  %v2534_v5 = vsel %vm2519_vm13, %v2531_v61, %v2533_v33  ;;  %v2538_v17 = vrot.slane %v2482_v18, 2  ;;  %v2480_v56 = vadd.f32 %v2411_v12, %v2278_v29  ;;  %v2299_v44 = vadd.f32 %v3523_v62, %v4476_v63 }
 0x1bb   : > { %v2581_v36 = vadd.f32 %v2534_v5, %v4484_v20  ;;  %v2290_v15 = vpop.f32.mrf.mxu1  ;;  %v2618_v31 = vmax.f32 %v2602_v23, 0.0  ;;  %v3196_v0 = vpack.c.bf16 %v2619_v40, %v2619_v40  ;;  %2715 = vrot.lane.b32.xlu1 %v3194_v16, %s3690_s20  ;;  %2697 = vst.msk [vmem:[%s4585_s19 + $0x8] sm:$0xf] %vm447_vm1, %v3194_v16  ;;  %2713 = vrot.lane.b32.xlu0 %v3193_v22, %s3690_s20 }
 0x1bc   : > { %v2427_v53 = vpop.f32.mrf.mxu0  ;;  %v2539_v60 = vsel %vm2519_vm13, %v2536_v8, %v2538_v17  ;;  %v2535_v26 = vrot.slane %v2480_v56, 2  ;;  %v2291_v27 = vadd.f32 %v2290_v15, %v4479_v47  ;;  %v2485_v47 = vadd.f32 %v3549_v43, %v2299_v44 }
 0x1bd   : > { %v2583_v61 = vadd.f32 %v2539_v60, %v4490_v25  ;;  %v3524_v63 = vpop.f32.mrf.mxu1  ;;  %v3195_v20 = vpack.c.bf16 %v2618_v31, %v2618_v31  ;;  %2699 = vst.msk [vmem:[%s4585_s19 + $0x10] sm:$0xf] %vm447_vm1, %v3196_v0  ;;  %v2604_v19 = vadd.f32 %v4569_v45, %v2581_v36 }
 0x1be   : > { %v3553_v12 = vpop.f32.mrf.mxu0  ;;  %v2537_v30 = vsel %vm2519_vm13, %v2535_v26, %v2536_v8  ;;  %v2483_v41 = vadd.f32 %v2424_v2, %v2291_v27  ;;  %v2302_v55 = vadd.f32 %v3524_v63, %v4486_v7  ;;  %v2543_v33 = vrot.slane %v2485_v47, 2 }
 0x1bf   : > { %v2582_v28 = vadd.f32 %v2537_v30, %v4496_v10  ;;  %v2293_v21 = vpop.f32.mrf.mxu1  ;;  %2698 = vst.msk [vmem:[%s4585_s19 + $0xc] sm:$0xf] %vm447_vm1, %v3195_v20  ;;  %v2620_v54 = vmax.f32 %v2604_v19, 0.0  ;;  %v2606_v22 = vadd.f32 %v4569_v45, %v2583_v61  ;;  %2717 = vrot.lane.b32.xlu1 %v3195_v20, %s3690_s20  ;;  %2719 = vrot.lane.b32.xlu0 %v3196_v0, %s3690_s20 }
 0x1c0   : > { %v2440_v25 = vpop.f32.mrf.mxu0  ;;  %v2294_v51 = vadd.f32 %v2293_v21, %v4492_v24  ;;  %v2540_v29 = vrot.slane %v2483_v41, 2  ;;  %v2486_v8 = vadd.f32 %v3550_v14, %v2302_v55 }
 0x1c1   : > { %v3527_v57 = vpop.f32.mrf.mxu1  ;;  %v3197_v10 = vpack.c.bf16 %v2620_v54, %v2620_v54  ;;  %v2622_v59 = vmax.f32 %v2606_v22, 0.0  ;;  %v2605_v32 = vadd.f32 %v4569_v45, %v2582_v28 }
 0x1c2   : > { %v3554_v43 = vpop.f32.mrf.mxu0  ;;  %v2484_v38 = vadd.f32 %v2427_v53, %v2294_v51  ;;  %v2315_v46 = vadd.f32 %v3527_v57, %v4498_v3  ;;  %v2545_v16 = vrot.slane %v2486_v8, 2 }
 0x1c3   : > { %v2306_v2 = vpop.f32.mrf.mxu1  ;;  %2700 = vst.msk [vmem:[%s4585_s19 + $0x14] sm:$0xf] %vm447_vm1, %v3197_v10  ;;  %v3199_v24 = vpack.c.bf16 %v2622_v59, %v2622_v59  ;;  %v2621_v18 = vmax.f32 %v2605_v32, 0.0  ;;  %2721 = vrot.lane.b32.xlu1 %v3197_v10, %s3690_s20 }
 0x1c4   : > { %v2443_v7 = vpop.f32.mrf.mxu0  ;;  %v2541_v62 = vrot.slane %v2484_v38, 2  ;;  %v2307_v11 = vadd.f32 %v2306_v2, %v4502_v35  ;;  %v2489_v56 = vadd.f32 %v3553_v12, %v2315_v46 }
 0x1c5   : > { %v3528_v23 = vpop.f32.mrf.mxu1  ;;  %2702 = vst.msk [vmem:[%s4585_s19 + $0x1c] sm:$0xf] %vm447_vm1, %v3199_v24  ;;  %v3198_v40 = vpack.c.bf16 %v2621_v18, %v2621_v18 }
 0x1c6   : > { %v3557_v3 = vpop.f32.mrf.mxu0  ;;  %v2542_v5 = vsel %vm2519_vm13, %v2540_v29, %v2541_v62  ;;  %v2544_v17 = vsel %vm2519_vm13, %v2541_v62, %v2543_v33  ;;  %v2487_v44 = vadd.f32 %v2440_v25, %v2307_v11  ;;  %v2318_v15 = vadd.f32 %v3528_v23, %v4505_v37 }
 0x1c7   : > { %v2584_v36 = vadd.f32 %v2542_v5, %v4515_v50  ;;  %v2585_v14 = vadd.f32 %v2544_v17, %v4518_v39  ;;  %v2309_v35 = vpop.f32.mrf.mxu1  ;;  %2701 = vst.msk [vmem:[%s4585_s19 + $0x18] sm:$0xf] %vm447_vm1, %v3198_v40  ;;  %2723 = vrot.lane.b32.xlu0 %v3198_v40, %s3690_s20  ;;  %2725 = vrot.lane.b32.xlu1 %v3199_v24, %s3690_s20  ;;  %v2550_v27 = vrot.slane %v2489_v56, 2 }
 0x1c8   : > { %v2546_v53 = vrot.slane %v2487_v44, 2  ;;  %v2310_v31 = vadd.f32 %v2309_v35, %v4508_v13  ;;  %v2490_v0 = vadd.f32 %v3554_v43, %v2318_v15  ;;  %v2456_v26 = vpop.f32.mrf.mxu0 }
 0x1c9   : > { %v3531_v60 = vpop.f32.mrf.mxu1  ;;  %v2608_v50 = vadd.f32 %v4569_v45, %v2585_v14  ;;  %v2607_v39 = vadd.f32 %v4569_v45, %v2584_v36 }
 0x1ca   : > { %v2547_v37 = vsel %vm2519_vm13, %v2545_v16, %v2546_v53  ;;  %v2488_v61 = vadd.f32 %v2443_v7, %v2310_v31  ;;  %v2331_v63 = vadd.f32 %v3531_v60, %v4520_v1  ;;  %v2551_v12 = vrot.slane %v2490_v0, 2  ;;  %v3558_v54 = vpop.f32.mrf.mxu0 }
 0x1cb   : > { %v2586_v20 = vadd.f32 %v2547_v37, %v4528_v6  ;;  %v2322_v19 = vpop.f32.mrf.mxu1  ;;  %v2624_v13 = vmax.f32 %v2608_v50, 0.0  ;;  %v2623_v30 = vmax.f32 %v2607_v39, 0.0 }
 0x1cc   : > { %v2548_v28 = vrot.slane %v2488_v61, 2  ;;  %v2323_v47 = vadd.f32 %v2322_v19, %v4523_v9  ;;  %v2552_v21 = vsel %vm2519_vm13, %v2550_v27, %v2551_v12  ;;  %v2493_v10 = vadd.f32 %v3557_v3, %v2331_v63  ;;  %v2459_v46 = vpop.f32.mrf.mxu0 }
 0x1cd   : > { %v3532_v25 = vpop.f32.mrf.mxu1  ;;  %v3201_v22 = vpack.c.bf16 %v2624_v13, %v2624_v13  ;;  %v3200_v41 = vpack.c.bf16 %v2623_v30, %v2623_v30  ;;  %v2609_v55 = vadd.f32 %v4569_v45, %v2586_v20  ;;  %v2588_v1 = vadd.f32 %v2552_v21, %v4534_v4 }
 0x1ce   : > { %v2549_v6 = vsel %vm2519_vm13, %v2546_v53, %v2548_v28  ;;  %v2491_v51 = vadd.f32 %v2456_v26, %v2323_v47  ;;  %v2334_v43 = vadd.f32 %v3532_v25, %v4530_v48  ;;  %v2556_v18 = vrot.slane %v2493_v10, 2 }
 0x1cf   : > { %v2587_v57 = vadd.f32 %v2549_v6, %v4542_v58  ;;  %v2325_v9 = vpop.f32.mrf.mxu1  ;;  %2704 = vst.msk [vmem:[%s4585_s19 + $0x24] sm:$0xf] %vm447_vm1, %v3201_v22  ;;  %2729 = vrot.lane.b32.xlu1 %v3201_v22, %s3690_s20  ;;  %2703 = vst.msk [vmem:[%s4585_s19 + $0x20] sm:$0xf] %vm447_vm1, %v3200_v41  ;;  %2727 = vrot.lane.b32.xlu0 %v3200_v41, %s3690_s20  ;;  %v2625_v59 = vmax.f32 %v2609_v55, 0.0  ;;  %v2611_v38 = vadd.f32 %v4569_v45, %v2588_v1 }
 0x1d0   : > { %v2553_v4 = vrot.slane %v2491_v51, 2  ;;  %v2326_v32 = vadd.f32 %v2325_v9, %v4536_v42  ;;  %v2494_v58 = vadd.f32 %v3558_v54, %v2334_v43 }
 0x1d1   : > { %v3202_v33 = vpack.c.bf16 %v2625_v59, %v2625_v59  ;;  %v2610_v48 = vadd.f32 %v4569_v45, %v2587_v57  ;;  %v2627_v24 = vmax.f32 %v2611_v38, 0.0 }
 0x1d2   : > { %v2554_v2 = vsel %vm2519_vm13, %v2551_v12, %v2553_v4  ;;  %v2492_v7 = vadd.f32 %v2459_v46, %v2326_v32  ;;  %v2558_v8 = vrot.slane %v2494_v58, 2 }
 0x1d3   : > { %v2589_v29 = vadd.f32 %v2554_v2, %v4548_v52  ;;  %2705 = vst.msk [vmem:[%s4585_s19 + $0x28] sm:$0xf] %vm447_vm1, %v3202_v33  ;;  %2731 = vrot.lane.b32.xlu0 %v3202_v33, %s3690_s20  ;;  %v2626_v42 = vmax.f32 %v2610_v48, 0.0  ;;  %v3204_v11 = vpack.c.bf16 %v2627_v24, %v2627_v24 }
 0x1d4   : > { %v2555_v62 = vrot.slane %v2492_v7, 2  ;;  %v2559_v23 = vsel %vm2519_vm13, %v2556_v18, %v2558_v8 }
 0x1d5   : > { %v3203_v40 = vpack.c.bf16 %v2626_v42, %v2626_v42  ;;  %v2612_v3 = vadd.f32 %v4569_v45, %v2589_v29  ;;  %v2591_v5 = vadd.f32 %v2559_v23, %v4552_v49  ;;  %2707 = vst.msk [vmem:[%s4585_s19 + $0x30] sm:$0xf] %vm447_vm1, %v3204_v11 }
 0x1d6   : > { %v2557_v17 = vsel %vm2519_vm13, %v2555_v62, %v2556_v18 }
 0x1d7   : > { %v2590_v52 = vadd.f32 %v2557_v17, %v4557_v34  ;;  %2706 = vst.msk [vmem:[%s4585_s19 + $0x2c] sm:$0xf] %vm447_vm1, %v3203_v40  ;;  %2733 = vrot.lane.b32.xlu1 %v3203_v40, %s3690_s20  ;;  %2735 = vrot.lane.b32.xlu0 %v3204_v11, %s3690_s20  ;;  %v2628_v56 = vmax.f32 %v2612_v3, 0.0  ;;  %v2614_v44 = vadd.f32 %v4569_v45, %v2591_v5 }
 0x1d9   : > { %v3205_v36 = vpack.c.bf16 %v2628_v56, %v2628_v56  ;;  %v2613_v49 = vadd.f32 %v4569_v45, %v2590_v52  ;;  %v2630_v14 = vmax.f32 %v2614_v44, 0.0 }
 0x1db   : > { %2708 = vst.msk [vmem:[%s4585_s19 + $0x34] sm:$0xf] %vm447_vm1, %v3205_v36  ;;  %2737 = vrot.lane.b32.xlu1 %v3205_v36, %s3690_s20  ;;  %v2629_v34 = vmax.f32 %v2613_v49, 0.0  ;;  %v3207_v15 = vpack.c.bf16 %v2630_v14, %v2630_v14 }
 0x1dd   : > { %v3206_v35 = vpack.c.bf16 %v2629_v34, %v2629_v34  ;;  %2710 = vst.msk [vmem:[%s4585_s19 + $0x3c] sm:$0xf] %vm447_vm1, %v3207_v15 }
 0x1df   : > { %2741 = vrot.lane.b32.xlu1 %v3207_v15, %s3690_s20  ;;  %2709 = vst.msk [vmem:[%s4585_s19 + $0x38] sm:$0xf] %vm447_vm1, %v3206_v35  ;;  %2739 = vrot.lane.b32.xlu0 %v3206_v35, %s3690_s20 }
 0x229   : > { %v2712_v45 = vpop.permute.xlu0 %2711 }
 0x22a   : > { %2760 = vst.msk [vmem:[%s4693_s28] sm:$0xf] %vm2759_vm14, %v2712_v45 }
 0x22d   : > { %v2716_v16 = vpop.permute.xlu1 %2715  ;;  %v2714_v53 = vpop.permute.xlu0 %2713 }
 0x22e   : > { %2762 = vst.msk [vmem:[%s4693_s28 + $0x8] sm:$0xf] %vm2759_vm14, %v2716_v16  ;;  %2761 = vst.msk [vmem:[%s4693_s28 + $0x4] sm:$0xf] %vm2759_vm14, %v2714_v53 }
 0x231   : > { %v2718_v31 = vpop.permute.xlu1 %2717  ;;  %v2720_v0 = vpop.permute.xlu0 %2719 }
 0x232   : > { %2763 = vst.msk [vmem:[%s4693_s28 + $0xc] sm:$0xf] %vm2759_vm14, %v2718_v31  ;;  %2764 = vst.msk [vmem:[%s4693_s28 + $0x10] sm:$0xf] %vm2759_vm14, %v2720_v0 }
 0x235   : > { %v2722_v60 = vpop.permute.xlu1 %2721 }
 0x236   : > { %2765 = vst.msk [vmem:[%s4693_s28 + $0x14] sm:$0xf] %vm2759_vm14, %v2722_v60 }
 0x239   : > { %v2724_v26 = vpop.permute.xlu0 %2723  ;;  %v2726_v50 = vpop.permute.xlu1 %2725 }
 0x23a   : > { %2766 = vst.msk [vmem:[%s4693_s28 + $0x18] sm:$0xf] %vm2759_vm14, %v2724_v26  ;;  %2767 = vst.msk [vmem:[%s4693_s28 + $0x1c] sm:$0xf] %vm2759_vm14, %v2726_v50 }
 0x241   : > { %v2730_v39 = vpop.permute.xlu1 %2729  ;;  %v2728_v27 = vpop.permute.xlu0 %2727 }
 0x242   : > { %2769 = vst.msk [vmem:[%s4693_s28 + $0x24] sm:$0xf] %vm2759_vm14, %v2730_v39  ;;  %2768 = vst.msk [vmem:[%s4693_s28 + $0x20] sm:$0xf] %vm2759_vm14, %v2728_v27 }
 0x245   : > { %v2732_v37 = vpop.permute.xlu0 %2731 }
 0x246   : > { %2770 = vst.msk [vmem:[%s4693_s28 + $0x28] sm:$0xf] %vm2759_vm14, %v2732_v37 }
 0x249   : > { %v2734_v61 = vpop.permute.xlu1 %2733  ;;  %v2736_v63 = vpop.permute.xlu0 %2735 }
 0x24a   : > { %2771 = vst.msk [vmem:[%s4693_s28 + $0x2c] sm:$0xf] %vm2759_vm14, %v2734_v61  ;;  %2772 = vst.msk [vmem:[%s4693_s28 + $0x30] sm:$0xf] %vm2759_vm14, %v2736_v63 }
 0x24d   : > { %v2738_v20 = vpop.permute.xlu1 %2737 }
 0x24e   : > { %2773 = vst.msk [vmem:[%s4693_s28 + $0x34] sm:$0xf] %vm2759_vm14, %v2738_v20 }
 0x251   : > { %v2742_v12 = vpop.permute.xlu1 %2741  ;;  %v2740_v19 = vpop.permute.xlu0 %2739 }
 0x252   : > { %2775 = vst.msk [vmem:[%s4693_s28 + $0x3c] sm:$0xf] %vm2759_vm14, %v2742_v12  ;;  %2774 = vst.msk [vmem:[%s4693_s28 + $0x38] sm:$0xf] %vm2759_vm14, %v2740_v19 }
 0x253 PF: > { %s17_s25 = sadd.s32 1, %s3687_s25   ;;  %s4756_s21 = smov %s3679_s23 }
 0x254   : > { %p14_p12 = scmp.ge.s32.totalorder %s17_s25, 6   ;;  %s4757_s22 = smov %s3683_s24 }
 0x255   : > { %s4758_s23 = smov %s4761_s26  ;;  %s4759_s24 = smov %s4765_s27 }
 0x256   :  { %16 = sbr.rel (!%p14_p12) target bundleno = 3 (0x3), region = 99 }

// kernel: context_module.5
= control target key start
LH: loop header
LB: loop body
LE: loop exit
PB: predicated region body
PF: predicated region fallthrough
CT: control target
= control target key end

     0   :  { %s3952_s21 = smov 0   ;;  %s3954_s22 = smov 0   ;;  %s5107_s0 = inlined_call_operand.vmem [shape: bf16[2,16,16,8], index: 0, kind: input, shape index: {}, may-alias: {0,1,2}]   ;;  %s5108_s1 = inlined_call_operand.vmem [shape: bf16[2,16,16,8], index: 1, kind: input, shape index: {}, may-alias: {0,1,2}]   ;;  %s5109_s2 = inlined_call_operand.vmem [shape: bf16[2,16,16,8], index: 2, kind: input, shape index: {}, may-alias: {0,1,2}]   ;;  %s5110_s3 = inlined_call_operand.vmem [shape: bf16[2,16,16,8], index: 3, kind: input, shape index: {}]   ;;  %s5111_s4 = inlined_call_operand.vmem [shape: bf16[3,3,4,4], index: 4, kind: input, shape index: {}]   ;;  %s5112_s5 = inlined_call_operand.vmem [shape: f32[1,4], index: 5, kind: input, shape index: {}]   ;;  %s5113_s6 = inlined_call_operand.vmem [shape: f32[2,16,16,16], index: 6, kind: output, shape index: {}]  }
   0x1   :  { %s3956_s23 = smov 0   ;;  %s3958_s24 = smov 0  }
   0x2   :  { %s3960_s25 = smov 0  }
   0x3 LB: > { %s25_s26 = sadd.s32 1, %s3903_s23  ;;  %s28_s27 = sadd.s32 1, %s3907_s24  ;;  %s3911_s25 = sphi %s3960_s25, %s16_s25   ;;  %s3907_s24 = sphi %s3958_s24, %s5129_s24   ;;  %s3903_s23 = sphi %s3956_s23, %s5128_s23   ;;  %s3899_s22 = sphi %s3954_s22, %s5127_s22   ;;  %s3895_s21 = sphi %s3952_s21, %s5126_s21  }
   0x4   : > { %p26_p0 = scmp.ge.s32.totalorder %s25_s26, 2  ;;  %p3119_p1 = scmp.ge.s32.totalorder %s3911_s25, 1 }
   0x5   : > { %p316_p2 = scmp.lt.s32.totalorder %s3911_s25, 5 }
   0x6   : > { %s5131_s26 = smov (%p26_p0, %s25_s26), 0  ;;  %s5133_s27 = smov (!%p26_p0, %s28_s27), %s3907_s24 }
   0x7   : > { %p317_p3 = pnand %p3119_p1, %p316_p2  ;;  %p30_p4 = scmp.ge.s32.totalorder %s5133_s27, 2 }
   0x8   : > { %s3985_s28 = sshll.u32 (!%p317_p3), %s3895_s21, 3  ;;  %p393_p5 = scmp.lt.s32.totalorder (!%p317_p3), %s3899_s22, 1 }
   0x9   : > { %s5135_s27 = smov (%p30_p4, %s5133_s27), 0  ;;  %320 = sbr.rel (%p317_p3) target bundleno = 721 (0x2d1), region = 44 }
   0xa   : > { %p395_p6 = scmp.lt.s32.totalorder (!%p317_p3), %s3985_s28, 15  ;;  %s4045_s13 = sadd.s32 (!%p317_p3), 4294967295, %s3985_s28 }
   0xb   : > { %s3914_s14 = smov (!%p317_p3), 124   ;;  %p405_p7 = scmp.gt.s32.totalorder (!%p317_p3), %s4045_s13, 0 }
   0xc   : > { %p3126_p8 = scmp.lt.s32.totalorder (!%p317_p3), %s4045_s13, 15  ;;  %s3311_s16 = sadd.s32 (!%p317_p3), 8, %s3985_s28 }
   0xd   : > { %p4076_p9 = scmp.lt.s32.totalorder (!%p317_p3), %s3311_s16, 15  ;;  %p784_p10 = scmp.gt.s32.totalorder (!%p317_p3), %s3895_s21, 0 }
   0xe   : > { %vm460_vm0 = vcmask 27648   ;;  %s5137_s22 = smov (!%p393_p5, %s3899_s22), 1  ;;  %v3913_v0 = vmov 0   ;;  %vm507_vm1 = vsmask.f32 256  ;;  %vm1036_vm4 = vcmask 1041408  }
   0xf   : > { %478 = vst.msk [vmem:[#allocation2 + $0x44] sm:$0xf] %vm460_vm0, %v3913_v0  ;;  %461 = vst.msk [vmem:[#allocation2] sm:$0xf] %vm460_vm0, %v3913_v0  ;;  %s396_s29 = scalar_select %p395_p6, %s3985_s28, 15  ;;  %vm726_vm7 = vcmask 24576  }
  0x10   : > { %462 = vst.msk [vmem:[#allocation2 + $0x4] sm:$0xf] %vm460_vm0, %v3913_v0  ;;  %463 = vst.msk [vmem:[#allocation2 + $0x8] sm:$0xf] %vm460_vm0, %v3913_v0  ;;  %s4024_s30 = sshll.u32 %s5137_s22, 5  ;;  %s5141_s16 = smov (!%p4076_p9, %s3311_s16), 15 }
  0x11   : > { %464 = vst.msk [vmem:[#allocation2 + $0xc] sm:$0xf] %vm460_vm0, %v3913_v0  ;;  %465 = vst.msk [vmem:[#allocation2 + $0x10] sm:$0xf] %vm460_vm0, %v3913_v0  ;;  %s3121_s7 = sshll.u32 %s396_s29, 1  ;;  %s5143_s16 = smov (!%p4076_p9, %s5141_s16), 15 }
  0x12   : > { %466 = vst.msk [vmem:[#allocation2 + $0x14] sm:$0xf] %vm460_vm0, %v3913_v0  ;;  %467 = vst.msk [vmem:[#allocation2 + $0x18] sm:$0xf] %vm460_vm0, %v3913_v0  ;;  %s4027_s8 = sadd.s32 %s4024_s30, %s3121_s7  ;;  %vm508_vm2 = vsmask.f32 4368 }
  0x13   : > { %468 = vst.msk [vmem:[#allocation2 + $0x1c] sm:$0xf] %vm460_vm0, %v3913_v0  ;;  %469 = vst.msk [vmem:[#allocation2 + $0x20] sm:$0xf] %vm460_vm0, %v3913_v0  ;;  %s3123_s9 = sshll.u32 %s4027_s8, 2  ;;  %s4119_s7 = sshll.u32 %s5143_s16, 1 }
  0x14   : > { %470 = vst.msk [vmem:[#allocation2 + $0x24] sm:$0xf] %vm460_vm0, %v3913_v0  ;;  %471 = vst.msk [vmem:[#allocation2 + $0x28] sm:$0xf] %vm460_vm0, %v3913_v0  ;;  %s4035_s12 = scalar_lea.vmem %s5107_s0, %s3123_s9  ;;  %p823_p11 = scmp.lt.s32.totalorder %s3895_s21, 1  ;;  %vm999_vm11 = vcmask 31744  }
  0x15   : > { %472 = vst.msk [vmem:[#allocation2 + $0x2c] sm:$0xf] %vm460_vm0, %v3913_v0  ;;  %473 = vst.msk [vmem:[#allocation2 + $0x30] sm:$0xf] %vm460_vm0, %v3913_v0  ;;  %v500_v1 = vld [vmem:[%s4035_s12 + $0x24] sm:$0xf]  ;;  %s430_s17 = sadd.s32 %s4119_s7, %s4024_s30 }
  0x16   : > { %474 = vst.msk [vmem:[#allocation2 + $0x34] sm:$0xf] %vm460_vm0, %v3913_v0  ;;  %475 = vst.msk [vmem:[#allocation2 + $0x38] sm:$0xf] %vm460_vm0, %v3913_v0  ;;  %v499_v2 = vld [vmem:[%s4035_s12 + $0x20] sm:$0xf] }
  0x17   : > { %476 = vst.msk [vmem:[#allocation2 + $0x3c] sm:$0xf] %vm460_vm0, %v3913_v0  ;;  %477 = vst.msk [vmem:[#allocation2 + $0x40] sm:$0xf] %vm460_vm0, %v3913_v0  ;;  %v501_v3 = vld [vmem:[%s4035_s12 + $0x28] sm:$0xf] }
  0x18   : > { %479 = vst.msk [vmem:[#allocation2 + $0x48] sm:$0xf] %vm460_vm0, %v3913_v0  ;;  %480 = vst.msk [vmem:[#allocation2 + $0x4c] sm:$0xf] %vm460_vm0, %v3913_v0  ;;  %v587_v4 = vshrl.u32 %v500_v1, 16  ;;  %v579_v5 = vshrl.u32 %v499_v2, 16 }
  0x19   : > { %481 = vst.msk [vmem:[#allocation2 + $0x50] sm:$0xf] %vm460_vm0, %v3913_v0  ;;  %482 = vst.msk [vmem:[#allocation2 + $0x54] sm:$0xf] %vm460_vm0, %v3913_v0  ;;  %v582_v6 = vshll.u32 %v499_v2, 16  ;;  %v596_v8 = vshrl.u32 %v501_v3, 16 }
  0x1a   : > { %483 = vst.msk [vmem:[#allocation2 + $0x58] sm:$0xf] %vm460_vm0, %v3913_v0  ;;  %484 = vst.msk [vmem:[#allocation2 + $0x5c] sm:$0xf] %vm460_vm0, %v3913_v0  ;;  %v491_v7 = vld [vmem:[%s4035_s12] sm:$0xf] }
  0x1b   : > { %485 = vst.msk [vmem:[#allocation2 + $0x60] sm:$0xf] %vm460_vm0, %v3913_v0  ;;  %486 = vst.msk [vmem:[#allocation2 + $0x64] sm:$0xf] %vm460_vm0, %v3913_v0  ;;  %v599_v9 = vshll.u32 %v501_v3, 16  ;;  %v511_v10 = vshrl.u32 %v491_v7, 16 }
  0x1c   : > { %487 = vst.msk [vmem:[#allocation2 + $0x68] sm:$0xf] %vm460_vm0, %v3913_v0  ;;  %488 = vst.msk [vmem:[#allocation2 + $0x6c] sm:$0xf] %vm460_vm0, %v3913_v0  ;;  %v493_v11 = vld [vmem:[%s4035_s12 + $0x8] sm:$0xf] }
  0x1d   : > { %489 = vst.msk [vmem:[#allocation2 + $0x70] sm:$0xf] %vm460_vm0, %v3913_v0  ;;  %490 = vst.msk [vmem:[#allocation2 + $0x74] sm:$0xf] %vm460_vm0, %v3913_v0  ;;  %v589_v12 = vrot.slane %v587_v4, 7  ;;  %v581_v13 = vrot.slane %v579_v5, 7 }
  0x1e   : > { %v514_v14 = vshll.u32 %v491_v7, 16  ;;  %v528_v15 = vshrl.u32 %v493_v11, 16  ;;  %v492_v16 = vld [vmem:[%s4035_s12 + $0x4] sm:$0xf]  ;;  %v598_v17 = vrot.slane %v596_v8, 7  ;;  %v513_v18 = vrot.slane %v511_v10, 7  ;;  %vm4063_vm3 = vmor %vm507_vm1, %vm508_vm2 }
  0x1f   : > { %v519_v19 = vshrl.u32 %v492_v16, 16  ;;  %v502_v20 = vld [vmem:[%s4035_s12 + $0x2c] sm:$0xf]  ;;  %v594_v21 = vrot.slane %v589_v12, 4  ;;  %v584_v22 = vor.u32 %v582_v6, %v581_v13  ;;  %v531_v24 = vshll.u32 %v493_v11, 16  ;;  %s406_s15 = scalar_select %p405_p7, %s4045_s13, 0  ;;  %vm4180_vm9 = vmand %vm726_vm7, %vm507_vm1 }
  0x20   : > { %v601_v23 = vor.u32 %v599_v9, %v598_v17  ;;  %v516_v25 = vor.u32 %v514_v14, %v513_v18  ;;  %v4049_v26 = vrot.slane %v528_v15, 7  ;;  %v604_v28 = vshrl.u32 %v502_v20, 16  ;;  %v494_v34 = vld [vmem:[%s4035_s12 + $0xc] sm:$0xf]  ;;  %v503_v35 = vld [vmem:[%s4035_s12 + $0x30] sm:$0xf] }
  0x21   : > { %674 = vrot.lane.b32.xlu1 %v594_v21, %s3914_s14  ;;  %670 = vrot.lane.b32.xlu0 %v584_v22, %s3914_s14  ;;  %v521_v27 = vrot.slane %v519_v19, 7  ;;  %v522_v29 = vshll.u32 %v492_v16, 16  ;;  %v590_v30 = vshll.u32 %v500_v1, 16  ;;  %v517_v36 = vrot.slane %v513_v18, 4  ;;  %v504_v39 = vld [vmem:[%s4035_s12 + $0x34] sm:$0xf] }
  0x22   : > { %v533_v31 = vor.u32 %v531_v24, %v4049_v26  ;;  %v606_v33 = vrot.slane %v604_v28, 7  ;;  %v607_v38 = vshll.u32 %v502_v20, 16  ;;  %v585_v42 = vrot.slane %v581_v13, 4  ;;  %s5139_s15 = smov (!%p3126_p8, %s406_s15), 15  ;;  %v495_v50 = vld [vmem:[%s4035_s12 + $0x10] sm:$0xf] }
  0x23   : > { %v526_v32 = vrot.slane %v521_v27, 4  ;;  %v524_v37 = vor.u32 %v522_v29, %v521_v27  ;;  %v592_v41 = vor.u32 %v590_v30, %v589_v12  ;;  %v536_v44 = vshrl.u32 %v494_v34, 16  ;;  %v496_v51 = vld [vmem:[%s4035_s12 + $0x14] sm:$0xf]  ;;  %s3131_s18 = sshll.u32 %s5139_s15, 1  ;;  %s3915_s20 = smov 8  }
  0x24   : > { %v611_v43 = vrot.slane %v606_v33, 4  ;;  %v613_v45 = vshrl.u32 %v503_v35, 16  ;;  %v621_v46 = vshrl.u32 %v504_v39, 16  ;;  %v602_v48 = vrot.slane %v598_v17, 4  ;;  %s413_s19 = sadd.s32 %s3131_s18, %s4024_s30  ;;  %v3149_v3 = vld [vmem:[%s5111_s4 + $0x6] sm:$0x3] }
  0x25   : > { %676 = vrot.lane.b32.xlu1 %v601_v23, %s3914_s14  ;;  %646 = vrot.lane.b32.xlu0 %v516_v25, %s3914_s14  ;;  %v525_v47 = vsel %vm4063_vm3, %v517_v36, %v524_v37  ;;  %v609_v49 = vor.u32 %v607_v38, %v606_v33  ;;  %v593_v52 = vsel %vm4063_vm3, %v585_v42, %v592_v41  ;;  %v616_v53 = vshll.u32 %v503_v35, 16  ;;  %v505_v8 = vld [vmem:[%s4035_s12 + $0x38] sm:$0xf]  ;;  %s3133_s28 = sshll.u32 %s413_s19, 2  ;;  %v506_v15 = vld [vmem:[%s4035_s12 + $0x3c] sm:$0xf] }
  0x26   : > { %v538_v54 = vrot.slane %v536_v44, 7  ;;  %v615_v55 = vrot.slane %v613_v45, 7  ;;  %v539_v56 = vshll.u32 %v494_v34, 16  ;;  %v4084_v57 = vrot.slane %v621_v46, 7  ;;  %3743 = vmatprep.subr.msk.bf16.mxu0 %vm1036_vm4, %v3149_v3  ;;  %3744 = vmatprep.subr.msk.bf16.mxu1 %vm1036_vm4, %v3149_v3  ;;  %s785_s29 = scalar_select %p784_p10, 1, 0 }
  0x27   : > { %v610_v58 = vsel %vm4063_vm3, %v602_v48, %v609_v49  ;;  %v624_v59 = vshll.u32 %v504_v39, 16  ;;  %v545_v60 = vshrl.u32 %v495_v50, 16  ;;  %v553_v61 = vshrl.u32 %v496_v51, 16  ;;  %v497_v18 = vld [vmem:[%s4035_s12 + $0x18] sm:$0xf]  ;;  %s415_s13 = scalar_lea.vmem %s5108_s1, %s3133_s28  ;;  %s3140_s30 = sshll.u32 %s430_s17, 2 }
  0x28   : > { %v534_v62 = vrot.slane %v4049_v26, 4  ;;  %v543_v63 = vrot.slane %v538_v54, 4  ;;  %v618_v0 = vor.u32 %v616_v53, %v615_v55  ;;  %v541_v1 = vor.u32 %v539_v56, %v538_v54  ;;  %v4132_v23 = vld [vmem:[%s5111_s4] sm:$0x3]  ;;  %v498_v25 = vld [vmem:[%s4035_s12 + $0x1c] sm:$0xf]  ;;  %s432_s28 = scalar_lea.vmem %s5109_s2, %s3140_s30 }
  0x29   : > { %652 = vrot.lane.b32.xlu1 %v533_v31, %s3914_s14  ;;  %650 = vrot.lane.b32.xlu0 %v526_v32, %s3914_s14  ;;  %v619_v2 = vrot.slane %v615_v55, 4  ;;  %v626_v4 = vor.u32 %v624_v59, %v4084_v57  ;;  %v547_v5 = vrot.slane %v545_v60, 7  ;;  %v4101_v6 = vrot.slane %v553_v61, 7  ;;  %v780_v27 = vld [vmem:[%s415_s13] sm:$0xf]  ;;  %s3916_s10 = smov 12  }
  0x2a   : > { %v556_v7 = vshll.u32 %v496_v51, 16  ;;  %v548_v9 = vshll.u32 %v495_v50, 16  ;;  %v630_v10 = vshrl.u32 %v505_v8, 16  ;;  %v542_v11 = vsel %vm4063_vm3, %v534_v62, %v541_v1  ;;  %v781_v29 = vld [vmem:[%s415_s13 + $0x4] sm:$0xf] }
  0x2b   : > { %v627_v12 = vsel %vm4063_vm3, %v619_v2, %v626_v4  ;;  %v551_v13 = vrot.slane %v547_v5, 4  ;;  %v1038_v16 = vsel %vm1036_vm4, %v3149_v3, 0  ;;  %v633_v17 = vshll.u32 %v505_v8, 16  ;;  %s824_s18 = scalar_select %p823_p11, 1, 0 }
  0x2c   : > { %v558_v14 = vor.u32 %v556_v7, %v4101_v6  ;;  %3508 = vmatpush3.bf16.msra.mxu0 %v1038_v16  ;;  %3742 = vmatpush3.bf16.msra.mxu1 %v1038_v16  ;;  %v550_v19 = vor.u32 %v548_v9, %v547_v5  ;;  %v632_v20 = vrot.slane %v630_v10, 7  ;;  %v638_v21 = vshrl.u32 %v506_v15, 16  ;;  %v4149_v34 = vld [vmem:[%s5111_s4 + $0xc] sm:$0x3]  ;;  %v782_v49 = vld [vmem:[%s432_s28] sm:$0xf] }
  0x2d   : > { %648 = vrot.lane.b32.xlu1 %v525_v47, %s3914_s14  ;;  %680 = vrot.lane.b32.xlu0 %v611_v43, %s3914_s14  ;;  %v786_v22 = vstv %s785_s29  ;;  %v628_v26 = vrot.slane %v4084_v57, 4  ;;  %v562_v28 = vshrl.u32 %v497_v18, 16  ;;  %v641_v32 = vshll.u32 %v506_v15, 16  ;;  %v783_v50 = vld [vmem:[%s432_s28 + $0x4] sm:$0xf]  ;;  %s4675_s28 = scalar_lea.vmem %s5110_s3, %s3123_s9 }
  0x2e   : > { %v559_v24 = vsel %vm4063_vm3, %v551_v13, %v558_v14  ;;  %3745 = vmatprep.subr.msk.bf16.mxu1 %vm1036_vm4, %v4132_v23  ;;  %vm787_vm5 = vcmp.eq.s32.totalorder %v786_v22, 1  ;;  %v635_v30 = vor.u32 %v633_v17, %v632_v20  ;;  %v640_v31 = vrot.slane %v638_v21, 7  ;;  %3746 = vmatprep.subr.msk.bf16.mxu0 %vm1036_vm4, %v4149_v34  ;;  %v756_v16 = vld [vmem:[#allocation2 + $0x44] sm:$0x1]  ;;  %v759_v22 = vld [vmem:[#allocation2 + $0x48] sm:$0xf] }
  0x2f   : > { %v570_v33 = vshrl.u32 %v498_v25, 16  ;;  %v560_v35 = vrot.slane %v4101_v6, 4  ;;  %v788_v36 = vsel %vm787_vm5, %v780_v27, 0  ;;  %v789_v37 = vsel %vm787_vm5, %v781_v29, 0  ;;  %v731_v29 = vld [vmem:[#allocation2 + $0x18] sm:$0xf] }
  0x30   : > { %v636_v38 = vrot.slane %v632_v20, 4  ;;  %v564_v39 = vrot.slane %v562_v28, 7  ;;  %v565_v41 = vshll.u32 %v497_v18, 16  ;;  %v825_v42 = vstv %s824_s18  ;;  %v752_v18 = vld [vmem:[#allocation2 + $0x3c] sm:$0xf] }
  0x31   : > { %678 = vrot.lane.b32.xlu1 %v610_v58, %s3914_s14  ;;  %672 = vrot.lane.b32.xlu0 %v593_v52, %s3914_s14  ;;  %v645_v43 = vrot.slane %v640_v31, 4  ;;  %v643_v44 = vor.u32 %v641_v32, %v640_v31  ;;  %v572_v45 = vrot.slane %v570_v33, 7  ;;  %v573_v46 = vshll.u32 %v498_v25, 16  ;;  %v763_v33 = vld [vmem:[#allocation2 + $0x50] sm:$0x1] }
  0x32   : > { %v791_v47 = vshrl.u32 %v788_v36, 16  ;;  %v799_v48 = vshrl.u32 %v789_v37, 16  ;;  %vm826_vm6 = vcmp.eq.s32.totalorder %v825_v42, 1  ;;  %v567_v52 = vor.u32 %v565_v41, %v564_v39 }
  0x33   : > { %v644_v51 = vsel %vm4063_vm3, %v636_v38, %v643_v44  ;;  %v568_v53 = vrot.slane %v564_v39, 4  ;;  %v575_v54 = vor.u32 %v573_v46, %v572_v45  ;;  %v802_v57 = vshll.u32 %v789_v37, 16  ;;  %v766_v44 = vld [vmem:[#allocation2 + $0x54] sm:$0xf] }
  0x34   : > { %v793_v55 = vrot.slane %v791_v47, 7  ;;  %v801_v56 = vrot.slane %v799_v48, 7  ;;  %v827_v58 = vsel %vm826_vm6, %v782_v49, 0  ;;  %v828_v59 = vsel %vm826_vm6, %v783_v50, 0 }
  0x35   : > { %656 = vrot.lane.b32.xlu1 %v543_v63, %s3914_s14  ;;  %682 = vrot.lane.b32.xlu0 %v618_v0, %s3914_s14  ;;  %v577_v60 = vrot.slane %v572_v45, 4  ;;  %v794_v61 = vshll.u32 %v788_v36, 16  ;;  %v830_v62 = vshrl.u32 %v827_v58, 16  ;;  %v576_v63 = vsel %vm4063_vm3, %v568_v53, %v575_v54 }
  0x36   : > { %v797_v0 = vrot.slane %v793_v55, 4  ;;  %v804_v1 = vor.u32 %v802_v57, %v801_v56  ;;  %v838_v2 = vshrl.u32 %v828_v59, 16  ;;  %v833_v5 = vshll.u32 %v827_v58, 16  ;;  %v4236_v58 = vld [vmem:[%s5111_s4 + $0x8] sm:$0x3] }
  0x37   : > { %v796_v3 = vor.u32 %v794_v61, %v793_v55  ;;  %v832_v4 = vrot.slane %v830_v62, 7  ;;  %v841_v8 = vshll.u32 %v828_v59, 16  ;;  %v806_v10 = vrot.slane %v801_v56, 4  ;;  %v738_v56 = vld [vmem:[#allocation2 + $0x24] sm:$0xf] }
  0x38   : > { %v805_v6 = vsel %vm4063_vm3, %v797_v0, %v804_v1  ;;  %v840_v7 = vrot.slane %v838_v2, 7  ;;  %vm720_vm8 = vsmask.f32 7938  ;;  %v1258_v57 = vsel %vm1036_vm4, %v4132_v23, 0  ;;  %v773_v23 = vld [vmem:[#allocation2 + $0x60] sm:$0xf] }
  0x39   : > { %654 = vrot.lane.b32.xlu1 %v542_v11, %s3914_s14  ;;  %684 = vrot.lane.b32.xlu0 %v627_v12, %s3914_s14  ;;  %v835_v9 = vor.u32 %v833_v5, %v832_v4  ;;  %v836_v11 = vrot.slane %v832_v4, 4  ;;  %vm4185_vm10 = vmand %vm460_vm0, %vm720_vm8  ;;  %v742_v5 = vld [vmem:[#allocation2 + $0x2c] sm:$0x1]  ;;  %vm2736_vm12 = vcmask 64512   ;;  %vm2069_vm13 = vcmask 1046528  }
  0x3a   : > { %v843_v12 = vor.u32 %v841_v8, %v840_v7  ;;  %v845_v13 = vrot.slane %v840_v7, 4  ;;  %v777_v7 = vld [vmem:[#allocation2 + $0x68] sm:$0x1]  ;;  %vm2849_vm14 = vcmask 97344   ;;  %vm2592_vm15 = vcmask 1045504  }
  0x3c   : > { %v844_v14 = vsel %vm4063_vm3, %v836_v11, %v843_v12 }
  0x3d   : > { %660 = vrot.lane.b32.xlu1 %v559_v24, %s3914_s14  ;;  %658 = vrot.lane.b32.xlu0 %v550_v19, %s3914_s14  ;;  %v722_v24 = vld [vmem:[#allocation2 + $0xc] sm:$0xf] }
  0x41   : > { %688 = vrot.lane.b32.xlu1 %v635_v30, %s3914_s14  ;;  %686 = vrot.lane.b32.xlu0 %v628_v26, %s3914_s14  ;;  %v728_v30 = vld [vmem:[#allocation2 + $0x14] sm:$0x1] }
  0x45   : > { %662 = vrot.lane.b32.xlu1 %v560_v35, %s3914_s14  ;;  %692 = vrot.lane.b32.xlu0 %v645_v43, %s3914_s14  ;;  %v735_v43 = vld [vmem:[#allocation2 + $0x20] sm:$0x1] }
  0x49   : > { %690 = vrot.lane.b32.xlu1 %v644_v51, %s3914_s14  ;;  %664 = vrot.lane.b32.xlu0 %v567_v52, %s3914_s14  ;;  %v1480_v51 = vsel %vm1036_vm4, %v4149_v34, 0  ;;  %v4221_v52 = vld [vmem:[%s5111_s4 + $0x2] sm:$0x3] }
  0x4d   : > { %666 = vrot.lane.b32.xlu1 %v576_v63, %s3914_s14  ;;  %668 = vrot.lane.b32.xlu0 %v577_v60, %s3914_s14  ;;  %v770_v63 = vld [vmem:[#allocation2 + $0x5c] sm:$0x1] }
  0x51   : > { %809 = vrot.lane.b32.xlu1 %v805_v6, %s3914_s14  ;;  %807 = vrot.lane.b32.xlu0 %v796_v3, %s3914_s14 }
  0x55   : > { %846 = vrot.lane.b32.xlu1 %v835_v9, %s3914_s14  ;;  %811 = vrot.lane.b32.xlu0 %v806_v10, %s3914_s14 }
  0x59   : > { %850 = vrot.lane.b32.xlu0 %v845_v13, %s3914_s14  ;;  %848 = vrot.lane.b32.xlu1 %v844_v14, %s3914_s14  ;;  %v745_v13 = vld [vmem:[#allocation2 + $0x30] sm:$0xf] }
  0x93   : > { %v675_v40 = vpop.permute.xlu1 %674  ;;  %v671_v19 = vpop.permute.xlu0 %670 }
  0x94   : > { %v757_v20 = vsel %vm4180_vm9, %v675_v40, %v756_v16  ;;  %v753_v21 = vsel %vm4185_vm10, %v671_v19, %v752_v18  ;;  %v749_v19 = vld [vmem:[#allocation2 + $0x38] sm:$0x1] }
  0x95   : > { %758 = vst [vmem:[#allocation2 + $0x44] sm:$0x1] %v757_v20  ;;  %754 = vst [vmem:[#allocation2 + $0x3c] sm:$0xf] %v753_v21 }
  0x97   : > { %v677_v25 = vpop.permute.xlu1 %676  ;;  %v647_v26 = vpop.permute.xlu0 %646 }
  0x98   : > { %v760_v27 = vsel %vm4185_vm10, %v677_v25, %v759_v22  ;;  %v723_v28 = vsel %vm4185_vm10, %v647_v26, %v722_v24  ;;  %v816_v24 = vld [vmem:[#allocation2] sm:$0xf] }
  0x99   : > { %761 = vst [vmem:[#allocation2 + $0x48] sm:$0xf] %v760_v27  ;;  %724 = vst [vmem:[#allocation2 + $0xc] sm:$0xf] %v723_v28 }
  0x9b   : > { %v653_v31 = vpop.permute.xlu1 %652  ;;  %v651_v32 = vpop.permute.xlu0 %650 }
  0x9c   : > { %v732_v35 = vsel %vm4185_vm10, %v653_v31, %v731_v29  ;;  %v729_v36 = vsel %vm4180_vm9, %v651_v32, %v728_v30  ;;  %v856_v30 = vld [vmem:[#allocation2 + $0x6c] sm:$0xf]  ;;  %v820_v31 = vld [vmem:[#allocation2 + $0x8] sm:$0x1] }
  0x9d   : > { %733 = vst [vmem:[#allocation2 + $0x18] sm:$0xf] %v732_v35  ;;  %730 = vst [vmem:[#allocation2 + $0x14] sm:$0x1] %v729_v36 }
  0x9f   : > { %v649_v37 = vpop.permute.xlu1 %648  ;;  %v681_v38 = vpop.permute.xlu0 %680 }
  0xa0   : > { %725 = vst.msk [vmem:[#allocation2 + $0x10] sm:$0xf] %vm460_vm0, %v649_v37  ;;  %v764_v39 = vsel %vm4180_vm9, %v681_v38, %v763_v33  ;;  %v4229_v34 = vld [vmem:[#allocation2 + $0x44] sm:$0xff]  }
  0xa1   : > { %765 = vst [vmem:[#allocation2 + $0x50] sm:$0x1] %v764_v39  ;;  %v860_v39 = vld [vmem:[#allocation2 + $0x74] sm:$0x1] }
  0xa3   : > { %v679_v41 = vpop.permute.xlu1 %678  ;;  %v673_v42 = vpop.permute.xlu0 %672 }
  0xa4   : > { %762 = vst.msk [vmem:[#allocation2 + $0x4c] sm:$0xf] %vm460_vm0, %v679_v41  ;;  %755 = vst.msk [vmem:[#allocation2 + $0x40] sm:$0xf] %vm460_vm0, %v673_v42  ;;  %v4212_v50 = vld [vmem:[#allocation2 + $0x14] sm:$0xff]  }
  0xa7   : > { %v657_v45 = vpop.permute.xlu1 %656  ;;  %v683_v46 = vpop.permute.xlu0 %682  ;;  %v4206_v47 = vld [vmem:[#allocation2 + $0xc] sm:$0xff]  }
  0xa8   : > { %v736_v48 = vsel %vm4180_vm9, %v657_v45, %v735_v43  ;;  %v767_v49 = vsel %vm4185_vm10, %v683_v46, %v766_v44  ;;  %3509 = vmatprep.mubr.msk.bf16.mxu0 %vm999_vm11, %v4206_v47  ;;  %v1624_v46 = vsel %vm1036_vm4, %v4236_v58, 0 }
  0xa9   : > { %737 = vst [vmem:[#allocation2 + $0x20] sm:$0x1] %v736_v48  ;;  %768 = vst [vmem:[#allocation2 + $0x54] sm:$0xf] %v767_v49  ;;  %3510 = vmatmul.mubr.msk.bf16.vlgmr.msra.gmra.mxu0 %vm999_vm11, %v4212_v50  ;;  %v4319_v48 = vld [vmem:[#allocation2 + $0x10] sm:$0xff]   ;;  %v1756_v49 = vsel %vm1036_vm4, %v4221_v52, 0 }
  0xaa   : > { %3560 = vmatpush3.bf16.msra.mxu0 %v1480_v51  ;;  %v3249_v51 = vld [vmem:[%s5111_s4 + $0xe] sm:$0x3] }
  0xab   : > { %v655_v53 = vpop.permute.xlu1 %654  ;;  %v685_v54 = vpop.permute.xlu0 %684  ;;  %v4225_v55 = vld [vmem:[#allocation2 + $0x3c] sm:$0xff]   ;;  %3748 = vmatprep.subr.msk.bf16.mxu0 %vm1036_vm4, %v4221_v52  ;;  %v4242_v59 = vld [vmem:[#allocation2 + $0x4c] sm:$0xff]  }
  0xac   : > { %734 = vst.msk [vmem:[#allocation2 + $0x1c] sm:$0xf] %vm460_vm0, %v655_v53  ;;  %769 = vst.msk [vmem:[#allocation2 + $0x58] sm:$0xf] %vm460_vm0, %v685_v54  ;;  %3521 = vmatprep.mubr.msk.bf16.mxu1 %vm999_vm11, %v4225_v55  ;;  %v3263_v53 = vld [vmem:[%s5111_s4 + $0xa] sm:$0x3] }
  0xad   : > { %3522 = vmatmul.mubr.msk.bf16.vlgmr.msra.gmra.mxu1 %vm999_vm11, %v4229_v34 }
  0xae   : > { %3525 = vmatprep.mubr.msk.bf16.mxu1 %vm999_vm11, %v4242_v59  ;;  %3534 = vmatpush3.bf16.msra.mxu1 %v1258_v57 }
  0xaf   : > { %v661_v60 = vpop.permute.xlu1 %660  ;;  %v659_v61 = vpop.permute.xlu0 %658  ;;  %3747 = vmatprep.subr.msk.bf16.mxu1 %vm1036_vm4, %v4236_v58 }
  0xb0   : > { %741 = vst.msk [vmem:[#allocation2 + $0x28] sm:$0xf] %vm460_vm0, %v661_v60  ;;  %v739_v62 = vsel %vm4185_vm10, %v659_v61, %v738_v56  ;;  %v4359_v60 = vld [vmem:[#allocation2 + $0x40] sm:$0xff]  }
  0xb1   : > { %740 = vst [vmem:[#allocation2 + $0x24] sm:$0xf] %v739_v62 }
  0xb3   : > { %v689_v0 = vpop.permute.xlu1 %688  ;;  %v687_v1 = vpop.permute.xlu0 %686  ;;  %v4253_v2 = vld [vmem:[#allocation2 + $0x1c] sm:$0xff]   ;;  %v4259_v6 = vld [vmem:[#allocation2 + $0x54] sm:$0xff]  }
  0xb4   : > { %v774_v3 = vsel %vm4185_vm10, %v689_v0, %v773_v23  ;;  %v771_v4 = vsel %vm4180_vm9, %v687_v1, %v770_v63  ;;  %3513 = vmatprep.mubr.msk.bf16.mxu0 %vm999_vm11, %v4253_v2  ;;  %v4300_v38 = vld [vmem:[#allocation2 + $0x18] sm:$0xff]   ;;  %v4363_v23 = vld [vmem:[#allocation2 + $0x48] sm:$0xff]   ;;  %v4375_v63 = vld [vmem:[#allocation2 + $0x50] sm:$0xff]  }
  0xb5   : > { %775 = vst [vmem:[#allocation2 + $0x60] sm:$0xf] %v774_v3  ;;  %772 = vst [vmem:[#allocation2 + $0x5c] sm:$0x1] %v771_v4  ;;  %3526 = vmatmul.mubr.msk.bf16.gmra.mxu1 %vm999_vm11, %v4259_v6  ;;  %v4341_v52 = vld [vmem:[#allocation2 + $0x18] sm:$0xff]   ;;  %v4377_v0 = vld [vmem:[#allocation2 + $0x40] sm:$0xff]  }
  0xb6   : > { %v4389_v3 = vld [vmem:[#allocation2 + $0x48] sm:$0xff]  }
  0xb7   : > { %v663_v8 = vpop.permute.xlu1 %662  ;;  %v693_v9 = vpop.permute.xlu0 %692 }
  0xb8   : > { %v743_v10 = vsel %vm4180_vm9, %v663_v8, %v742_v5  ;;  %v778_v11 = vsel %vm4180_vm9, %v693_v9, %v777_v7  ;;  %v4269_v12 = vld [vmem:[#allocation2 + $0x24] sm:$0xff]   ;;  %v4393_v5 = vld [vmem:[#allocation2 + $0x50] sm:$0xff]  }
  0xb9   : > { %744 = vst [vmem:[#allocation2 + $0x2c] sm:$0x1] %v743_v10  ;;  %779 = vst [vmem:[#allocation2 + $0x68] sm:$0x1] %v778_v11  ;;  %3514 = vmatmul.mubr.msk.bf16.gmra.mxu0 %vm999_vm11, %v4269_v12  ;;  %v4313_v44 = vld [vmem:[#allocation2 + $0x20] sm:$0xff]   ;;  %v1890_v10 = vsel %vm1036_vm4, %v3249_v51, 0 }
  0xba   : > { %v4345_v56 = vld [vmem:[#allocation2 + $0x20] sm:$0xff]   ;;  %v2147_v11 = vsel %vm1036_vm4, %v3263_v53, 0 }
  0xbb   : > { %v691_v14 = vpop.permute.xlu1 %690  ;;  %v665_v16 = vpop.permute.xlu0 %664 }
  0xbc   : > { %776 = vst.msk [vmem:[#allocation2 + $0x64] sm:$0xf] %vm460_vm0, %v691_v14  ;;  %v746_v18 = vsel %vm4185_vm10, %v665_v16, %v745_v13  ;;  %v4276_v40 = vld [vmem:[#allocation2 + $0x5c] sm:$0xff]   ;;  %v3262_v13 = vld [vmem:[%s5111_s4 + $0x4] sm:$0x3] }
  0xbd   : > { %747 = vst [vmem:[#allocation2 + $0x30] sm:$0xf] %v746_v18  ;;  %3529 = vmatprep.mubr.msk.bf16.mxu1 %vm999_vm11, %v4276_v40  ;;  %v4379_v1 = vld [vmem:[#allocation2 + $0x58] sm:$0xff]   ;;  %v3288_v14 = vld [vmem:[%s5111_s4 + $0x10] sm:$0x3]  ;;  %v2279_v16 = vsel %vm1036_vm4, %v3262_v13, 0 }
  0xbe   : > { %v4407_v9 = vld [vmem:[#allocation2 + $0x58] sm:$0xff]   ;;  %v2413_v18 = vsel %vm1036_vm4, %v3288_v14, 0 }
  0xbf   : > { %v667_v20 = vpop.permute.xlu1 %666  ;;  %v669_v21 = vpop.permute.xlu0 %668 }
  0xc0   : > { %748 = vst.msk [vmem:[#allocation2 + $0x34] sm:$0xf] %vm460_vm0, %v667_v20  ;;  %v750_v22 = vsel %vm4180_vm9, %v669_v21, %v749_v19  ;;  %v4327_v15 = vld [vmem:[#allocation2 + $0x28] sm:$0xff]  }
  0xc1   : > { %751 = vst [vmem:[#allocation2 + $0x38] sm:$0x1] %v750_v22  ;;  %v4357_v58 = vld [vmem:[#allocation2 + $0x28] sm:$0xff]  }
  0xc3   : > { %v810_v25 = vpop.permute.xlu1 %809  ;;  %v808_v26 = vpop.permute.xlu0 %807  ;;  %v4283_v27 = vld [vmem:[#allocation2 + $0x64] sm:$0xff]  }
  0xc4   : > { %819 = vst.msk [vmem:[#allocation2 + $0x4] sm:$0xf] %vm460_vm0, %v810_v25  ;;  %v817_v28 = vsel %vm4185_vm10, %v808_v26, %v816_v24  ;;  %v4288_v29 = vld [vmem:[#allocation2 + $0x2c] sm:$0xff]   ;;  %3530 = vmatmul.mubr.msk.bf16.gmra.mxu1 %vm999_vm11, %v4283_v27  ;;  %v4391_v4 = vld [vmem:[#allocation2 + $0x60] sm:$0xff]  }
  0xc5   : > { %818 = vst [vmem:[#allocation2] sm:$0xf] %v817_v28  ;;  %3517 = vmatprep.mubr.msk.bf16.mxu0 %vm999_vm11, %v4288_v29 }
  0xc7   : > { %v847_v32 = vpop.permute.xlu1 %846  ;;  %v812_v33 = vpop.permute.xlu0 %811  ;;  %v4343_v54 = vld [vmem:[#allocation2 + $0x30] sm:$0xff]  }
  0xc8   : > { %v857_v35 = vsel %vm4185_vm10, %v847_v32, %v856_v30  ;;  %v821_v36 = vsel %vm4180_vm9, %v812_v33, %v820_v31  ;;  %v4298_v37 = vld [vmem:[#allocation2 + $0x34] sm:$0xff]  }
  0xc9   : > { %858 = vst [vmem:[#allocation2 + $0x6c] sm:$0xf] %v857_v35  ;;  %822 = vst [vmem:[#allocation2 + $0x8] sm:$0x1] %v821_v36  ;;  %3518 = vmatmul.mubr.msk.bf16.gmra.mxu0 %vm999_vm11, %v4298_v37  ;;  %v4347_v57 = vld [vmem:[#allocation2 + $0x38] sm:$0xff]   ;;  %v4361_v61 = vld [vmem:[#allocation2 + $0x30] sm:$0xff]  }
  0xca   : > { %3561 = vmatprep.mubr.msk.bf16.mxu0 %vm999_vm11, %v4300_v38  ;;  %v4373_v62 = vld [vmem:[#allocation2 + $0x38] sm:$0xff]  }
  0xcb   : > { %v851_v41 = vpop.permute.xlu0 %850  ;;  %v849_v42 = vpop.permute.xlu1 %848 }
  0xcc   : > { %v4306_v17 = vld [vmem:[#allocation2] sm:$0xff]   ;;  %v861_v43 = vsel %vm4180_vm9, %v851_v41, %v860_v39  ;;  %859 = vst.msk [vmem:[#allocation2 + $0x70] sm:$0xf] %vm460_vm0, %v849_v42  ;;  %vm2930_vm0 = vcmask 130144  }
  0xcd   : > { %862 = vst [vmem:[#allocation2 + $0x74] sm:$0x1] %v861_v43  ;;  %3535 = vmatprep.mubr.msk.bf16.mxu1 %vm999_vm11, %v4306_v17 }
  0xd0   : > { %v4315_v45 = vld [vmem:[#allocation2 + $0x8] sm:$0xff]  }
  0xd1   : > { %3536 = vmatmul.mubr.msk.bf16.vlgmr.msra.gmra.mxu1 %vm999_vm11, %v4315_v45  ;;  %3562 = vmatmul.mubr.msk.bf16.vlgmr.msra.gmra.mxu0 %vm999_vm11, %v4313_v44  ;;  %v4395_v7 = vld [vmem:[#allocation2 + $0x68] sm:$0xff]  }
  0xd2   : > { %3586 = vmatpush3.bf16.msra.mxu1 %v1624_v46  ;;  %3539 = vmatprep.mubr.msk.bf16.mxu1 %vm999_vm11, %v4319_v48 }
  0xd3   : > { %3565 = vmatprep.mubr.msk.bf16.mxu0 %vm999_vm11, %v4327_v15  ;;  %3612 = vmatpush3.bf16.msra.mxu0 %v1756_v49 }
  0xd4   : > { %3749 = vmatprep.subr.msk.bf16.mxu1 %vm1036_vm4, %v3249_v51  ;;  %3750 = vmatprep.subr.msk.bf16.mxu0 %vm1036_vm4, %v3263_v53  ;;  %v4405_v8 = vld [vmem:[#allocation2 + $0x70] sm:$0xff]  }
  0xd9   : > { %3540 = vmatmul.mubr.msk.bf16.gmra.mxu1 %vm999_vm11, %v4341_v52  ;;  %3566 = vmatmul.mubr.msk.bf16.gmra.mxu0 %vm999_vm11, %v4343_v54 }
  0xda   : > { %3543 = vmatprep.mubr.msk.bf16.mxu1 %vm999_vm11, %v4345_v56  ;;  %3569 = vmatprep.mubr.msk.bf16.mxu0 %vm999_vm11, %v4347_v57 }
  0xe1   : > { %3544 = vmatmul.mubr.msk.bf16.gmra.mxu1 %vm999_vm11, %v4357_v58  ;;  %3570 = vmatmul.mubr.msk.bf16.gmra.mxu0 %vm999_vm11, %v4359_v60 }
  0xe2   : > { %3547 = vmatprep.mubr.msk.bf16.mxu1 %vm999_vm11, %v4361_v61  ;;  %3573 = vmatprep.mubr.msk.bf16.mxu0 %vm999_vm11, %v4363_v23 }
  0xe9   : > { %3548 = vmatmul.mubr.msk.bf16.gmra.mxu1 %vm999_vm11, %v4373_v62  ;;  %3574 = vmatmul.mubr.msk.bf16.gmra.mxu0 %vm999_vm11, %v4375_v63 }
  0xea   : > { %3551 = vmatprep.mubr.msk.bf16.mxu1 %vm999_vm11, %v4377_v0  ;;  %3577 = vmatprep.mubr.msk.bf16.mxu0 %vm999_vm11, %v4379_v1 }
  0xf1   : > { %3552 = vmatmul.mubr.msk.bf16.gmra.mxu1 %vm999_vm11, %v4389_v3  ;;  %3578 = vmatmul.mubr.msk.bf16.gmra.mxu0 %vm999_vm11, %v4391_v4 }
  0xf2   : > { %3555 = vmatprep.mubr.msk.bf16.mxu1 %vm999_vm11, %v4393_v5  ;;  %3581 = vmatprep.mubr.msk.bf16.mxu0 %vm999_vm11, %v4395_v7 }
  0xf9   : > { %3556 = vmatmul.mubr.msk.bf16.gmra.mxu1 %vm999_vm11, %v4407_v9  ;;  %3582 = vmatmul.mubr.msk.bf16.gmra.mxu0 %vm999_vm11, %v4405_v8 }
  0xfa   : > { %3587 = vmatprep.mubr.msk.bf16.mxu1 %vm999_vm11, %v4206_v47  ;;  %3613 = vmatprep.mubr.msk.bf16.mxu0 %vm999_vm11, %v4306_v17 }
 0x101   : > { %3588 = vmatmul.mubr.msk.bf16.vlgmr.msra.gmra.mxu1 %vm999_vm11, %v4212_v50  ;;  %3614 = vmatmul.mubr.msk.bf16.vlgmr.msra.gmra.mxu0 %vm999_vm11, %v4315_v45 }
 0x102   : > { %3638 = vmatpush3.bf16.msra.mxu1 %v1890_v10  ;;  %3591 = vmatprep.mubr.msk.bf16.mxu1 %vm999_vm11, %v4253_v2  ;;  %v3345_v10 = vld [vmem:[%s4035_s12] sm:$0xff]  }
 0x103   : > { %3617 = vmatprep.mubr.msk.bf16.mxu0 %vm999_vm11, %v4319_v48  ;;  %3664 = vmatpush3.bf16.msra.mxu0 %v2147_v11 }
 0x104   : > { %3751 = vmatprep.subr.msk.bf16.mxu1 %vm1036_vm4, %v3262_v13  ;;  %3752 = vmatprep.subr.msk.bf16.mxu0 %vm1036_vm4, %v3288_v14 }
 0x109   : > { %3592 = vmatmul.mubr.msk.bf16.gmra.mxu1 %vm999_vm11, %v4269_v12  ;;  %3618 = vmatmul.mubr.msk.bf16.gmra.mxu0 %vm999_vm11, %v4341_v52 }
 0x10a   : > { %3595 = vmatprep.mubr.msk.bf16.mxu1 %vm999_vm11, %v4288_v29  ;;  %3621 = vmatprep.mubr.msk.bf16.mxu0 %vm999_vm11, %v4345_v56 }
 0x111   : > { %3596 = vmatmul.mubr.msk.bf16.gmra.mxu1 %vm999_vm11, %v4298_v37  ;;  %3622 = vmatmul.mubr.msk.bf16.gmra.mxu0 %vm999_vm11, %v4357_v58 }
 0x112   : > { %3599 = vmatprep.mubr.msk.bf16.mxu1 %vm999_vm11, %v4225_v55  ;;  %3625 = vmatprep.mubr.msk.bf16.mxu0 %vm999_vm11, %v4361_v61 }
 0x119   : > { %3600 = vmatmul.mubr.msk.bf16.gmra.mxu1 %vm999_vm11, %v4229_v34  ;;  %3626 = vmatmul.mubr.msk.bf16.gmra.mxu0 %vm999_vm11, %v4373_v62 }
 0x11a   : > { %3603 = vmatprep.mubr.msk.bf16.mxu1 %vm999_vm11, %v4242_v59  ;;  %3629 = vmatprep.mubr.msk.bf16.mxu0 %vm999_vm11, %v4377_v0 }
 0x121   : > { %3604 = vmatmul.mubr.msk.bf16.gmra.mxu1 %vm999_vm11, %v4259_v6  ;;  %3630 = vmatmul.mubr.msk.bf16.gmra.mxu0 %vm999_vm11, %v4389_v3 }
 0x122   : > { %3607 = vmatprep.mubr.msk.bf16.mxu1 %vm999_vm11, %v4276_v40  ;;  %3633 = vmatprep.mubr.msk.bf16.mxu0 %vm999_vm11, %v4393_v5 }
 0x129   : > { %3608 = vmatmul.mubr.msk.bf16.gmra.mxu1 %vm999_vm11, %v4283_v27  ;;  %3634 = vmatmul.mubr.msk.bf16.gmra.mxu0 %vm999_vm11, %v4407_v9 }
 0x12a   : > { %3639 = vmatprep.mubr.msk.bf16.mxu1 %vm999_vm11, %v4300_v38  ;;  %3665 = vmatprep.mubr.msk.bf16.mxu0 %vm999_vm11, %v4206_v47 }
 0x131   : > { %3640 = vmatmul.mubr.msk.bf16.vlgmr.msra.gmra.mxu1 %vm999_vm11, %v4313_v44  ;;  %3666 = vmatmul.mubr.msk.bf16.vlgmr.msra.gmra.mxu0 %vm999_vm11, %v4212_v50 }
 0x132   : > { %3690 = vmatpush3.bf16.msra.mxu1 %v2279_v16  ;;  %3643 = vmatprep.mubr.msk.bf16.mxu1 %vm999_vm11, %v4327_v15  ;;  %v3346_v16 = vunpack.c.l.bf16 %v3345_v10 }
 0x133   : > { %3669 = vmatprep.mubr.msk.bf16.mxu0 %vm999_vm11, %v4253_v2  ;;  %3716 = vmatpush3.bf16.msra.mxu0 %v2413_v18 }
 0x139   : > { %3644 = vmatmul.mubr.msk.bf16.gmra.mxu1 %vm999_vm11, %v4343_v54  ;;  %3670 = vmatmul.mubr.msk.bf16.gmra.mxu0 %vm999_vm11, %v4269_v12 }
 0x13a   : > { %3647 = vmatprep.mubr.msk.bf16.mxu1 %vm999_vm11, %v4347_v57  ;;  %3673 = vmatprep.mubr.msk.bf16.mxu0 %vm999_vm11, %v4288_v29 }
 0x141   : > { %3648 = vmatmul.mubr.msk.bf16.gmra.mxu1 %vm999_vm11, %v4359_v60  ;;  %3674 = vmatmul.mubr.msk.bf16.gmra.mxu0 %vm999_vm11, %v4298_v37 }
 0x142   : > { %3651 = vmatprep.mubr.msk.bf16.mxu1 %vm999_vm11, %v4363_v23  ;;  %3677 = vmatprep.mubr.msk.bf16.mxu0 %vm999_vm11, %v4225_v55 }
 0x149   : > { %3652 = vmatmul.mubr.msk.bf16.gmra.mxu1 %vm999_vm11, %v4375_v63  ;;  %3678 = vmatmul.mubr.msk.bf16.gmra.mxu0 %vm999_vm11, %v4229_v34 }
 0x14a   : > { %3655 = vmatprep.mubr.msk.bf16.mxu1 %vm999_vm11, %v4379_v1  ;;  %3681 = vmatprep.mubr.msk.bf16.mxu0 %vm999_vm11, %v4242_v59 }
 0x151   : > { %3656 = vmatmul.mubr.msk.bf16.gmra.mxu1 %vm999_vm11, %v4391_v4  ;;  %3682 = vmatmul.mubr.msk.bf16.gmra.mxu0 %vm999_vm11, %v4259_v6 }
 0x152   : > { %3659 = vmatprep.mubr.msk.bf16.mxu1 %vm999_vm11, %v4395_v7  ;;  %3685 = vmatprep.mubr.msk.bf16.mxu0 %vm999_vm11, %v4276_v40 }
 0x159   : > { %3660 = vmatmul.mubr.msk.bf16.gmra.mxu1 %vm999_vm11, %v4405_v8  ;;  %3686 = vmatmul.mubr.msk.bf16.gmra.mxu0 %vm999_vm11, %v4283_v27 }
 0x15a   : > { %3691 = vmatprep.mubr.msk.bf16.mxu1 %vm999_vm11, %v4306_v17  ;;  %3717 = vmatprep.mubr.msk.bf16.mxu0 %vm999_vm11, %v4300_v38 }
 0x161   : > { %3692 = vmatmul.mubr.msk.bf16.vlgmr.msra.gmra.mxu1 %vm999_vm11, %v4315_v45  ;;  %3718 = vmatmul.mubr.msk.bf16.vlgmr.msra.gmra.mxu0 %vm999_vm11, %v4313_v44 }
 0x162   : > { %3695 = vmatprep.mubr.msk.bf16.mxu1 %vm999_vm11, %v4319_v48  ;;  %3721 = vmatprep.mubr.msk.bf16.mxu0 %vm999_vm11, %v4327_v15 }
 0x169   : > { %v3511_v47 = vpop.f32.mrf.mxu0  ;;  %3696 = vmatmul.mubr.msk.bf16.gmra.mxu1 %vm999_vm11, %v4341_v52  ;;  %3722 = vmatmul.mubr.msk.bf16.gmra.mxu0 %vm999_vm11, %v4343_v54 }
 0x16a   : > { %3699 = vmatprep.mubr.msk.bf16.mxu1 %vm999_vm11, %v4345_v56  ;;  %3725 = vmatprep.mubr.msk.bf16.mxu0 %vm999_vm11, %v4347_v57 }
 0x16b   : > { %v1074_v55 = vpop.f32.mrf.mxu0 }
 0x16d   : > { %v3523_v50 = vpop.f32.mrf.mxu1  ;;  %v3512_v2 = vpop.f32.mrf.mxu0 }
 0x16e   : > { %v3347_v50 = vunpack.c.h.bf16 %v3345_v10 }
 0x16f   : > { %v4541_v34 = vpop.f32.mrf.mxu1  ;;  %v1077_v40 = vpop.f32.mrf.mxu0 }
 0x171   : > { %v4543_v59 = vpop.f32.mrf.mxu1  ;;  %3700 = vmatmul.mubr.msk.bf16.gmra.mxu1 %vm999_vm11, %v4357_v58  ;;  %3726 = vmatmul.mubr.msk.bf16.gmra.mxu0 %vm999_vm11, %v4359_v60 }
 0x172   : > { %3703 = vmatprep.mubr.msk.bf16.mxu1 %vm999_vm11, %v4361_v61  ;;  %3729 = vmatprep.mubr.msk.bf16.mxu0 %vm999_vm11, %v4363_v23 }
 0x173   : > { %v4553_v6 = vpop.f32.mrf.mxu1 }
 0x175   : > { %v4555_v12 = vpop.f32.mrf.mxu1 }
 0x177   : > { %v4557_v19 = vpop.f32.mrf.mxu1 }
 0x179   : > { %v3515_v20 = vpop.f32.mrf.mxu0  ;;  %v4559_v21 = vpop.f32.mrf.mxu1  ;;  %3704 = vmatmul.mubr.msk.bf16.gmra.mxu1 %vm999_vm11, %v4373_v62  ;;  %3730 = vmatmul.mubr.msk.bf16.gmra.mxu0 %vm999_vm11, %v4375_v63 }
 0x17a   : > { %3707 = vmatprep.mubr.msk.bf16.mxu1 %vm999_vm11, %v4377_v0  ;;  %3733 = vmatprep.mubr.msk.bf16.mxu0 %vm999_vm11, %v4379_v1 }
 0x17b   : > { %v1089_v22 = vpop.f32.mrf.mxu0  ;;  %v1136_v24 = vpop.f32.mrf.mxu1 }
 0x17c   : > { %v3384_v24 = vld [vmem:[%s4035_s12 + $0x10] sm:$0xff]  }
 0x17d   : > { %v3516_v25 = vpop.f32.mrf.mxu0 }
 0x17f   : > { %v1092_v26 = vpop.f32.mrf.mxu0 }
 0x181   : > { %3708 = vmatmul.mubr.msk.bf16.gmra.mxu1 %vm999_vm11, %v4389_v3  ;;  %3734 = vmatmul.mubr.msk.bf16.gmra.mxu0 %vm999_vm11, %v4391_v4 }
 0x182   : > { %3711 = vmatprep.mubr.msk.bf16.mxu1 %vm999_vm11, %v4393_v5  ;;  %3737 = vmatprep.mubr.msk.bf16.mxu0 %vm999_vm11, %v4395_v7 }
 0x184   : > { %v4577_v27 = vpop.f32.mrf.mxu1 }
 0x186   : > { %v1148_v28 = vpop.f32.mrf.mxu1 }
 0x188   : > { %v3532_v29 = vpop.f32.mrf.mxu1 }
 0x189   : > { %v3519_v30 = vpop.f32.mrf.mxu0  ;;  %3712 = vmatmul.mubr.msk.bf16.gmra.mxu1 %vm999_vm11, %v4407_v9  ;;  %3738 = vmatmul.mubr.msk.bf16.gmra.mxu0 %vm999_vm11, %v4405_v8  ;;  %v3383_v9 = vld [vmem:[%s4035_s12 + $0x8] sm:$0xff]   ;;  %v3354_v29 = vunpack.c.l.bf16 %v3384_v24 }
 0x18a   : > { %v4583_v33 = vpop.f32.mrf.mxu1  ;;  %v3350_v13 = vunpack.c.l.bf16 %v3383_v9  ;;  %v3351_v14 = vunpack.c.h.bf16 %v3383_v9 }
 0x18b   : > { %v1104_v31 = vpop.f32.mrf.mxu0 }
 0x18d   : > { %v3520_v32 = vpop.f32.mrf.mxu0 }
 0x18e   : > { %v3355_v32 = vunpack.c.h.bf16 %v3384_v24 }
 0x18f   : > { %v1106_v35 = vpop.f32.mrf.mxu0 }
 0x191   : > { %v3537_v36 = vpop.f32.mrf.mxu1  ;;  %v3563_v37 = vpop.f32.mrf.mxu0 }
 0x193   : > { %v1294_v38 = vpop.f32.mrf.mxu1  ;;  %v1516_v39 = vpop.f32.mrf.mxu0 }
 0x194   : > { %v1295_v41 = vadd.f32 %v1294_v38, %v1074_v55  ;;  %v3802_v55 = vpack.i.bf16 %v3351_v14, %v3350_v13 }
 0x195   : > { %v3538_v42 = vpop.f32.mrf.mxu1  ;;  %v3564_v17 = vpop.f32.mrf.mxu0 }
 0x196   : > { %v4585_v43 = vadd.f32 %v1516_v39, %v1295_v41  ;;  %v1305_v44 = vadd.f32 %v3538_v42, %v3512_v2  ;;  %3803 = vrot.lane.b32.xlu1 %v3802_v55, %s3915_s20  ;;  %v3807_v41 = vpack.i.bf16 %v3355_v32, %v3354_v29  ;;  %v3387_v42 = vld [vmem:[%s4035_s12 + $0x28] sm:$0xff]  }
 0x197   : > { %v1297_v45 = vpop.f32.mrf.mxu1  ;;  %v1519_v46 = vpop.f32.mrf.mxu0 }
 0x198   : > { %v4587_v48 = vadd.f32 %v3564_v17, %v1305_v44  ;;  %v1298_v49 = vadd.f32 %v1297_v45, %v1077_v40  ;;  %v3366_v44 = vunpack.c.l.bf16 %v3387_v42  ;;  %v3367_v45 = vunpack.c.h.bf16 %v3387_v42 }
 0x199   : > { %v3541_v15 = vpop.f32.mrf.mxu1  ;;  %v3567_v51 = vpop.f32.mrf.mxu0 }
 0x19a   : > { %v4589_v53 = vadd.f32 %v1519_v46, %v1298_v49  ;;  %v1317_v52 = vadd.f32 %v3541_v15, %v3515_v20  ;;  %v3797_v20 = vpack.i.bf16 %v3347_v50, %v3346_v16 }
 0x19b   : > { %v1309_v54 = vpop.f32.mrf.mxu1  ;;  %v1531_v56 = vpop.f32.mrf.mxu0 }
 0x19c   : > { %v4591_v57 = vadd.f32 %v3567_v51, %v1317_v52  ;;  %v1310_v58 = vadd.f32 %v1309_v54, %v1089_v22  ;;  %v3385_v22 = vld [vmem:[%s4035_s12 + $0x18] sm:$0xff]   ;;  %3798 = vrot.lane.b32.xlu0 %v3797_v20, %s3915_s20 }
 0x19d   : > { %v3542_v60 = vpop.f32.mrf.mxu1  ;;  %v3568_v61 = vpop.f32.mrf.mxu0  ;;  %v3358_v26 = vunpack.c.l.bf16 %v3385_v22  ;;  %v3359_v28 = vunpack.c.h.bf16 %v3385_v22 }
 0x19e   : > { %v4593_v23 = vadd.f32 %v1531_v56, %v1310_v58  ;;  %v1320_v62 = vadd.f32 %v3542_v60, %v3516_v25  ;;  %v3822_v56 = vpack.i.bf16 %v3367_v45, %v3366_v44 }
 0x19f   : > { %v1312_v63 = vpop.f32.mrf.mxu1  ;;  %v1534_v0 = vpop.f32.mrf.mxu0  ;;  %v3812_v37 = vpack.i.bf16 %v3359_v28, %v3358_v26 }
 0x1a0   : > { %v4595_v1 = vadd.f32 %v3568_v61, %v1320_v62  ;;  %3808 = vrot.lane.b32.xlu0 %v3807_v41, %s3915_s20  ;;  %v3388_v62 = vld [vmem:[%s4035_s12 + $0x30] sm:$0xff]  }
 0x1a1   : > { %v3545_v3 = vpop.f32.mrf.mxu1  ;;  %v3571_v4 = vpop.f32.mrf.mxu0  ;;  %3813 = vrot.lane.b32.xlu1 %v3812_v37, %s3915_s20 }
 0x1a2   : > { %v1332_v5 = vadd.f32 %v3545_v3, %v3519_v30 }
 0x1a3   : > { %v1324_v7 = vpop.f32.mrf.mxu1  ;;  %v1546_v8 = vpop.f32.mrf.mxu0 }
 0x1a4   : > { %v4599_v11 = vadd.f32 %v3571_v4, %v1332_v5  ;;  %v3370_v8 = vunpack.c.l.bf16 %v3388_v62 }
 0x1a5   : > { %v3546_v18 = vpop.f32.mrf.mxu1  ;;  %v3572_v47 = vpop.f32.mrf.mxu0  ;;  %3823 = vrot.lane.b32.xlu1 %v3822_v56, %s3915_s20 }
 0x1a7   : > { %v1326_v2 = vpop.f32.mrf.mxu1  ;;  %v1548_v40 = vpop.f32.mrf.mxu0 }
 0x1a8   : > { %v1327_v25 = vadd.f32 %v1326_v2, %v1106_v35  ;;  %v3386_v35 = vld [vmem:[%s4035_s12 + $0x20] sm:$0xff]  }
 0x1a9   : > { %v3549_v30 = vpop.f32.mrf.mxu1  ;;  %v3575_v31 = vpop.f32.mrf.mxu0  ;;  %v3362_v46 = vunpack.c.l.bf16 %v3386_v35  ;;  %v3363_v51 = vunpack.c.h.bf16 %v3386_v35 }
 0x1aa   : > { %v4605_v36 = vadd.f32 %v1548_v40, %v1327_v25 }
 0x1ab   : > { %v1338_v38 = vpop.f32.mrf.mxu1  ;;  %v1560_v39 = vpop.f32.mrf.mxu0  ;;  %v3817_v61 = vpack.i.bf16 %v3363_v51, %v3362_v46 }
 0x1ac   : > { %v1339_v17 = vadd.f32 %v1338_v38, %v4541_v34  ;;  %v3389_v34 = vld [vmem:[%s4035_s12 + $0x38] sm:$0xff]   ;;  %s3148_s12 = sshll.u32 %s4027_s8, 3 }
 0x1ad   : > { %v3550_v49 = vpop.f32.mrf.mxu1  ;;  %v3576_v15 = vpop.f32.mrf.mxu0  ;;  %v3374_v3 = vunpack.c.l.bf16 %v3389_v34  ;;  %v3375_v4 = vunpack.c.h.bf16 %v3389_v34  ;;  %3818 = vrot.lane.b32.xlu0 %v3817_v61, %s3915_s20  ;;  %s4680_s7 = scalar_lea.vmem %s5113_s6, %s3148_s12 }
 0x1ae   : > { %v4612_v52 = vadd.f32 %v1560_v39, %v1339_v17  ;;  %v1349_v54 = vadd.f32 %v3550_v49, %v4543_v59  ;;  %v3371_v59 = vunpack.c.h.bf16 %v3388_v62 }
 0x1af   : > { %v1341_v58 = vpop.f32.mrf.mxu1  ;;  %v1563_v60 = vpop.f32.mrf.mxu0  ;;  %v3832_v13 = vpack.i.bf16 %v3375_v4, %v3374_v3 }
 0x1b0   : > { %v4617_v63 = vadd.f32 %v3576_v15, %v1349_v54  ;;  %v1342_v0 = vadd.f32 %v1341_v58, %v4553_v6  ;;  %v3827_v18 = vpack.i.bf16 %v3371_v59, %v3370_v8 }
 0x1b1   : > { %v3553_v5 = vpop.f32.mrf.mxu1  ;;  %v3579_v7 = vpop.f32.mrf.mxu0  ;;  %3833 = vrot.lane.b32.xlu1 %v3832_v13, %s3915_s20 }
 0x1b2   : > { %v4622_v9 = vadd.f32 %v1563_v60, %v1342_v0  ;;  %v1361_v10 = vadd.f32 %v3553_v5, %v4555_v12  ;;  %3828 = vrot.lane.b32.xlu0 %v3827_v18, %s3915_s20 }
 0x1b3   : > { %v1353_v14 = vpop.f32.mrf.mxu1  ;;  %v1575_v16 = vpop.f32.mrf.mxu0 }
 0x1b4   : > { %v4625_v47 = vadd.f32 %v3579_v7, %v1361_v10  ;;  %v1354_v6 = vadd.f32 %v1353_v14, %v4557_v19 }
 0x1b5   : > { %v3554_v50 = vpop.f32.mrf.mxu1  ;;  %v3580_v55 = vpop.f32.mrf.mxu0 }
 0x1b6   : > { %v4630_v2 = vadd.f32 %v1575_v16, %v1354_v6  ;;  %v1364_v40 = vadd.f32 %v3554_v50, %v4559_v21 }
 0x1b7   : > { %v1356_v20 = vpop.f32.mrf.mxu1  ;;  %v1578_v12 = vpop.f32.mrf.mxu0 }
 0x1b8   : > { %v4633_v22 = vadd.f32 %v3580_v55, %v1364_v40 }
 0x1b9   : > { %v3557_v24 = vpop.f32.mrf.mxu1  ;;  %v3583_v25 = vpop.f32.mrf.mxu0 }
 0x1ba   : > { %v1376_v26 = vadd.f32 %v3557_v24, %v4577_v27 }
 0x1bb   : > { %v1368_v28 = vpop.f32.mrf.mxu1  ;;  %v1590_v19 = vpop.f32.mrf.mxu0 }
 0x1bc   : > { %v4636_v29 = vadd.f32 %v3583_v25, %v1376_v26 }
 0x1bd   : > { %v3558_v30 = vpop.f32.mrf.mxu1  ;;  %v3584_v31 = vpop.f32.mrf.mxu0 }
 0x1bf   : > { %v1370_v32 = vpop.f32.mrf.mxu1  ;;  %v1592_v37 = vpop.f32.mrf.mxu0 }
 0x1c0   : > { %v1371_v38 = vadd.f32 %v1370_v32, %v4583_v33  ;;  %v4685_v32 = vld [vmem:[%s4675_s28] sm:$0xff]  }
 0x1c1   : > { %v3589_v39 = vpop.f32.mrf.mxu1  ;;  %v3615_v21 = vpop.f32.mrf.mxu0 }
 0x1c2   : > { %v4639_v41 = vadd.f32 %v1592_v37, %v1371_v38  ;;  %v4641_v42 = vadd.f32 %v3615_v21, %v3589_v39  ;;  %v3315_v39 = vunpack.c.h.bf16 %v4685_v32 }
 0x1c3   : > { %v1660_v35 = vpop.f32.mrf.mxu1  ;;  %v1792_v17 = vpop.f32.mrf.mxu0 }
 0x1c4   : > { %v4643_v44 = vadd.f32 %v1792_v17, %v1660_v35  ;;  %2738 = vst.msk [vmem:[%s4680_s7 + $0x8] sm:$0xff] %vm2736_vm12, %v3315_v39 }
 0x1c5   : > { %v3590_v27 = vpop.f32.mrf.mxu1  ;;  %v3616_v45 = vpop.f32.mrf.mxu0 }
 0x1c6   : > { %v4645_v46 = vadd.f32 %v3616_v45, %v3590_v27 }
 0x1c7   : > { %v1663_v49 = vpop.f32.mrf.mxu1  ;;  %v1795_v15 = vpop.f32.mrf.mxu0 }
 0x1c8   : > { %v4647_v51 = vadd.f32 %v1795_v15, %v1663_v49 }
 0x1c9   : > { %v3593_v54 = vpop.f32.mrf.mxu1  ;;  %v3619_v33 = vpop.f32.mrf.mxu0 }
 0x1ca   : > { %v4649_v56 = vadd.f32 %v3619_v33, %v3593_v54 }
 0x1cb   : > { %v1676_v58 = vpop.f32.mrf.mxu1  ;;  %v1808_v60 = vpop.f32.mrf.mxu0 }
 0x1cc   : > { %v4651_v61 = vadd.f32 %v1808_v60, %v1676_v58 }
 0x1cd   : > { %v3594_v34 = vpop.f32.mrf.mxu1  ;;  %v3620_v62 = vpop.f32.mrf.mxu0 }
 0x1ce   : > { %v4653_v0 = vadd.f32 %v3620_v62, %v3594_v34 }
 0x1cf   : > { %v1679_v3 = vpop.f32.mrf.mxu1  ;;  %v1811_v4 = vpop.f32.mrf.mxu0 }
 0x1d0   : > { %v4655_v5 = vadd.f32 %v1811_v4, %v1679_v3 }
 0x1d1   : > { %v3597_v7 = vpop.f32.mrf.mxu1  ;;  %v3623_v8 = vpop.f32.mrf.mxu0 }
 0x1d2   : > { %v4657_v59 = vadd.f32 %v3623_v8, %v3597_v7 }
 0x1d3   : > { %v1692_v10 = vpop.f32.mrf.mxu1  ;;  %v1824_v13 = vpop.f32.mrf.mxu0 }
 0x1d4   : > { %v4659_v14 = vadd.f32 %v1824_v13, %v1692_v10 }
 0x1d5   : > { %v3598_v16 = vpop.f32.mrf.mxu1  ;;  %v3624_v18 = vpop.f32.mrf.mxu0 }
 0x1d6   : > { %v4661_v6 = vadd.f32 %v3624_v18, %v3598_v16 }
 0x1d7   : > { %v1695_v50 = vpop.f32.mrf.mxu1  ;;  %v1827_v55 = vpop.f32.mrf.mxu0 }
 0x1d8   : > { %v4663_v40 = vadd.f32 %v1827_v55, %v1695_v50 }
 0x1d9   : > { %v3601_v20 = vpop.f32.mrf.mxu1  ;;  %v3627_v12 = vpop.f32.mrf.mxu0 }
 0x1da   : > { %v4665_v24 = vadd.f32 %v3627_v12, %v3601_v20 }
 0x1db   : > { %v1708_v25 = vpop.f32.mrf.mxu1  ;;  %v1840_v26 = vpop.f32.mrf.mxu0 }
 0x1dc   : > { %v4668_v28 = vadd.f32 %v1840_v26, %v1708_v25 }
 0x1dd   : > { %v3602_v19 = vpop.f32.mrf.mxu1  ;;  %v3628_v30 = vpop.f32.mrf.mxu0 }
 0x1de   : > { %v4682_v31 = vadd.f32 %v3628_v30, %v3602_v19 }
 0x1df   : > { %v1711_v37 = vpop.f32.mrf.mxu1  ;;  %v1843_v38 = vpop.f32.mrf.mxu0 }
 0x1e0   : > { %v4688_v21 = vadd.f32 %v1843_v38, %v1711_v37 }
 0x1e1   : > { %v3605_v35 = vpop.f32.mrf.mxu1  ;;  %v3631_v17 = vpop.f32.mrf.mxu0 }
 0x1e2   : > { %v4692_v27 = vadd.f32 %v3631_v17, %v3605_v35 }
 0x1e3   : > { %v1724_v45 = vpop.f32.mrf.mxu1  ;;  %v1856_v49 = vpop.f32.mrf.mxu0 }
 0x1e4   : > { %v4694_v15 = vadd.f32 %v1856_v49, %v1724_v45 }
 0x1e5   : > { %v3606_v54 = vpop.f32.mrf.mxu1  ;;  %v3632_v33 = vpop.f32.mrf.mxu0 }
 0x1e6   : > { %v4696_v58 = vadd.f32 %v3632_v33, %v3606_v54 }
 0x1e7   : > { %v1727_v60 = vpop.f32.mrf.mxu1  ;;  %v1859_v34 = vpop.f32.mrf.mxu0 }
 0x1e8   : > { %v4698_v62 = vadd.f32 %v1859_v34, %v1727_v60 }
 0x1e9   : > { %v3609_v3 = vpop.f32.mrf.mxu1  ;;  %v3635_v4 = vpop.f32.mrf.mxu0 }
 0x1ea   : > { %v4700_v7 = vadd.f32 %v3635_v4, %v3609_v3 }
 0x1eb   : > { %v1740_v8 = vpop.f32.mrf.mxu1  ;;  %v1872_v10 = vpop.f32.mrf.mxu0 }
 0x1ec   : > { %v4702_v13 = vadd.f32 %v1872_v10, %v1740_v8 }
 0x1ed   : > { %v3610_v16 = vpop.f32.mrf.mxu1  ;;  %v3636_v18 = vpop.f32.mrf.mxu0 }
 0x1ee   : > { %v4704_v50 = vadd.f32 %v3636_v18, %v3610_v16 }
 0x1ef   : > { %v1743_v55 = vpop.f32.mrf.mxu1  ;;  %v1875_v20 = vpop.f32.mrf.mxu0 }
 0x1f0   : > { %v4706_v12 = vadd.f32 %v1875_v20, %v1743_v55 }
 0x1f1   : > { %v3641_v25 = vpop.f32.mrf.mxu1  ;;  %v4708_v26 = vpop.f32.mrf.mxu0 }
 0x1f2   : > { %v2023_v39 = vadd.f32 %v3641_v25, %v4641_v42 }
 0x1f3   : > { %v1926_v19 = vpop.f32.mrf.mxu1  ;;  %v4710_v30 = vpop.f32.mrf.mxu0 }
 0x1f4   : > { %v2021_v35 = vadd.f32 %v1926_v19, %v4643_v44  ;;  %v2073_v60 = vrot.slane %v2023_v39, 1 }
 0x1f5   : > { %v3642_v37 = vpop.f32.mrf.mxu1  ;;  %v4712_v38 = vpop.f32.mrf.mxu0 }
 0x1f6   : > { %v2070_v34 = vrot.slane %v2021_v35, 1  ;;  %v2024_v3 = vadd.f32 %v3642_v37, %v4645_v46 }
 0x1f7   : > { %v1929_v17 = vpop.f32.mrf.mxu1  ;;  %v4716_v45 = vpop.f32.mrf.mxu0 }
 0x1f8   : > { %v2022_v49 = vadd.f32 %v1929_v17, %v4647_v51  ;;  %v2075_v25 = vrot.slane %v2024_v3, 1 }
 0x1f9   : > { %v3645_v54 = vpop.f32.mrf.mxu1  ;;  %v4719_v33 = vpop.f32.mrf.mxu0 }
 0x1fa   : > { %v2071_v4 = vrot.slane %v2022_v49, 1  ;;  %v2027_v16 = vadd.f32 %v3645_v54, %v4649_v56 }
 0x1fb   : > { %v1942_v8 = vpop.f32.mrf.mxu1  ;;  %v4722_v10 = vpop.f32.mrf.mxu0 }
 0x1fc   : > { %v2072_v42 = vsel %vm2069_vm13, %v2070_v34, %v2071_v4  ;;  %v2074_v44 = vsel %vm2069_vm13, %v2071_v4, %v2073_v60  ;;  %v2025_v51 = vadd.f32 %v1942_v8, %v4651_v61  ;;  %v2080_v17 = vrot.slane %v2027_v16, 1 }
 0x1fd   : > { %v4729_v18 = vadd.f32 %v2072_v42, %v4585_v43  ;;  %v4732_v55 = vadd.f32 %v2074_v44, %v4589_v53  ;;  %v3646_v20 = vpop.f32.mrf.mxu1  ;;  %v4734_v46 = vpop.f32.mrf.mxu0 }
 0x1fe   : > { %v2076_v19 = vrot.slane %v2025_v51, 1  ;;  %v2028_v37 = vadd.f32 %v3646_v20, %v4653_v0 }
 0x1ff   : > { %v1945_v39 = vpop.f32.mrf.mxu1  ;;  %v4737_v35 = vpop.f32.mrf.mxu0 }
 0x200   : > { %v2077_v56 = vsel %vm2069_vm13, %v2075_v25, %v2076_v19  ;;  %v2081_v61 = vrot.slane %v2028_v37, 1  ;;  %v2026_v43 = vadd.f32 %v1945_v39, %v4655_v5 }
 0x201   : > { %v4742_v49 = vadd.f32 %v2077_v56, %v4587_v48  ;;  %v3649_v53 = vpop.f32.mrf.mxu1  ;;  %v4744_v54 = vpop.f32.mrf.mxu0 }
 0x202   : > { %v2082_v60 = vsel %vm2069_vm13, %v2080_v17, %v2081_v61  ;;  %v2078_v34 = vrot.slane %v2026_v43, 1  ;;  %v2031_v42 = vadd.f32 %v3649_v53, %v4657_v59 }
 0x203   : > { %v4748_v0 = vadd.f32 %v2082_v60, %v4591_v57  ;;  %v1958_v3 = vpop.f32.mrf.mxu1  ;;  %v4750_v4 = vpop.f32.mrf.mxu0 }
 0x204   : > { %v2079_v8 = vsel %vm2069_vm13, %v2076_v19, %v2078_v34  ;;  %v2029_v5 = vadd.f32 %v1958_v3, %v4659_v14  ;;  %v2086_v37 = vrot.slane %v2031_v42, 1 }
 0x205   : > { %v4756_v48 = vadd.f32 %v2079_v8, %v4593_v23  ;;  %v3650_v44 = vpop.f32.mrf.mxu1  ;;  %v4758_v16 = vpop.f32.mrf.mxu0 }
 0x206   : > { %v2083_v51 = vrot.slane %v2029_v5, 1  ;;  %v2032_v20 = vadd.f32 %v3650_v44, %v4661_v6 }
 0x207   : > { %v1961_v57 = vpop.f32.mrf.mxu1  ;;  %v4761_v25 = vpop.f32.mrf.mxu0 }
 0x208   : > { %v2084_v39 = vsel %vm2069_vm13, %v2081_v61, %v2083_v51  ;;  %v2088_v19 = vrot.slane %v2032_v20, 1  ;;  %v2030_v59 = vadd.f32 %v1961_v57, %v4663_v40 }
 0x209   : > { %v4766_v14 = vadd.f32 %v2084_v39, %v4595_v1  ;;  %v3653_v23 = vpop.f32.mrf.mxu1  ;;  %v4768_v17 = vpop.f32.mrf.mxu0 }
 0x20a   : > { %v2089_v56 = vsel %vm2069_vm13, %v2086_v37, %v2088_v19  ;;  %v2085_v43 = vrot.slane %v2030_v59, 1  ;;  %v2035_v3 = vadd.f32 %v3653_v23, %v4665_v24 }
 0x20b   : > { %v4772_v6 = vadd.f32 %v2089_v56, %v4599_v11  ;;  %v1974_v53 = vpop.f32.mrf.mxu1  ;;  %v4774_v60 = vpop.f32.mrf.mxu0 }
 0x20c   : > { %v2087_v61 = vsel %vm2069_vm13, %v2085_v43, %v2086_v37  ;;  %v2033_v8 = vadd.f32 %v1974_v53, %v4668_v28  ;;  %v2093_v20 = vrot.slane %v2035_v3, 1 }
 0x20d   : > { %v4778_v34 = vadd.f32 %v2087_v61, %v4605_v36  ;;  %v3654_v40 = vpop.f32.mrf.mxu1  ;;  %v4780_v1 = vpop.f32.mrf.mxu0 }
 0x20e   : > { %v2090_v57 = vrot.slane %v2033_v8, 1  ;;  %v2036_v36 = vadd.f32 %v3654_v40, %v4682_v31 }
 0x20f   : > { %v1977_v42 = vpop.f32.mrf.mxu1  ;;  %v4784_v5 = vpop.f32.mrf.mxu0 }
 0x210   : > { %v2034_v11 = vadd.f32 %v1977_v42, %v4688_v21  ;;  %v2095_v53 = vrot.slane %v2036_v36, 1  ;;  %v4815_v36 = vpop.permute.xlu1 %3803 }
 0x211   : > { %v3657_v44 = vpop.f32.mrf.mxu1  ;;  %v4787_v51 = vpop.f32.mrf.mxu0 }
 0x212   : > { %v2091_v37 = vrot.slane %v2034_v11, 1  ;;  %v2039_v59 = vadd.f32 %v3657_v44, %v4692_v27 }
 0x213   : > { %v1990_v39 = vpop.f32.mrf.mxu1  ;;  %v4790_v19 = vpop.f32.mrf.mxu0 }
 0x214   : > { %v2092_v24 = vsel %vm2069_vm13, %v2090_v57, %v2091_v37  ;;  %v2094_v28 = vsel %vm2069_vm13, %v2091_v37, %v2093_v20  ;;  %v2037_v23 = vadd.f32 %v1990_v39, %v4694_v15  ;;  %v2100_v42 = vrot.slane %v2039_v59, 1 }
 0x215   : > { %v4797_v21 = vadd.f32 %v2092_v24, %v4612_v52  ;;  %v4800_v56 = vadd.f32 %v2094_v28, %v4622_v9  ;;  %v3658_v43 = vpop.f32.mrf.mxu1  ;;  %v4802_v31 = vpop.f32.mrf.mxu0 }
 0x216   : > { %v2096_v61 = vrot.slane %v2037_v23, 1  ;;  %v2040_v40 = vadd.f32 %v3658_v43, %v4696_v58  ;;  %v3799_v28 = vpop.permute.xlu0 %3798 }
 0x217   : > { %v1993_v3 = vpop.f32.mrf.mxu1  ;;  %v4805_v8 = vpop.f32.mrf.mxu0 }
 0x218   : > { %v2097_v27 = vsel %vm2069_vm13, %v2095_v53, %v2096_v61  ;;  %v2101_v15 = vrot.slane %v2040_v40, 1  ;;  %v2038_v52 = vadd.f32 %v1993_v3, %v4698_v62 }
 0x219   : > { %v4810_v11 = vadd.f32 %v2097_v27, %v4617_v63  ;;  %v3661_v9 = vpop.f32.mrf.mxu1  ;;  %v4812_v44 = vpop.f32.mrf.mxu0 }
 0x21a   : > { %v2102_v20 = vsel %vm2069_vm13, %v2100_v42, %v2101_v15  ;;  %v2098_v57 = vrot.slane %v2038_v52, 1  ;;  %v2043_v63 = vadd.f32 %v3661_v9, %v4700_v7  ;;  %v4839_v52 = vpop.permute.xlu0 %3808 }
 0x21b   : > { %v4818_v58 = vadd.f32 %v2102_v20, %v4625_v47  ;;  %v2006_v37 = vpop.f32.mrf.mxu1  ;;  %v4820_v39 = vpop.f32.mrf.mxu0  ;;  %v3801_v47 = vunpack.i.h.bf16 %v3799_v28 }
 0x21c   : > { %v2099_v62 = vsel %vm2069_vm13, %v2096_v61, %v2098_v57  ;;  %v2041_v24 = vadd.f32 %v2006_v37, %v4702_v13  ;;  %v2106_v7 = vrot.slane %v2043_v63, 1 }
 0x21d   : > { %v4826_v59 = vadd.f32 %v2099_v62, %v4630_v2  ;;  %v3662_v23 = vpop.f32.mrf.mxu1  ;;  %v4828_v43 = vpop.f32.mrf.mxu0  ;;  %2851 = vst.msk [vmem:[%s4680_s7 + $0x8] sm:$0xff] %vm2849_vm14, %v3801_v47 }
 0x21e   : > { %v2103_v53 = vrot.slane %v2041_v24, 1  ;;  %v2044_v40 = vadd.f32 %v3662_v23, %v4704_v50  ;;  %v4837_v2 = vpop.permute.xlu1 %3813 }
 0x21f   : > { %v2009_v3 = vpop.f32.mrf.mxu1  ;;  %v4831_v42 = vpop.f32.mrf.mxu0 }
 0x220   : > { %v2104_v13 = vsel %vm2069_vm13, %v2101_v15, %v2103_v53  ;;  %v2108_v61 = vrot.slane %v2044_v40, 1  ;;  %v2042_v27 = vadd.f32 %v2009_v3, %v4706_v12  ;;  %v3806_v40 = vunpack.i.h.bf16 %v4815_v36 }
 0x221   : > { %v4842_v9 = vadd.f32 %v2104_v13, %v4633_v22  ;;  %v3693_v20 = vpop.f32.mrf.mxu1  ;;  %v3719_v50 = vpop.f32.mrf.mxu0  ;;  %v3800_v3 = vunpack.i.l.bf16 %v3799_v28  ;;  %v3376_v13 = vld [vmem:[%s4675_s28 + $0x8] sm:$0xff]   ;;  %v3815_v28 = vunpack.i.l.bf16 %v4837_v2 }
 0x222   : > { %v2109_v57 = vsel %vm2069_vm13, %v2106_v7, %v2108_v61  ;;  %v2105_v37 = vrot.slane %v2042_v27, 1  ;;  %v2324_v15 = vadd.f32 %v3693_v20, %v4708_v26  ;;  %v3805_v26 = vunpack.i.l.bf16 %v4815_v36 }
 0x223   : > { %v4846_v62 = vadd.f32 %v2109_v57, %v4636_v29  ;;  %v2315_v63 = vpop.f32.mrf.mxu1  ;;  %v2449_v12 = vpop.f32.mrf.mxu0 }
 0x224   : > { %v2107_v24 = vsel %vm2069_vm13, %v2105_v37, %v2106_v7  ;;  %v2316_v23 = vadd.f32 %v2315_v63, %v4710_v30  ;;  %v4859_v7 = vpop.permute.xlu1 %3823  ;;  %v4861_v30 = vpop.permute.xlu0 %3818  ;;  %v2546_v27 = vadd.f32 %v3719_v50, %v2324_v15  ;;  %v3319_v37 = vunpack.c.h.bf16 %v3376_v13 }
 0x225   : > { %v4852_v22 = vadd.f32 %v2107_v24, %v4639_v41  ;;  %v3694_v47 = vpop.f32.mrf.mxu1  ;;  %v3720_v53 = vpop.f32.mrf.mxu0  ;;  %v3314_v41 = vunpack.c.l.bf16 %v4685_v32  ;;  %v3811_v24 = vunpack.i.h.bf16 %v4839_v52 }
 0x226   : > { %v2327_v29 = vadd.f32 %v3694_v47, %v4712_v38  ;;  %v3318_v38 = vunpack.c.l.bf16 %v3376_v13  ;;  %v2544_v36 = vadd.f32 %v2449_v12, %v2316_v23  ;;  %v3810_v47 = vunpack.i.l.bf16 %v4839_v52  ;;  %2740 = vst.msk [vmem:[%s4680_s7 + $0x18] sm:$0xff] %vm2736_vm12, %v3319_v37  ;;  %v3378_v52 = vld [vmem:[%s4675_s28 + $0x18] sm:$0xff]  }
 0x227   : > { %v2318_v20 = vpop.f32.mrf.mxu1  ;;  %v2452_v57 = vpop.f32.mrf.mxu0  ;;  %2737 = vst.msk [vmem:[%s4680_s7] sm:$0xff] %vm2736_vm12, %v3314_v41  ;;  %v3821_v12 = vunpack.i.h.bf16 %v4861_v30  ;;  %v3326_v37 = vunpack.c.l.bf16 %v3378_v52 }
 0x228   : > { %v2319_v63 = vadd.f32 %v2318_v20, %v4716_v45  ;;  %v4870_v32 = vadd.f32 %v3720_v53, %v2327_v29  ;;  %2850 = vst.msk [vmem:[%s4680_s7] sm:$0xff] %vm2849_vm14, %v3800_v3  ;;  %v3377_v45 = vld [vmem:[%s4675_s28 + $0x10] sm:$0xff]   ;;  %v3820_v29 = vunpack.i.l.bf16 %v4861_v30  ;;  %2853 = vst.msk [vmem:[%s4680_s7 + $0x18] sm:$0xff] %vm2849_vm14, %v3806_v40  ;;  %v2596_v20 = vrot.slane %v2546_v27, 2  ;;  %v4892_v40 = vpop.permute.xlu1 %3833  ;;  %v4894_v27 = vpop.permute.xlu0 %3828 }
 0x229   : > { %v3697_v50 = vpop.f32.mrf.mxu1  ;;  %v3723_v15 = vpop.f32.mrf.mxu0  ;;  %2739 = vst.msk [vmem:[%s4680_s7 + $0x10] sm:$0xff] %vm2736_vm12, %v3318_v38  ;;  %v3322_v41 = vunpack.c.l.bf16 %v3377_v45  ;;  %v3323_v13 = vunpack.c.h.bf16 %v3377_v45  ;;  %v3327_v38 = vunpack.c.h.bf16 %v3378_v52  ;;  %2743 = vst.msk [vmem:[%s4680_s7 + $0x30] sm:$0xff] %vm2736_vm12, %v3326_v37 }
 0x22a   : > { %v2545_v23 = vadd.f32 %v2452_v57, %v2319_v63  ;;  %v2340_v53 = vadd.f32 %v3697_v50, %v4719_v33  ;;  %2852 = vst.msk [vmem:[%s4680_s7 + $0x10] sm:$0xff] %vm2849_vm14, %v3805_v26  ;;  %v2593_v57 = vrot.slane %v2544_v36, 2  ;;  %v2598_v50 = vrot.slane %v4870_v32, 2  ;;  %2856 = vst.msk [vmem:[%s4680_s7 + $0x30] sm:$0xff] %vm2849_vm14, %v3815_v28 }
 0x22b   : > { %v2331_v61 = vpop.f32.mrf.mxu1  ;;  %v2465_v3 = vpop.f32.mrf.mxu0  ;;  %2741 = vst.msk [vmem:[%s4680_s7 + $0x20] sm:$0xff] %vm2736_vm12, %v3322_v41  ;;  %2742 = vst.msk [vmem:[%s4680_s7 + $0x28] sm:$0xff] %vm2736_vm12, %v3323_v13 }
 0x22c   : > { %v2594_v33 = vrot.slane %v2545_v23, 2  ;;  %v4889_v63 = vadd.f32 %v3723_v15, %v2340_v53  ;;  %v2332_v26 = vadd.f32 %v2331_v61, %v4722_v10  ;;  %v3830_v23 = vunpack.i.l.bf16 %v4894_v27  ;;  %2854 = vst.msk [vmem:[%s4680_s7 + $0x20] sm:$0xff] %vm2849_vm14, %v3810_v47  ;;  %v3379_v10 = vld [vmem:[%s4675_s28 + $0x20] sm:$0xff]   ;;  %v3380_v61 = vld [vmem:[%s4675_s28 + $0x28] sm:$0xff]   ;;  %2855 = vst.msk [vmem:[%s4680_s7 + $0x28] sm:$0xff] %vm2849_vm14, %v3811_v24 }
 0x22d   : > { %v3698_v45 = vpop.f32.mrf.mxu1  ;;  %v3724_v52 = vpop.f32.mrf.mxu0  ;;  %2744 = vst.msk [vmem:[%s4680_s7 + $0x38] sm:$0xff] %vm2736_vm12, %v3327_v38  ;;  %v4918_v15 = vld [vmem:[%s5112_s5] ss:$0 sm:$0xff]  ;;  %v5121_v47 = vunpack.i.h.bf16 %v4837_v2  ;;  %v3330_v24 = vunpack.c.l.bf16 %v3379_v10 }
 0x22e   : > { %v2595_v32 = vsel %vm2592_vm15, %v2593_v57, %v2594_v33  ;;  %v2597_v53 = vsel %vm2592_vm15, %v2594_v33, %v2596_v20  ;;  %v2603_v41 = vrot.slane %v4889_v63, 2  ;;  %v2548_v36 = vadd.f32 %v2465_v3, %v2332_v26 }
 0x22f   : > { %2857 = vst.msk [vmem:[%s4680_s7 + $0x38] sm:$0xff] %vm2849_vm14, %v5121_v47  ;;  %v2343_v13 = vadd.f32 %v3698_v45, %v4734_v46  ;;  %v2334_v20 = vpop.f32.mrf.mxu1  ;;  %v2468_v38 = vpop.f32.mrf.mxu0  ;;  %v2650_v3 = vadd.f32 %v2597_v53, %v4732_v55  ;;  %v2649_v37 = vadd.f32 %v2595_v32, %v4729_v18  ;;  %v3331_v57 = vunpack.c.h.bf16 %v3379_v10 }
 0x230   : > { %v2599_v33 = vrot.slane %v2548_v36, 2  ;;  %v2335_v2 = vadd.f32 %v2334_v20, %v4737_v35  ;;  %v3334_v63 = vunpack.c.l.bf16 %v3380_v61  ;;  %v3335_v18 = vunpack.c.h.bf16 %v3380_v61  ;;  %v3381_v36 = vld [vmem:[%s4675_s28 + $0x30] sm:$0xff]   ;;  %2745 = vst.msk [vmem:[%s4680_s7 + $0x40] sm:$0xff] %vm2736_vm12, %v3330_v24  ;;  %v3382_v61 = vld [vmem:[%s4675_s28 + $0x38] sm:$0xff]  }
 0x231   : > { %v4932_v28 = vadd.f32 %v3724_v52, %v2343_v13  ;;  %v3701_v46 = vpop.f32.mrf.mxu1  ;;  %v3727_v26 = vpop.f32.mrf.mxu0  ;;  %v2673_v45 = vadd.f32 %v4918_v15, %v2650_v3  ;;  %v2672_v55 = vadd.f32 %v4918_v15, %v2649_v37  ;;  %2746 = vst.msk [vmem:[%s4680_s7 + $0x48] sm:$0xff] %vm2736_vm12, %v3331_v57  ;;  %v3338_v52 = vunpack.c.l.bf16 %v3381_v36 }
 0x232   : > { %v2600_v35 = vsel %vm2592_vm15, %v2598_v50, %v2599_v33  ;;  %v2549_v10 = vadd.f32 %v2468_v38, %v2335_v2  ;;  %v2356_v32 = vadd.f32 %v3701_v46, %v4744_v54  ;;  %2859 = vst.msk [vmem:[%s4680_s7 + $0x48] sm:$0xff] %vm2849_vm14, %v3821_v12  ;;  %2858 = vst.msk [vmem:[%s4680_s7 + $0x40] sm:$0xff] %vm2849_vm14, %v3820_v29  ;;  %v5122_v12 = vunpack.i.l.bf16 %v4859_v7 }
 0x233   : > { %2747 = vst.msk [vmem:[%s4680_s7 + $0x50] sm:$0xff] %vm2736_vm12, %v3334_v63  ;;  %v2604_v53 = vrot.slane %v4932_v28, 2  ;;  %v2347_v47 = vpop.f32.mrf.mxu1  ;;  %v2481_v50 = vpop.f32.mrf.mxu0  ;;  %v2689_v13 = vmax.f32 %v2673_v45, 0.0  ;;  %v2688_v20 = vmax.f32 %v2672_v55, 0.0  ;;  %v2651_v54 = vadd.f32 %v2600_v35, %v4742_v49  ;;  %2748 = vst.msk [vmem:[%s4680_s7 + $0x58] sm:$0xff] %vm2736_vm12, %v3335_v18 }
 0x234   : > { %2860 = vst.msk [vmem:[%s4680_s7 + $0x50] sm:$0xff] %vm2849_vm14, %v5122_v12  ;;  %v2601_v38 = vrot.slane %v2549_v10, 2  ;;  %v2348_v3 = vadd.f32 %v2347_v47, %v4750_v4  ;;  %v3835_v37 = vunpack.i.l.bf16 %v4892_v40  ;;  %v5123_v57 = vunpack.i.h.bf16 %v4859_v7 }
 0x235   : > { %2749 = vst.msk [vmem:[%s4680_s7 + $0x60] sm:$0xff] %vm2736_vm12, %v3338_v52  ;;  %v3339_v49 = vunpack.c.h.bf16 %v3381_v36  ;;  %v2605_v30 = vsel %vm2592_vm15, %v2603_v41, %v2604_v53  ;;  %v3702_v29 = vpop.f32.mrf.mxu1  ;;  %v3728_v2 = vpop.f32.mrf.mxu0  ;;  %2884 = vrot.lane.b32.xlu1 %v2689_v13, %s3916_s10  ;;  %2882 = vrot.lane.b32.xlu0 %v2688_v20, %s3916_s10  ;;  %v2674_v4 = vadd.f32 %v4918_v15, %v2651_v54  ;;  %v3343_v7 = vunpack.c.h.bf16 %v3382_v61 }
 0x236   : > { %2861 = vst.msk [vmem:[%s4680_s7 + $0x58] sm:$0xff] %vm2849_vm14, %v5123_v57  ;;  %2862 = vst.msk [vmem:[%s4680_s7 + $0x60] sm:$0xff] %vm2849_vm14, %v3830_v23  ;;  %v3342_v24 = vunpack.c.l.bf16 %v3382_v61  ;;  %v2602_v41 = vsel %vm2592_vm15, %v2599_v33, %v2601_v38  ;;  %v2554_v63 = vadd.f32 %v3727_v26, %v2356_v32  ;;  %v2552_v28 = vadd.f32 %v2481_v50, %v2348_v3 }
 0x237   : > { %v2359_v46 = vadd.f32 %v3702_v29, %v4758_v16  ;;  %2750 = vst.msk [vmem:[%s4680_s7 + $0x68] sm:$0xff] %vm2736_vm12, %v3339_v49  ;;  %v2350_v45 = vpop.f32.mrf.mxu1  ;;  %v2484_v55 = vpop.f32.mrf.mxu0  ;;  %v2690_v18 = vmax.f32 %v2674_v4, 0.0  ;;  %v2652_v36 = vadd.f32 %v2602_v41, %v4756_v48  ;;  %v2653_v35 = vadd.f32 %v2605_v30, %v4748_v0  ;;  %2752 = vst.msk [vmem:[%s4680_s7 + $0x78] sm:$0xff] %vm2736_vm12, %v3343_v7 }
 0x238   : > { %v5124_v23 = vunpack.i.h.bf16 %v4894_v27  ;;  %2751 = vst.msk [vmem:[%s4680_s7 + $0x70] sm:$0xff] %vm2736_vm12, %v3342_v24  ;;  %v2606_v33 = vrot.slane %v2552_v28, 2  ;;  %v2351_v16 = vadd.f32 %v2350_v45, %v4761_v25  ;;  %v5125_v10 = vunpack.i.h.bf16 %v4892_v40 }
 0x239   : > { %v2555_v26 = vadd.f32 %v3728_v2, %v2359_v46  ;;  %2864 = vst.msk [vmem:[%s4680_s7 + $0x70] sm:$0xff] %vm2849_vm14, %v3835_v37  ;;  %v3705_v48 = vpop.f32.mrf.mxu1  ;;  %v3731_v0 = vpop.f32.mrf.mxu0  ;;  %2886 = vrot.lane.b32.xlu0 %v2690_v18, %s3916_s10  ;;  %v2675_v27 = vadd.f32 %v4918_v15, %v2652_v36  ;;  %v2676_v32 = vadd.f32 %v4918_v15, %v2653_v35  ;;  %v2609_v52 = vrot.slane %v2554_v63, 2 }
 0x23a   : > { %2863 = vst.msk [vmem:[%s4680_s7 + $0x68] sm:$0xff] %vm2849_vm14, %v5124_v23  ;;  %2865 = vst.msk [vmem:[%s4680_s7 + $0x78] sm:$0xff] %vm2849_vm14, %v5125_v10  ;;  %v2607_v61 = vsel %vm2592_vm15, %v2604_v53, %v2606_v33  ;;  %v2553_v50 = vadd.f32 %v2484_v55, %v2351_v16  ;;  %v2372_v25 = vadd.f32 %v3705_v48, %v4768_v17 }
 0x23b   : > { %v2611_v47 = vrot.slane %v2555_v26, 2  ;;  %v2363_v40 = vpop.f32.mrf.mxu1  ;;  %v2497_v13 = vpop.f32.mrf.mxu0  ;;  %v2691_v20 = vmax.f32 %v2675_v27, 0.0  ;;  %v2692_v54 = vmax.f32 %v2676_v32, 0.0  ;;  %v2654_v12 = vadd.f32 %v2607_v61, %v4766_v14 }
 0x23c   : > { %v2608_v3 = vrot.slane %v2553_v50, 2  ;;  %v2364_v37 = vadd.f32 %v2363_v40, %v4774_v60  ;;  %v2558_v29 = vadd.f32 %v3731_v0, %v2372_v25 }
 0x23d   : > { %v2612_v38 = vsel %vm2592_vm15, %v2609_v52, %v2611_v47  ;;  %v3706_v57 = vpop.f32.mrf.mxu1  ;;  %v3732_v49 = vpop.f32.mrf.mxu0  ;;  %2888 = vrot.lane.b32.xlu1 %v2691_v20, %s3916_s10  ;;  %2890 = vrot.lane.b32.xlu0 %v2692_v54, %s3916_s10  ;;  %v2677_v53 = vadd.f32 %v4918_v15, %v2654_v12 }
 0x23e   : > { %v2656_v17 = vadd.f32 %v2612_v38, %v4772_v6  ;;  %v2610_v30 = vsel %vm2592_vm15, %v2608_v3, %v2609_v52  ;;  %v2556_v24 = vadd.f32 %v2497_v13, %v2364_v37  ;;  %v2375_v41 = vadd.f32 %v3706_v57, %v4780_v1 }
 0x23f   : > { %v2366_v2 = vpop.f32.mrf.mxu1  ;;  %v2500_v14 = vpop.f32.mrf.mxu0  ;;  %v2693_v4 = vmax.f32 %v2677_v53, 0.0  ;;  %v2655_v60 = vadd.f32 %v2610_v30, %v4778_v34  ;;  %v2616_v18 = vrot.slane %v2558_v29, 2 }
 0x240   : > { %v2679_v7 = vadd.f32 %v4918_v15, %v2656_v17  ;;  %v2367_v63 = vadd.f32 %v2366_v2, %v4784_v5  ;;  %v2613_v34 = vrot.slane %v2556_v24, 2  ;;  %v2559_v26 = vadd.f32 %v3732_v49, %v2375_v41 }
 0x241   : > { %v3709_v28 = vpop.f32.mrf.mxu1  ;;  %v3735_v46 = vpop.f32.mrf.mxu0  ;;  %2892 = vrot.lane.b32.xlu1 %v2693_v4, %s3916_s10  ;;  %v2678_v6 = vadd.f32 %v4918_v15, %v2655_v60 }
 0x242   : > { %v2557_v45 = vadd.f32 %v2500_v14, %v2367_v63  ;;  %v2388_v55 = vadd.f32 %v3709_v28, %v4787_v51  ;;  %v2695_v23 = vmax.f32 %v2679_v7, 0.0  ;;  %v2618_v50 = vrot.slane %v2559_v26, 2 }
 0x243   : > { %v2379_v36 = vpop.f32.mrf.mxu1  ;;  %v2513_v35 = vpop.f32.mrf.mxu0  ;;  %v2694_v33 = vmax.f32 %v2678_v6, 0.0 }
 0x244   : > { %v2614_v16 = vrot.slane %v2557_v45, 2  ;;  %v2380_v1 = vadd.f32 %v2379_v36, %v4790_v19  ;;  %v2562_v0 = vadd.f32 %v3735_v46, %v2388_v55 }
 0x245   : > { %v3710_v5 = vpop.f32.mrf.mxu1  ;;  %v3736_v10 = vpop.f32.mrf.mxu0  ;;  %2896 = vrot.lane.b32.xlu1 %v2695_v23, %s3916_s10  ;;  %2894 = vrot.lane.b32.xlu0 %v2694_v33, %s3916_s10 }
 0x246   : > { %v2615_v48 = vsel %vm2592_vm15, %v2613_v34, %v2614_v16  ;;  %v2617_v51 = vsel %vm2592_vm15, %v2614_v16, %v2616_v18  ;;  %v2560_v27 = vadd.f32 %v2513_v35, %v2380_v1  ;;  %v2391_v32 = vadd.f32 %v3710_v5, %v4802_v31 }
 0x247   : > { %v2382_v52 = vpop.f32.mrf.mxu1  ;;  %v2516_v61 = vpop.f32.mrf.mxu0  ;;  %v2658_v47 = vadd.f32 %v2617_v51, %v4800_v56  ;;  %v2657_v19 = vadd.f32 %v2615_v48, %v4797_v21  ;;  %v2623_v3 = vrot.slane %v2562_v0, 2 }
 0x248   : > { %v2619_v25 = vrot.slane %v2560_v27, 2  ;;  %v2383_v40 = vadd.f32 %v2382_v52, %v4805_v8  ;;  %v2563_v13 = vadd.f32 %v3736_v10, %v2391_v32 }
 0x249   : > { %v3713_v20 = vpop.f32.mrf.mxu1  ;;  %v3739_v54 = vpop.f32.mrf.mxu0  ;;  %v2681_v12 = vadd.f32 %v4918_v15, %v2658_v47  ;;  %v2680_v38 = vadd.f32 %v4918_v15, %v2657_v19 }
 0x24a   : > { %v2620_v31 = vsel %vm2592_vm15, %v2618_v50, %v2619_v25  ;;  %v2561_v37 = vadd.f32 %v2516_v61, %v2383_v40  ;;  %v2404_v57 = vadd.f32 %v3713_v20, %v4812_v44  ;;  %v2624_v56 = vrot.slane %v2563_v13, 2 }
 0x24b   : > { %v2395_v49 = vpop.f32.mrf.mxu1  ;;  %v2529_v21 = vpop.f32.mrf.mxu0  ;;  %v2697_v53 = vmax.f32 %v2681_v12, 0.0  ;;  %v2696_v17 = vmax.f32 %v2680_v38, 0.0  ;;  %v2659_v8 = vadd.f32 %v2620_v31, %v4810_v11 }
 0x24c   : > { %v2621_v30 = vrot.slane %v2561_v37, 2  ;;  %v2396_v29 = vadd.f32 %v2395_v49, %v4820_v39  ;;  %v2625_v2 = vsel %vm2592_vm15, %v2623_v3, %v2624_v56  ;;  %v2566_v60 = vadd.f32 %v3739_v54, %v2404_v57 }
 0x24d   : > { %v3714_v14 = vpop.f32.mrf.mxu1  ;;  %v3740_v4 = vpop.f32.mrf.mxu0  ;;  %2900 = vrot.lane.b32.xlu1 %v2697_v53, %s3916_s10  ;;  %2898 = vrot.lane.b32.xlu0 %v2696_v17, %s3916_s10  ;;  %v2682_v44 = vadd.f32 %v4918_v15, %v2659_v8  ;;  %v2661_v28 = vadd.f32 %v2625_v2, %v4818_v58 }
 0x24e   : > { %v2622_v7 = vsel %vm2592_vm15, %v2619_v25, %v2621_v30  ;;  %v2564_v24 = vadd.f32 %v2529_v21, %v2396_v29  ;;  %v2407_v41 = vadd.f32 %v3714_v14, %v4828_v43  ;;  %v2629_v35 = vrot.slane %v2566_v60, 2 }
 0x24f   : > { %v2398_v11 = vpop.f32.mrf.mxu1  ;;  %v2698_v63 = vmax.f32 %v2682_v44, 0.0  ;;  %v2660_v39 = vadd.f32 %v2622_v7, %v4826_v59  ;;  %v2532_v55 = vpop.f32.mrf.mxu0  ;;  %v2684_v36 = vadd.f32 %v4918_v15, %v2661_v28 }
 0x250   : > { %v2626_v46 = vrot.slane %v2564_v24, 2  ;;  %v2567_v6 = vadd.f32 %v3740_v4, %v2407_v41  ;;  %v2399_v45 = vadd.f32 %v2398_v11, %v4831_v42 }
 0x251   : > { %2902 = vrot.lane.b32.xlu0 %v2698_v63, %s3916_s10  ;;  %v2683_v18 = vadd.f32 %v4918_v15, %v2660_v39  ;;  %v2700_v59 = vmax.f32 %v2684_v36, 0.0 }
 0x252   : > { %v2627_v43 = vsel %vm2592_vm15, %v2624_v56, %v2626_v46  ;;  %v2631_v23 = vrot.slane %v2567_v6, 2  ;;  %v2565_v33 = vadd.f32 %v2532_v55, %v2399_v45 }
 0x253   : > { %v2699_v34 = vmax.f32 %v2683_v18, 0.0  ;;  %v2662_v58 = vadd.f32 %v2627_v43, %v4842_v9 }
 0x254   : > { %v2632_v26 = vsel %vm2592_vm15, %v2629_v35, %v2631_v23  ;;  %v2628_v16 = vrot.slane %v2565_v33, 2 }
 0x255   : > { %2904 = vrot.lane.b32.xlu1 %v2699_v34, %s3916_s10  ;;  %2906 = vrot.lane.b32.xlu0 %v2700_v59, %s3916_s10  ;;  %v2685_v42 = vadd.f32 %v4918_v15, %v2662_v58  ;;  %v2664_v1 = vadd.f32 %v2632_v26, %v4846_v62 }
 0x256   : > { %v2630_v5 = vsel %vm2592_vm15, %v2628_v16, %v2629_v35 }
 0x257   : > { %v2701_v10 = vmax.f32 %v2685_v42, 0.0  ;;  %v2687_v48 = vadd.f32 %v4918_v15, %v2664_v1  ;;  %v2663_v9 = vadd.f32 %v2630_v5, %v4852_v22 }
 0x259   : > { %2908 = vrot.lane.b32.xlu1 %v2701_v10, %s3916_s10  ;;  %v2686_v51 = vadd.f32 %v4918_v15, %v2663_v9  ;;  %v2703_v0 = vmax.f32 %v2687_v48, 0.0 }
 0x25b   : > { %v2702_v27 = vmax.f32 %v2686_v51, 0.0 }
 0x25d   : > { %2912 = vrot.lane.b32.xlu1 %v2703_v0, %s3916_s10  ;;  %2910 = vrot.lane.b32.xlu0 %v2702_v27, %s3916_s10 }
 0x2a7   : > { %v2885_v62 = vpop.permute.xlu1 %2884  ;;  %v2883_v32 = vpop.permute.xlu0 %2882 }
 0x2a8   : > { %2932 = vst.msk [vmem:[%s4680_s7 + $0x8] sm:$0xff] %vm2930_vm0, %v2885_v62  ;;  %2931 = vst.msk [vmem:[%s4680_s7] sm:$0xff] %vm2930_vm0, %v2883_v32 }
 0x2ab   : > { %v2887_v22 = vpop.permute.xlu0 %2886 }
 0x2ac   : > { %2933 = vst.msk [vmem:[%s4680_s7 + $0x10] sm:$0xff] %vm2930_vm0, %v2887_v22 }
 0x2af   : > { %v2889_v15 = vpop.permute.xlu1 %2888  ;;  %v2891_v52 = vpop.permute.xlu0 %2890 }
 0x2b0   : > { %2934 = vst.msk [vmem:[%s4680_s7 + $0x18] sm:$0xff] %vm2930_vm0, %v2889_v15  ;;  %2935 = vst.msk [vmem:[%s4680_s7 + $0x20] sm:$0xff] %vm2930_vm0, %v2891_v52 }
 0x2b3   : > { %v2893_v61 = vpop.permute.xlu1 %2892 }
 0x2b4   : > { %2936 = vst.msk [vmem:[%s4680_s7 + $0x28] sm:$0xff] %vm2930_vm0, %v2893_v61 }
 0x2b7   : > { %v2897_v47 = vpop.permute.xlu1 %2896  ;;  %v2895_v19 = vpop.permute.xlu0 %2894 }
 0x2b8   : > { %2938 = vst.msk [vmem:[%s4680_s7 + $0x38] sm:$0xff] %vm2930_vm0, %v2897_v47  ;;  %2937 = vst.msk [vmem:[%s4680_s7 + $0x30] sm:$0xff] %vm2930_vm0, %v2895_v19 }
 0x2bf   : > { %v2901_v50 = vpop.permute.xlu1 %2900  ;;  %v2899_v25 = vpop.permute.xlu0 %2898 }
 0x2c0   : > { %2940 = vst.msk [vmem:[%s4680_s7 + $0x48] sm:$0xff] %vm2930_vm0, %v2901_v50  ;;  %2939 = vst.msk [vmem:[%s4680_s7 + $0x40] sm:$0xff] %vm2930_vm0, %v2899_v25 }
 0x2c3   : > { %v2903_v40 = vpop.permute.xlu0 %2902 }
 0x2c4   : > { %2941 = vst.msk [vmem:[%s4680_s7 + $0x50] sm:$0xff] %vm2930_vm0, %v2903_v40 }
 0x2c7   : > { %v2905_v13 = vpop.permute.xlu1 %2904  ;;  %v2907_v20 = vpop.permute.xlu0 %2906 }
 0x2c8   : > { %2942 = vst.msk [vmem:[%s4680_s7 + $0x58] sm:$0xff] %vm2930_vm0, %v2905_v13  ;;  %2943 = vst.msk [vmem:[%s4680_s7 + $0x60] sm:$0xff] %vm2930_vm0, %v2907_v20 }
 0x2cb   : > { %v2909_v54 = vpop.permute.xlu1 %2908 }
 0x2cc   : > { %2944 = vst.msk [vmem:[%s4680_s7 + $0x68] sm:$0xff] %vm2930_vm0, %v2909_v54 }
 0x2cf   : > { %v2913_v12 = vpop.permute.xlu1 %2912  ;;  %v2911_v38 = vpop.permute.xlu0 %2910 }
 0x2d0   : > { %2946 = vst.msk [vmem:[%s4680_s7 + $0x78] sm:$0xff] %vm2930_vm0, %v2913_v12  ;;  %2945 = vst.msk [vmem:[%s4680_s7 + $0x70] sm:$0xff] %vm2930_vm0, %v2911_v38 }
 0x2d1 PF: > { %s16_s25 = sadd.s32 1, %s3911_s25   ;;  %s5126_s21 = smov %s3903_s23 }
 0x2d2   : > { %p13_p12 = scmp.ge.s32.totalorder %s16_s25, 6   ;;  %s5127_s22 = smov %s3907_s24 }
 0x2d3   : > { %s5128_s23 = smov %s5131_s26  ;;  %s5129_s24 = smov %s5135_s27 }
 0x2d4   :  { %15 = sbr.rel (!%p13_p12) target bundleno = 3 (0x3), region = 94 }

</bundles_post_ra>
